<compile_context>
chip_gen: v7x
topology: tpu7x:2x2x1
jax: 0.10.0
libtpu: 0.0.40
codegen_flags: <defaults>
</compile_context>

<pallas_src>
import functools

import jax
import jax.numpy as jnp
from jax import lax
from jax.experimental import pallas as pl
from jax.experimental.pallas import tpu as pltpu

BN_EPS = 1e-5
LANE = 128


def _round_up(x, m):
    return (x + m - 1) // m * m


@functools.lru_cache(maxsize=1)
def _vmem_limit_bytes():
    """Generation-aware scoped-VMEM budget (headroom kept for double-buffers)."""
    try:
        cap = int(pltpu.get_tpu_info().vmem_capacity_bytes)
    except Exception:
        return 32 * 1024 * 1024          # safe fallback
    # ~3/4 of physical VMEM, capped: v5e/v6e (128 MiB) -> 96 MiB, v7x (64 MiB) -> 48 MiB.
    return int(min((cap // 4) * 3, 96 * 1024 * 1024))


# ---------------------------------------------------------------------------
# Conv pass kernel: [optional per-channel affine + ReLU] -> 3x3 conv (pad=1)
#                   -> per-channel partial sum / sum-of-squares (for BN).
# One grid step = one image (grid over N).
# ---------------------------------------------------------------------------
def _conv3x3_stats_kernel(x_ref, scale_ref, shift_ref, w_ref,      # inputs
                          y_ref, stats_ref,                         # outputs
                          apad_ref, col_ref,                        # scratch
                          *, fuse_affine_relu, precision, H, W, Cp):
    # x_ref:       (H, W, Cp)     act dtype  one image (conv1: x, conv2: raw conv1 out)
    # scale/shift: (1, Cp)        f32        BN affine folded in front of conv2
    # w_ref:       (9*Cp, Cp)     matmul dtype, im2col weight (taps folded in K)
    # y_ref:       (H, W, Cp)     act dtype  raw conv output (pre-BN), bf16 in prod
    # stats_ref:   (2, Cp)        f32        per-image [sum, sum_sq] over H*W
    # apad_ref:    (H+2, W+2, Cp) matmul dtype, spatially padded activation
    # col_ref:     (H*W, 9*Cp)    matmul dtype, im2col buffer
    a = x_ref[...]
    if fuse_affine_relu:                      # static flag: conv2 path only
        a = jnp.maximum(a.astype(jnp.float32) * scale_ref[...] + shift_ref[...],
                        0.0)

    # Zero only the halo (interior is fully overwritten right below). Done
    # every step because each megacore core gets its own scratch buffer.
    apad_ref[0:1, :, :] = jnp.zeros((1, W + 2, Cp), apad_ref.dtype)
    apad_ref[H + 1:H + 2, :, :] = jnp.zeros((1, W + 2, Cp), apad_ref.dtype)
    apad_ref[1:H + 1, 0:1, :] = jnp.zeros((H, 1, Cp), apad_ref.dtype)
    apad_ref[1:H + 1, W + 1:W + 2, :] = jnp.zeros((H, 1, Cp), apad_ref.dtype)
    apad_ref[1:H + 1, 1:W + 1, :] = a.astype(apad_ref.dtype)

    # im2col: stage the 9 taps once (bf16 in prod -> half the store bytes),
    # then ONE MXU matmul with K = 9*Cp.
    # TODO(synk): restructure the tap staging so the (H,W,Cp)->(H*W,Cp)
    # reshape is contiguous (flatten over W+2 with junk-column masking).
    for dy in range(3):
        for dx in range(3):
            t = dy * 3 + dx
            tap = apad_ref[dy:dy + H, dx:dx + W, :].reshape(H * W, Cp)
            col_ref[:, t * Cp:(t + 1) * Cp] = tap.astype(col_ref.dtype)

    y = jnp.dot(col_ref[...], w_ref[...],
                preferred_element_type=jnp.float32,
                precision=precision)                            # (H*W, Cp) f32
    y_ref[...] = y.reshape(H, W, Cp).astype(y_ref.dtype)
    # BatchNorm statistics fused into the conv epilogue, taken from the f32
    # accumulation BEFORE the bf16 downcast.  These are per-image partials;
    # the batch-global reduction happens outside the grid so BN stays correct
    # under tiling / megacore.
    stats_ref[...] = jnp.concatenate(
        [jnp.sum(y, axis=0, keepdims=True),
         jnp.sum(y * y, axis=0, keepdims=True)], axis=0)


# ---------------------------------------------------------------------------
# Final epilogue kernel: BN2 affine + residual add + ReLU.
# ---------------------------------------------------------------------------
def _bn_add_relu_kernel(y_ref, scale_ref, shift_ref, res_ref, o_ref):
    y = y_ref[...].astype(jnp.float32)
    r = res_ref[...].astype(jnp.float32)
    o = jnp.maximum(y * scale_ref[...] + shift_ref[...] + r, 0.0)
    o_ref[...] = o.astype(o_ref.dtype)


# ---------------------------------------------------------------------------
# pallas_call wrappers
# ---------------------------------------------------------------------------
def _conv3x3_bn_stats(x, scale, shift, w_col, *, fuse_affine_relu, precision):
    N, H, W, Cp = x.shape
    K = w_col.shape[0]
    act_dtype = w_col.dtype                   # bf16 in production, f32 on the check path
    kern = functools.partial(_conv3x3_stats_kernel,
                             fuse_affine_relu=fuse_affine_relu,
                             precision=precision,
                             H=H, W=W, Cp=Cp)
    return pl.pallas_call(
        kern,
        grid=(N,),
        in_specs=[
            pl.BlockSpec((None, H, W, Cp), lambda n: (n, 0, 0, 0)),
            pl.BlockSpec((1, Cp), lambda n: (0, 0)),
            pl.BlockSpec((1, Cp), lambda n: (0, 0)),
            pl.BlockSpec((K, Cp), lambda n: (0, 0)),
        ],
        out_specs=(
            pl.BlockSpec((None, H, W, Cp), lambda n: (n, 0, 0, 0)),
            pl.BlockSpec((None, 2, Cp), lambda n: (n, 0, 0)),
        ),
        out_shape=(
            jax.ShapeDtypeStruct((N, H, W, Cp), act_dtype),       # bf16 intermediate
            jax.ShapeDtypeStruct((N, 2, Cp), jnp.float32),        # f32 BN partials
        ),
        scratch_shapes=[
            pltpu.VMEM((H + 2, W + 2, Cp), act_dtype),    # padded activation
            pltpu.VMEM((H * W, K), act_dtype),            # im2col buffer
        ],
        compiler_params=pltpu.CompilerParams(
            dimension_semantics=("parallel",),
            vmem_limit_bytes=_vmem_limit_bytes()),
    )(x, scale, shift, w_col)


def _bn_add_relu(y, scale, shift, res):
    N, H, W, Cp = y.shape
    return pl.pallas_call(
        _bn_add_relu_kernel,
        grid=(N,),
        in_specs=[
            pl.BlockSpec((None, H, W, Cp), lambda n: (n, 0, 0, 0)),
            pl.BlockSpec((1, Cp), lambda n: (0, 0)),
            pl.BlockSpec((1, Cp), lambda n: (0, 0)),
            pl.BlockSpec((None, H, W, Cp), lambda n: (n, 0, 0, 0)),
        ],
        out_specs=pl.BlockSpec((None, H, W, Cp), lambda n: (n, 0, 0, 0)),
        out_shape=jax.ShapeDtypeStruct((N, H, W, Cp), y.dtype),
        compiler_params=pltpu.CompilerParams(
            dimension_semantics=("parallel",),
            vmem_limit_bytes=_vmem_limit_bytes()),
    )(y, scale, shift, res)


def _bn_affine_from_stats(stats, gamma, beta, count):
    # stats: (N, 2, Cp) per-image partial sums -> batch-global BN affine.
    s = jnp.sum(stats, axis=0)
    mean = s[0] / count
    var = s[1] / count - mean * mean            # biased variance (training BN)
    scale = gamma * lax.rsqrt(var + BN_EPS)
    shift = beta - mean * scale
    return scale.reshape(1, -1), shift.reshape(1, -1)


# ---------------------------------------------------------------------------
# NHWC (padded-channel) entry point — the perf path.  No layout work in XLA.
#   x      : (N, H, W, Cp) activations, Cp a multiple of 128, padded channels 0.
#   w*_col : (9*Cp, Cp) im2col-folded conv weights (same dtype as x).
#   g*/b*  : (Cp,) f32 BN gamma/beta (gamma padded with 1.0, beta with 0.0).
# Returns (N, H, W, Cp) in x.dtype (padded channels stay exactly zero).
# ---------------------------------------------------------------------------
def basic_block_pallas_nhwc(x, w1_col, w2_col, g1, b1, g2, b2, *, precision=None):
    N, H, W, Cp = x.shape
    count = jnp.float32(N * H * W)
    ones = jnp.ones((1, Cp), jnp.float32)
    zeros = jnp.zeros((1, Cp), jnp.float32)

    # pass 1: conv1 + BN1 partial statistics
    y1, st1 = _conv3x3_bn_stats(x, ones, zeros, w1_col,
                                fuse_affine_relu=False, precision=precision)
    sc1, sh1 = _bn_affine_from_stats(st1, g1, b1, count)

    # pass 2: BN1 affine + ReLU fused into conv2 prologue, conv2 + BN2 stats
    y2, st2 = _conv3x3_bn_stats(y1, sc1, sh1, w2_col,
                                fuse_affine_relu=True, precision=precision)
    sc2, sh2 = _bn_affine_from_stats(st2, g2, b2, count)

    # pass 3: BN2 affine + residual add + ReLU
    return _bn_add_relu(y2, sc2, sh2, x)


# ---------------------------------------------------------------------------
# NCHW convenience wrapper (PyTorch layout).  The transposes / channel pad here
# are test-only glue for parity with the module spec; production callers should
# stay in NHWC-padded layout and call basic_block_pallas_nhwc directly.
# ---------------------------------------------------------------------------
def basic_block_pallas(x_nchw, w1, w2, gamma1, beta1, gamma2, beta2,
                       matmul_dtype=jnp.bfloat16):
    """x_nchw: (N, C, H, W); conv weights in PyTorch layout (Cout, Cin, 3, 3)."""
    N, C, H, W = x_nchw.shape
    assert w1.shape == (C, C, 3, 3) and w2.shape == (C, C, 3, 3), \
        "downsample=None requires inplanes == planes, stride == 1"
    Cp = _round_up(C, LANE)                     # lane-dense channel layout

    # HIGHEST precision only makes sense (and is only wanted) on the f32
    # strict-numerics path; with bf16 inputs default precision is the fast path.
    strict_f32 = jnp.dtype(matmul_dtype) == jnp.dtype(jnp.float32)
    precision = lax.Precision.HIGHEST if strict_f32 else None

    # NHWC, channels zero-padded to a multiple of 128, stored at matmul dtype
    # (bf16 in production -> halves HBM traffic of x / y1 / y2 / out).
    x = jnp.transpose(x_nchw, (0, 2, 3, 1))
    x = jnp.pad(x, ((0, 0), (0, 0), (0, 0), (0, Cp - C))).astype(matmul_dtype)

    def prep_w(w):
        wk = jnp.transpose(w, (2, 3, 1, 0)).astype(jnp.float32)    # (3,3,Ci,Co)
        wk = jnp.pad(wk, ((0, 0), (0, 0), (0, Cp - C), (0, Cp - C)))
        return wk.reshape(9 * Cp, Cp).astype(matmul_dtype)         # taps -> K

    def prep_gb(g, b):
        g = jnp.pad(g.astype(jnp.float32), (0, Cp - C), constant_values=1.0)
        b = jnp.pad(b.astype(jnp.float32), (0, Cp - C))
        return g, b

    w1c, w2c = prep_w(w1), prep_w(w2)
    g1p, b1p = prep_gb(gamma1, beta1)
    g2p, b2p = prep_gb(gamma2, beta2)

    out = basic_block_pallas_nhwc(x, w1c, w2c, g1p, b1p, g2p, b2p,
                                  precision=precision)
    return jnp.transpose(out[..., :C].astype(jnp.float32), (0, 3, 1, 2))  # NCHW


# ---------------- pure-JAX reference (exact module semantics) ----------------
def _bn_train(y_nchw, gamma, beta):
    mean = jnp.mean(y_nchw, axis=(0, 2, 3), keepdims=True)
    var = jnp.mean((y_nchw - mean) ** 2, axis=(0, 2, 3), keepdims=True)
    return (y_nchw - mean) * lax.rsqrt(var + BN_EPS) * \
        gamma.reshape(1, -1, 1, 1) + beta.reshape(1, -1, 1, 1)


def basic_block_ref(x, w1, w2, g1, b1, g2, b2):
    conv = functools.partial(
        lax.conv_general_dilated, window_strides=(1, 1),
        padding=((1, 1), (1, 1)),
        dimension_numbers=("NCHW", "OIHW", "NCHW"),
        precision=jax.lax.Precision.HIGHEST)
    y = jax.nn.relu(_bn_train(conv(x, w1), g1, b1))
    y = _bn_train(conv(y, w2), g2, b2)
    return jax.nn.relu(y + x)


if __name__ == "__main__":
    N, C, H, W = 2, 4, 16, 16          # inplanes = planes = 4, stride = 1
    key = jax.random.PRNGKey(0)
    kx, k1, k2 = jax.random.split(key, 3)

    x = jax.random.normal(kx, (N, C, H, W), jnp.float32)
    fan_in = C * 3 * 3
    w1 = jax.random.normal(k1, (C, C, 3, 3), jnp.float32) / jnp.sqrt(fan_in)
    w2 = jax.random.normal(k2, (C, C, 3, 3), jnp.float32) / jnp.sqrt(fan_in)
    gamma1 = jnp.ones((C,), jnp.float32)
    beta1 = jnp.zeros((C,), jnp.float32)
    gamma2 = jnp.ones((C,), jnp.float32)
    beta2 = jnp.zeros((C,), jnp.float32)

    ref = basic_block_ref(x, w1, w2, gamma1, beta1, gamma2, beta2)

    # Production configuration: bf16 MXU inputs AND bf16 HBM intermediates,
    # f32 accumulation / BN statistics / residual math -> compare against the
    # f32 reference with a bf16-rounding-sized tolerance.
    out = basic_block_pallas(x, w1, w2, gamma1, beta1, gamma2, beta2,
                             matmul_dtype=jnp.bfloat16)
    out = jax.block_until_ready(out)
    assert out.shape == (N, C, H, W)
    assert jnp.allclose(out, ref, rtol=5e-2, atol=5e-2), \
        f"bf16 path: max abs err {jnp.max(jnp.abs(out - ref))}"

    # Strict numerical check of the same kernels: f32 everywhere + HIGHEST
    # matmul precision (gated to this path only).
    out_f32 = basic_block_pallas(x, w1, w2, gamma1, beta1, gamma2, beta2,
                                 matmul_dtype=jnp.float32)
    out_f32 = jax.block_until_ready(out_f32)
    assert jnp.allclose(out_f32, ref, rtol=1e-3, atol=1e-3), \
        f"f32 path: max abs err {jnp.max(jnp.abs(out_f32 - ref))}"

    print("KERNEL_OK")
</pallas_src>

<mosaic_0001>
module attributes {stable_mosaic.version = 11 : i64} {
  func.func @_conv3x3_stats_kernel(%arg0: i32, %arg1: memref<1x16x16x128xbf16, #tpu.memory_space<vmem>>, %arg2: memref<1x128xf32, #tpu.memory_space<vmem>>, %arg3: memref<1x128xf32, #tpu.memory_space<vmem>>, %arg4: memref<1152x128xbf16, #tpu.memory_space<vmem>>, %arg5: memref<1x16x16x128xbf16, #tpu.memory_space<vmem>>, %arg6: memref<1x2x128xf32, #tpu.memory_space<vmem>>, %arg7: memref<18x18x128xbf16, #tpu.memory_space<vmem>>, %arg8: memref<256x1152xbf16, #tpu.memory_space<vmem>>) attributes {dimension_semantics = [#tpu.dimension_semantics<parallel>], iteration_bounds = array<i64: 2>, scalar_prefetch = 0 : i64, scratch_operands = 2 : i64, tpu.core_type = #tpu.core_type<tc>, window_params = [{transform_indices = @transform_0, window_bounds = array<i64: 1, 16, 16, 128>}, {pipeline_mode = #tpu.pipeline_mode<synchronous>, transform_indices = @transform_1, window_bounds = array<i64: 1, 128>}, {pipeline_mode = #tpu.pipeline_mode<synchronous>, transform_indices = @transform_2, window_bounds = array<i64: 1, 128>}, {pipeline_mode = #tpu.pipeline_mode<synchronous>, transform_indices = @transform_3, window_bounds = array<i64: 1152, 128>}, {transform_indices = @transform_4, window_bounds = array<i64: 1, 16, 16, 128>}, {transform_indices = @transform_5, window_bounds = array<i64: 1, 2, 128>}]} {
    %c0 = arith.constant 0 : index
    %c0_0 = arith.constant 0 : index
    %c0_1 = arith.constant 0 : index
    %c0_2 = arith.constant 0 : index
    %0 = vector.load %arg1[%c0, %c0_0, %c0_1, %c0_2] : memref<1x16x16x128xbf16, #tpu.memory_space<vmem>>, vector<1x16x16x128xbf16>
    %1 = vector.shape_cast %0 : vector<1x16x16x128xbf16> to vector<16x16x128xbf16>
    %cst = arith.constant 0.000000e+00 : bf16
    %2 = vector.broadcast %cst : bf16 to vector<1x18x128xbf16>
    %c0_3 = arith.constant 0 : index
    %c0_4 = arith.constant 0 : index
    %c0_5 = arith.constant 0 : index
    %3 = vector.load %arg7[%c0_3, %c0_4, %c0_5] : memref<18x18x128xbf16, #tpu.memory_space<vmem>>, vector<1x18x128xbf16>
    tpu.vector_store %arg7[%c0_3, %c0_4, %c0_5], %2 {strides = array<i32>} : memref<18x18x128xbf16, #tpu.memory_space<vmem>>, vector<1x18x128xbf16>,
    %cst_6 = arith.constant 0.000000e+00 : bf16
    %4 = vector.broadcast %cst_6 : bf16 to vector<1x18x128xbf16>
    %c17 = arith.constant 17 : index
    %c0_7 = arith.constant 0 : index
    %c0_8 = arith.constant 0 : index
    %5 = vector.load %arg7[%c17, %c0_7, %c0_8] : memref<18x18x128xbf16, #tpu.memory_space<vmem>>, vector<1x18x128xbf16>
    tpu.vector_store %arg7[%c17, %c0_7, %c0_8], %4 {strides = array<i32>} : memref<18x18x128xbf16, #tpu.memory_space<vmem>>, vector<1x18x128xbf16>,
    %cst_9 = arith.constant 0.000000e+00 : bf16
    %6 = vector.broadcast %cst_9 : bf16 to vector<16x1x128xbf16>
    %c1 = arith.constant 1 : index
    %c0_10 = arith.constant 0 : index
    %c0_11 = arith.constant 0 : index
    %7 = vector.load %arg7[%c1, %c0_10, %c0_11] : memref<18x18x128xbf16, #tpu.memory_space<vmem>>, vector<16x1x128xbf16>
    tpu.vector_store %arg7[%c1, %c0_10, %c0_11], %6 {strides = array<i32>} : memref<18x18x128xbf16, #tpu.memory_space<vmem>>, vector<16x1x128xbf16>,
    %cst_12 = arith.constant 0.000000e+00 : bf16
    %8 = vector.broadcast %cst_12 : bf16 to vector<16x1x128xbf16>
    %c1_13 = arith.constant 1 : index
    %c17_14 = arith.constant 17 : index
    %c0_15 = arith.constant 0 : index
    %9 = vector.load %arg7[%c1_13, %c17_14, %c0_15] : memref<18x18x128xbf16, #tpu.memory_space<vmem>>, vector<16x1x128xbf16>
    tpu.vector_store %arg7[%c1_13, %c17_14, %c0_15], %8 {strides = array<i32>} : memref<18x18x128xbf16, #tpu.memory_space<vmem>>, vector<16x1x128xbf16>,
    %c1_16 = arith.constant 1 : index
    %c1_17 = arith.constant 1 : index
    %c0_18 = arith.constant 0 : index
    %10 = vector.load %arg7[%c1_16, %c1_17, %c0_18] : memref<18x18x128xbf16, #tpu.memory_space<vmem>>, vector<16x16x128xbf16>
    tpu.vector_store %arg7[%c1_16, %c1_17, %c0_18], %1 {strides = array<i32>} : memref<18x18x128xbf16, #tpu.memory_space<vmem>>, vector<16x16x128xbf16>,
    %c0_19 = arith.constant 0 : index
    %c0_20 = arith.constant 0 : index
    %c0_21 = arith.constant 0 : index
    %11 = vector.load %arg7[%c0_19, %c0_20, %c0_21] : memref<18x18x128xbf16, #tpu.memory_space<vmem>>, vector<16x16x128xbf16>
    %12 = vector.shape_cast %11 : vector<16x16x128xbf16> to vector<256x128xbf16>
    %c0_22 = arith.constant 0 : index
    %c0_23 = arith.constant 0 : index
    %13 = vector.load %arg8[%c0_22, %c0_23] : memref<256x1152xbf16, #tpu.memory_space<vmem>>, vector<256x128xbf16>
    tpu.vector_store %arg8[%c0_22, %c0_23], %12 {strides = array<i32>} : memref<256x1152xbf16, #tpu.memory_space<vmem>>, vector<256x128xbf16>,
    %c0_24 = arith.constant 0 : index
    %c1_25 = arith.constant 1 : index
    %c0_26 = arith.constant 0 : index
    %14 = vector.load %arg7[%c0_24, %c1_25, %c0_26] : memref<18x18x128xbf16, #tpu.memory_space<vmem>>, vector<16x16x128xbf16>
    %15 = vector.shape_cast %14 : vector<16x16x128xbf16> to vector<256x128xbf16>
    %c0_27 = arith.constant 0 : index
    %c128 = arith.constant 128 : index
    %16 = vector.load %arg8[%c0_27, %c128] : memref<256x1152xbf16, #tpu.memory_space<vmem>>, vector<256x128xbf16>
    tpu.vector_store %arg8[%c0_27, %c128], %15 {strides = array<i32>} : memref<256x1152xbf16, #tpu.memory_space<vmem>>, vector<256x128xbf16>,
    %c0_28 = arith.constant 0 : index
    %c2 = arith.constant 2 : index
    %c0_29 = arith.constant 0 : index
    %17 = vector.load %arg7[%c0_28, %c2, %c0_29] : memref<18x18x128xbf16, #tpu.memory_space<vmem>>, vector<16x16x128xbf16>
    %18 = vector.shape_cast %17 : vector<16x16x128xbf16> to vector<256x128xbf16>
    %c0_30 = arith.constant 0 : index
    %c256 = arith.constant 256 : index
    %19 = vector.load %arg8[%c0_30, %c256] : memref<256x1152xbf16, #tpu.memory_space<vmem>>, vector<256x128xbf16>
    tpu.vector_store %arg8[%c0_30, %c256], %18 {strides = array<i32>} : memref<256x1152xbf16, #tpu.memory_space<vmem>>, vector<256x128xbf16>,
    %c1_31 = arith.constant 1 : index
    %c0_32 = arith.constant 0 : index
    %c0_33 = arith.constant 0 : index
    %20 = vector.load %arg7[%c1_31, %c0_32, %c0_33] : memref<18x18x128xbf16, #tpu.memory_space<vmem>>, vector<16x16x128xbf16>
    %21 = vector.shape_cast %20 : vector<16x16x128xbf16> to vector<256x128xbf16>
    %c0_34 = arith.constant 0 : index
    %c384 = arith.constant 384 : index
    %22 = vector.load %arg8[%c0_34, %c384] : memref<256x1152xbf16, #tpu.memory_space<vmem>>, vector<256x128xbf16>
    tpu.vector_store %arg8[%c0_34, %c384], %21 {strides = array<i32>} : memref<256x1152xbf16, #tpu.memory_space<vmem>>, vector<256x128xbf16>,
    %c1_35 = arith.constant 1 : index
    %c1_36 = arith.constant 1 : index
    %c0_37 = arith.constant 0 : index
    %23 = vector.load %arg7[%c1_35, %c1_36, %c0_37] : memref<18x18x128xbf16, #tpu.memory_space<vmem>>, vector<16x16x128xbf16>
    %24 = vector.shape_cast %23 : vector<16x16x128xbf16> to vector<256x128xbf16>
    %c0_38 = arith.constant 0 : index
    %c512 = arith.constant 512 : index
    %25 = vector.load %arg8[%c0_38, %c512] : memref<256x1152xbf16, #tpu.memory_space<vmem>>, vector<256x128xbf16>
    tpu.vector_store %arg8[%c0_38, %c512], %24 {strides = array<i32>} : memref<256x1152xbf16, #tpu.memory_space<vmem>>, vector<256x128xbf16>,
    %c1_39 = arith.constant 1 : index
    %c2_40 = arith.constant 2 : index
    %c0_41 = arith.constant 0 : index
    %26 = vector.load %arg7[%c1_39, %c2_40, %c0_41] : memref<18x18x128xbf16, #tpu.memory_space<vmem>>, vector<16x16x128xbf16>
    %27 = vector.shape_cast %26 : vector<16x16x128xbf16> to vector<256x128xbf16>
    %c0_42 = arith.constant 0 : index
    %c640 = arith.constant 640 : index
    %28 = vector.load %arg8[%c0_42, %c640] : memref<256x1152xbf16, #tpu.memory_space<vmem>>, vector<256x128xbf16>
    tpu.vector_store %arg8[%c0_42, %c640], %27 {strides = array<i32>} : memref<256x1152xbf16, #tpu.memory_space<vmem>>, vector<256x128xbf16>,
    %c2_43 = arith.constant 2 : index
    %c0_44 = arith.constant 0 : index
    %c0_45 = arith.constant 0 : index
    %29 = vector.load %arg7[%c2_43, %c0_44, %c0_45] : memref<18x18x128xbf16, #tpu.memory_space<vmem>>, vector<16x16x128xbf16>
    %30 = vector.shape_cast %29 : vector<16x16x128xbf16> to vector<256x128xbf16>
    %c0_46 = arith.constant 0 : index
    %c768 = arith.constant 768 : index
    %31 = vector.load %arg8[%c0_46, %c768] : memref<256x1152xbf16, #tpu.memory_space<vmem>>, vector<256x128xbf16>
    tpu.vector_store %arg8[%c0_46, %c768], %30 {strides = array<i32>} : memref<256x1152xbf16, #tpu.memory_space<vmem>>, vector<256x128xbf16>,
    %c2_47 = arith.constant 2 : index
    %c1_48 = arith.constant 1 : index
    %c0_49 = arith.constant 0 : index
    %32 = vector.load %arg7[%c2_47, %c1_48, %c0_49] : memref<18x18x128xbf16, #tpu.memory_space<vmem>>, vector<16x16x128xbf16>
    %33 = vector.shape_cast %32 : vector<16x16x128xbf16> to vector<256x128xbf16>
    %c0_50 = arith.constant 0 : index
    %c896 = arith.constant 896 : index
    %34 = vector.load %arg8[%c0_50, %c896] : memref<256x1152xbf16, #tpu.memory_space<vmem>>, vector<256x128xbf16>
    tpu.vector_store %arg8[%c0_50, %c896], %33 {strides = array<i32>} : memref<256x1152xbf16, #tpu.memory_space<vmem>>, vector<256x128xbf16>,
    %c2_51 = arith.constant 2 : index
    %c2_52 = arith.constant 2 : index
    %c0_53 = arith.constant 0 : index
    %35 = vector.load %arg7[%c2_51, %c2_52, %c0_53] : memref<18x18x128xbf16, #tpu.memory_space<vmem>>, vector<16x16x128xbf16>
    %36 = vector.shape_cast %35 : vector<16x16x128xbf16> to vector<256x128xbf16>
    %c0_54 = arith.constant 0 : index
    %c1024 = arith.constant 1024 : index
    %37 = vector.load %arg8[%c0_54, %c1024] : memref<256x1152xbf16, #tpu.memory_space<vmem>>, vector<256x128xbf16>
    tpu.vector_store %arg8[%c0_54, %c1024], %36 {strides = array<i32>} : memref<256x1152xbf16, #tpu.memory_space<vmem>>, vector<256x128xbf16>,
    %c0_55 = arith.constant 0 : index
    %c0_56 = arith.constant 0 : index
    %38 = vector.load %arg8[%c0_55, %c0_56] : memref<256x1152xbf16, #tpu.memory_space<vmem>>, vector<256x1152xbf16>
    %c0_57 = arith.constant 0 : index
    %c0_58 = arith.constant 0 : index
    %39 = vector.load %arg4[%c0_57, %c0_58] : memref<1152x128xbf16, #tpu.memory_space<vmem>>, vector<1152x128xbf16>
    %cst_59 = arith.constant dense<0.000000e+00> : vector<256x128xf32>
    %40 = tpu.matmul %38, %39, %cst_59 {dimension_numbers = #tpu.dot_dimension_numbers<[1], [0], [0], [1], [0, 0, 1, 1], [], []>} : vector<256x1152xbf16>, vector<1152x128xbf16>, vector<256x128xf32> -> vector<256x128xf32>
    %41 = vector.shape_cast %40 : vector<256x128xf32> to vector<16x16x128xf32>
    %42 = arith.truncf %41 : vector<16x16x128xf32> to vector<16x16x128xbf16>
    %c0_60 = arith.constant 0 : index
    %c0_61 = arith.constant 0 : index
    %c0_62 = arith.constant 0 : index
    %c0_63 = arith.constant 0 : index
    %43 = vector.load %arg5[%c0_60, %c0_61, %c0_62, %c0_63] : memref<1x16x16x128xbf16, #tpu.memory_space<vmem>>, vector<1x16x16x128xbf16>
    %44 = vector.shape_cast %43 : vector<1x16x16x128xbf16> to vector<16x16x128xbf16>
    %45 = vector.shape_cast %42 : vector<16x16x128xbf16> to vector<1x16x16x128xbf16>
    tpu.vector_store %arg5[%c0_60, %c0_61, %c0_62, %c0_63], %45 {strides = array<i32>} : memref<1x16x16x128xbf16, #tpu.memory_space<vmem>>, vector<1x16x16x128xbf16>,
    %cst_64 = arith.constant dense<0.000000e+00> : vector<128xf32>
    %46 = vector.multi_reduction <add>, %40, %cst_64 [0] : vector<256x128xf32> to vector<128xf32>
    %47 = vector.shape_cast %46 : vector<128xf32> to vector<1x128xf32>
    %48 = arith.mulf %40, %40 : vector<256x128xf32>
    %cst_65 = arith.constant dense<0.000000e+00> : vector<128xf32>
    %49 = vector.multi_reduction <add>, %48, %cst_65 [0] : vector<256x128xf32> to vector<128xf32>
    %50 = vector.shape_cast %49 : vector<128xf32> to vector<1x128xf32>
    %51 = tpu.concatenate %47, %50 in 0 : vector<1x128xf32>, vector<1x128xf32> -> vector<2x128xf32>
    %c0_66 = arith.constant 0 : index
    %c0_67 = arith.constant 0 : index
    %c0_68 = arith.constant 0 : index
    %52 = vector.load %arg6[%c0_66, %c0_67, %c0_68] : memref<1x2x128xf32, #tpu.memory_space<vmem>>, vector<1x2x128xf32>
    %53 = vector.shape_cast %52 : vector<1x2x128xf32> to vector<2x128xf32>
    %54 = vector.shape_cast %51 : vector<2x128xf32> to vector<1x2x128xf32>
    tpu.vector_store %arg6[%c0_66, %c0_67, %c0_68], %54 {strides = array<i32>} : memref<1x2x128xf32, #tpu.memory_space<vmem>>, vector<1x2x128xf32>,
    return
  }
  func.func @transform_0(%arg0: i32) -> (i32, i32, i32, i32) {
    %c0_i32 = arith.constant 0 : i32
    %c0_i32_0 = arith.constant 0 : i32
    %c0_i32_1 = arith.constant 0 : i32
    %c0_i32_2 = arith.constant 0 : i32
    return %arg0, %c0_i32, %c0_i32_0, %c0_i32_1 : i32, i32, i32, i32
  }
  func.func @transform_1(%arg0: i32) -> (i32, i32) {
    %c0_i32 = arith.constant 0 : i32
    %c0_i32_0 = arith.constant 0 : i32
    %c0_i32_1 = arith.constant 0 : i32
    return %c0_i32, %c0_i32_0 : i32, i32
  }
  func.func @transform_2(%arg0: i32) -> (i32, i32) {
    %c0_i32 = arith.constant 0 : i32
    %c0_i32_0 = arith.constant 0 : i32
    %c0_i32_1 = arith.constant 0 : i32
    return %c0_i32, %c0_i32_0 : i32, i32
  }
  func.func @transform_3(%arg0: i32) -> (i32, i32) {
    %c0_i32 = arith.constant 0 : i32
    %c0_i32_0 = arith.constant 0 : i32
    %c0_i32_1 = arith.constant 0 : i32
    return %c0_i32, %c0_i32_0 : i32, i32
  }
  func.func @transform_4(%arg0: i32) -> (i32, i32, i32, i32) {
    %c0_i32 = arith.constant 0 : i32
    %c0_i32_0 = arith.constant 0 : i32
    %c0_i32_1 = arith.constant 0 : i32
    %c0_i32_2 = arith.constant 0 : i32
    return %arg0, %c0_i32, %c0_i32_0, %c0_i32_1 : i32, i32, i32, i32
  }
  func.func @transform_5(%arg0: i32) -> (i32, i32, i32) {
    %c0_i32 = arith.constant 0 : i32
    %c0_i32_0 = arith.constant 0 : i32
    %c0_i32_1 = arith.constant 0 : i32
    return %arg0, %c0_i32, %c0_i32_0 : i32, i32, i32
  }
}

</mosaic_0001>

<bundles_post_ra>
// kernel: tpu_custom_call.1
= control target key start
LH: loop header
LB: loop body
LE: loop exit
PB: predicated region body
PF: predicated region fallthrough
CT: control target
= control target key end

     0   :  { %11 = vsyncpa [#allocation5], 0  ;;  %s8574_s0 = inlined_call_operand.hbm [shape: bf16[2,16,16,128], index: 0, kind: input, shape index: {}]   ;;  %s8575_s1 = inlined_call_operand.vmem [shape: f32[1,128], index: 1, kind: input, shape index: {}]   ;;  %s8576_s2 = inlined_call_operand.vmem [shape: f32[1,128], index: 2, kind: input, shape index: {}]   ;;  %s8577_s3 = inlined_call_operand.hbm [shape: bf16[1152,128], index: 3, kind: input, shape index: {}]   ;;  %s8578_s4 = inlined_call_operand.hbm [shape: bf16[2,16,16,128], index: 4, kind: output, shape index: {0}]   ;;  %s8579_s5 = inlined_call_operand.hbm [shape: f32[2,2,128], index: 5, kind: output, shape index: {1}]  }
   0x1   :  { %13 = vsyncpa [#allocation5 + $0x1], 0 }
   0x2   :  { %14 = vsyncpa [#allocation8], 0 }
   0x3   :  { %15 = vsyncpa [#allocation6], 0 }
   0x4   :  { %17 = vsyncpa [#allocation6 + $0x1], 0 }
   0x5   :  { %18 = vsyncpa [#allocation11], 0 }
   0x6   :  { %20 = vsyncpa [#allocation11 + $0x1], 0  ;;  %s6995_s1 = smov 0   ;;  %s6997_s18 = smov 0  }
   0x7   :  { %s6999_s2 = smov 0   ;;  %s7001_s19 = smov 0  }
   0x8 LB: > { %s7016_s20 = sadd.s32 4294967295, %s6954_s19   ;;  %s5627_s21 = sadd.s32 4294967294, %s6954_s19   ;;  %s6954_s19 = sphi %s7001_s19, %s8646_s19   ;;  %s6950_s2 = sphi %s6999_s2, %s8645_s2   ;;  %s6946_s18 = sphi %s6997_s18, %s8644_s18   ;;  %s6942_s1 = sphi %s6995_s1, %s8643_s1  }
   0x9   : > { %p46_p0 = scmp.ne.s32.totalorder %s6946_s18, %s6942_s1  ;;  %p8580_p1 = scmp.eq.s32.totalorder %s7016_s20, 0 }
   0xa   : > { %p139_p3 = scmp.eq.s32.totalorder %s5627_s21, 1  ;;  %p5628_p5 = scmp.ge.s32.totalorder %s6954_s19, 1 }
   0xb   : > { %p7025_p4 = por %p8580_p1, %p46_p0  ;;  %p172_p7 = scmp.lt.s32.totalorder %s6954_s19, 3 }
   0xc   : > { %p7030_p6 = por %p139_p3, %p46_p0  ;;  %s6956_s25 = smov [#allocation7]  }
   0xd   : > { %s8583_s22 = scalar_select %p7025_p4, 1, 0 }
   0xe   : > { %s8584_s23 = scalar_select %p7030_p6, 1, 0 }
   0xf   : > { %p7035_p8 = pnand %p5628_p5, %p172_p7  ;;  %s190_s26 = sshll.u32 %s6956_s25, 4  ;;  %s7039_s26 = int_to_ptr.vmem [resolvable:$true] %s190_s26 }
  0x10   : > { %s7051_s28 = sadd.s32 1, %s6954_s19   ;;  %s33_s29 = sadd.s32 1, %s6950_s2 }
  0x11   : > { %s8585_s24 = scalar_select %p7035_p8, 1, 0 }
  0x12   : > { %p6617_p9 = pneg %p7035_p8  ;;  %s30_s30 = ssub.s32 %s6954_s19, %s7051_s28 }
  0x13   : > { %s6794_s8 = scalar_lea.hbm %s8577_s3, 9216 }
  0x14   : > { %p7046_p11 = pnand %p6617_p9, %p8580_p1  ;;  %p6795_p12 = scmp.ne.s32.totalorder %s8577_s3, %s6794_s8 }
  0x15   : > { %p6801_p5 = scmp.lt.u32.totalorder %s6794_s8, %s8577_s3 }
  0x16   : > { %p6796_p13 = pneg %p7046_p11 }
  0x18   : > { %p6797_p0 = pnand %p6796_p13, %p6795_p12 }
  0x1a   : > { %p6798_p3 = pneg %p6797_p0 }
  0x1c   : > { %p6803_p7 = pnand %p6801_p5, %p6798_p3 }
  0x1e   : > { %6806 = shalt.err (!%p6803_p7)
}
  0x1f   : > { %s6807_s13 = scalar_lea.vmem %s7039_s26, 9216  ;;  %p6815_p2 = scmp.lt.s32.totalorder %s7039_s26, %s7039_s26 }
  0x20   : > { %p6808_p9 = scmp.ne.s32.totalorder %s7039_s26, %s6807_s13  ;;  %p6816_p6 = scmp.lt.s32.totalorder %s6807_s13, %s6807_s13 }
  0x22   : > { %p6810_p10 = pnand %p6808_p9, %p6796_p13  ;;  %p6817_p4 = por %p6816_p6, %p6815_p2 }
  0x24   : > { %p6811_p1 = pneg %p6810_p10 }
  0x26   : > { %p6818_p8 = pnand %p6817_p4, %p6811_p1 }
  0x28   : > { %6821 = shalt.err (!%p6818_p8)
}
  0x29   : > { %s6957_s14 = smov 64   ;;  %s6958_s15 = smov 4  }
  0x2a   : > { %6620 = dma.hbm_to_vmem [thread:$0]  (!%p7046_p11), %s8577_s3, 9216, %s7039_s26, [#allocation8], %s6957_s14, %s6957_s14, %s6958_s15  }
  0x2b   : > { %p31_p1 = scmp.eq.s32.totalorder %s30_s30, 0  ;;  %p40_p2 = scmp.ne.s32.totalorder %s6950_s2, %s6946_s18 }
  0x2c   : > { %p41_p4 = scmp.eq.s32.totalorder %s6954_s19, 0  ;;  %p6633_p6 = scmp.lt.s32.totalorder %s6954_s19, 2 }
  0x2d   : > { %s7085_s21 = scalar_select %p31_p1, %s6950_s2, %s33_s29  }
  0x2e   : > { %p42_p8 = por %p41_p4, %p40_p2  ;;  %p8587_p10 = scmp.eq.s32.totalorder %s7016_s20, 1 }
  0x2f   : > { %s204_s27 = sand.u32 1, %s6950_s2   ;;  %s5942_s6 = sshll.u32 %s6954_s19, 11 }
  0x30   : > { %p7089_p12 = por %p8587_p10, %p40_p2  ;;  %s5631_s7 = sshll.u32 %s204_s27, 7 }
  0x31   : > { %s7098_s10 = scalar_lea.hbm %s8574_s0, %s5942_s6  ;;  %s208_s26 = scalar_lea.vmem [#allocation4], %s5631_s7 }
  0x32   : > { %s215_s29 = sshll.u32 %s208_s26, 4  ;;  %p7100_p11 = pnand %p6633_p6, %p42_p8  ;;  %s7104_s29 = int_to_ptr.vmem [resolvable:$true] %s215_s29 }
  0x33   : > { %s7106_s11 = scalar_lea.sflag [#allocation5], %s204_s27  ;;  %s6822_s12 = scalar_lea.hbm %s7098_s10, 2048 }
  0x34   : > { %p6823_p13 = scmp.ne.s32.totalorder %s7098_s10, %s6822_s12  ;;  %p6824_p0 = pneg %p7100_p11 }
  0x35   : > { %s6827_s17 = scalar_lea.hbm %s8574_s0, 4096  ;;  %p6828_p7 = scmp.lt.u32.totalorder %s7098_s10, %s8574_s0 }
  0x36   : > { %p6825_p3 = pnand %p6824_p0, %p6823_p13  ;;  %p6829_p9 = scmp.lt.u32.totalorder %s6827_s17, %s6822_s12 }
  0x37   : > { %p6831_p2 = scmp.lt.u32.totalorder %s6822_s12, %s7098_s10 }
  0x38   : > { %p6826_p5 = pneg %p6825_p3  ;;  %p6830_p1 = por %p6829_p9, %p6828_p7 }
  0x3a   : > { %p6832_p4 = por %p6831_p2, %p6830_p1 }
  0x3c   : > { %p6833_p6 = pnand %p6832_p4, %p6826_p5 }
  0x3e   : > { %6836 = shalt.err (!%p6833_p6)
}
  0x3f   : > { %s6837_s27 = scalar_lea.vmem %s7104_s29, 2048  ;;  %s6959_s8 = smov [#allocation4]  }
  0x40   : > { %p6838_p8 = scmp.ne.s32.totalorder %s7104_s29, %s6837_s27  ;;  %s6842_s9 = sshll.u32 %s6959_s8, 4  ;;  %s6843_s9 = int_to_ptr.vmem [resolvable:$false] %s6842_s9 }
  0x41   : > { %s6844_s26 = scalar_lea.vmem %s6843_s9, 4096  ;;  %p6845_p3 = scmp.lt.s32.totalorder %s7104_s29, %s6843_s9 }
  0x42   : > { %p6840_p10 = pnand %p6838_p8, %p6824_p0  ;;  %p6846_p7 = scmp.lt.s32.totalorder %s6844_s26, %s6837_s27 }
  0x44   : > { %p6841_p13 = pneg %p6840_p10  ;;  %p6847_p9 = por %p6846_p7, %p6845_p3 }
  0x46   : > { %p6848_p1 = pnand %p6847_p9, %p6841_p13 }
  0x48   : > { %6851 = shalt.err (!%p6848_p1)
}
  0x49   : > { %6624 = dma.hbm_to_vmem [thread:$0]  (!%p7100_p11), %s7098_s10, 2048, %s7104_s29, %s7106_s11, %s6957_s14, %s6957_s14, %s6958_s15  }
  0x4a   : > { %p8590_p0 = scmp.ne.s32.totalorder %s8585_s24, 0 }
  0x4c   : > { %227 = sbr.rel (%p8590_p0) target bundleno = 748 (0x2ec), region = 36 }
  0x53   : > { %s7140_s12 = sand.u32 1, %s6946_s18   ;;  %p8591_p5 = scmp.ne.s32.totalorder %s8583_s22, 0 }
  0x54   : > { %s5635_s13 = sshll.u32 %s7140_s12, 7  ;;  %s230_s16 = scalar_lea.sflag [#allocation5], %s7140_s12 }
  0x55   : > { %s7146_s30 = scalar_lea.vmem [#allocation4], %s5635_s13 }
  0x56   : > { %6925 = dma.done.wait (%p8591_p5), %s230_s16, 2048  }
  0x57   : > { %6927 = vsyncadd (%p8591_p5), %s230_s16, 4294965248  ;;  %p8592_p11 = scmp.eq.s32.totalorder %s7016_s20, 0 }
  0x59   : > { %6929 = dma.done.wait (%p8592_p11), [#allocation8], 9216   ;;  %p8593_p2 = pmov %p8592_p11 }
  0x5a   : > { %v6960_v0 = vmov 0   ;;  %v6674_v1 = vld [vmem:[#allocation7 + $0x40] sm:$0xff]   ;;  %v6676_v3 = vld [vmem:[#allocation7 + $0x48] sm:$0xff]   ;;  %v6678_v5 = vld [vmem:[#allocation7 + $0x50] sm:$0xff]   ;;  %vm310_vm0 = vcmask 1040384   ;;  %vm733_vm7 = vcmask 1043456  }
  0x5b   : > { %6931 = vsyncadd (%p8593_p2), [#allocation8], 4294958080  ;;  %302 = vst [vmem:[#allocation2] sm:$0xf] %v6960_v0  ;;  %v6675_v2 = vld [vmem:[#allocation7] sm:$0xff]   ;;  %6071 = vmatprep.subr.bf16.mxu0 %v6674_v1  ;;  %6591 = vmatprep.subr.bf16.mxu1 %v6674_v1  ;;  %v6677_v4 = vld [vmem:[#allocation7 + $0x8] sm:$0xff]  }
  0x5c   : > { %303 = vst [vmem:[#allocation2 + $0x4] sm:$0xf] %v6960_v0  ;;  %304 = vst [vmem:[#allocation2 + $0x8] sm:$0x1] %v6960_v0  ;;  %6072 = vmatpush3.bf16.msra.mxu0 %v6675_v2  ;;  %6599 = vmatpush3.bf16.msra.mxu1 %v6675_v2  ;;  %v6679_v6 = vld [vmem:[#allocation7 + $0x10] sm:$0xff]   ;;  %v6680_v7 = vld [vmem:[#allocation7 + $0x58] sm:$0xff]  }
  0x5d   : > { %306 = vst [vmem:[#allocation2 + $0xcc] sm:$0xf] %v6960_v0  ;;  %307 = vst [vmem:[#allocation2 + $0xd0] sm:$0xf] %v6960_v0  ;;  %6073 = vmatprep.subr.bf16.mxu0 %v6676_v3  ;;  %6592 = vmatprep.subr.bf16.mxu1 %v6676_v3  ;;  %vm311_vm1 = vsmask.f32 256 }
  0x5e   : > { %308 = vst [vmem:[#allocation2 + $0xd4] sm:$0x1] %v6960_v0  ;;  %vm1039_vm2 = vsmask.f32 3328  ;;  %vm1040_vm3 = vsmask.f32 7440  ;;  %vm7158_vm5 = vmand %vm310_vm0, %vm311_vm1 }
  0x5f   : > { %vm361_vm4 = vsmask.f32 7938  ;;  %v6681_v8 = vld [vmem:[#allocation7 + $0x18] sm:$0xff]   ;;  %v6682_v9 = vld [vmem:[#allocation7 + $0x60] sm:$0xff]   ;;  %vm411_vm6 = vsmask.f32 4368  ;;  %vm7176_vm9 = vmor %vm1039_vm2, %vm1040_vm3 }
  0x60   : > { %6074 = vmatpush3.bf16.msra.mxu0 %v6677_v4  ;;  %6600 = vmatpush3.bf16.msra.mxu1 %v6677_v4  ;;  %v6683_v11 = vld [vmem:[#allocation7 + $0x20] sm:$0xff]   ;;  %v6684_v12 = vld [vmem:[#allocation7 + $0x68] sm:$0xff]   ;;  %v292_v21 = vld [vmem:[%s7146_s30 + $0x58] sm:$0xf]  ;;  %vm1602_vm12 = vcmask 1042432   ;;  %vm1603_vm13 = vcmask 1046532  }
  0x61   : > { %6075 = vmatprep.subr.bf16.mxu0 %v6678_v5  ;;  %6593 = vmatprep.subr.bf16.mxu1 %v6678_v5  ;;  %v6685_v16 = vld [vmem:[#allocation7 + $0x28] sm:$0xff]   ;;  %vm7165_vm8 = vmand %vm310_vm0, %vm361_vm4  ;;  %v6686_v23 = vld [vmem:[#allocation7 + $0x70] sm:$0xff]   ;;  %v601_v27 = vshrl.u32 %v292_v21, 16  ;;  %v604_v41 = vshll.u32 %v292_v21, 16  ;;  %s8430_s22 = scalar_lea.vmem [#allocation9], %s5635_s13  ;;  %s5975_s24 = sshll.u32 %s7016_s20, 11 }
  0x62   : > { %v991_v13 = vld [vmem:[#allocation2] sm:$0xf]  ;;  %v293_v25 = vld [vmem:[%s7146_s30 + $0x5c] sm:$0xf]  ;;  %v346_v26 = vld [vmem:[#allocation2 + $0x90] sm:$0x1]  ;;  %s8495_s29 = scalar_lea.hbm %s8578_s4, %s5975_s24 }
  0x63   : > { %v992_v14 = vld [vmem:[#allocation2 + $0x4] sm:$0xf]  ;;  %v993_v15 = vld [vmem:[#allocation2 + $0x8] sm:$0x1]  ;;  %v1043_v17 = vshrl.u32 %v991_v13, 16  ;;  %v1046_v18 = vshll.u32 %v991_v13, 16  ;;  %vm7182_vm10 = vmor %vm311_vm1, %vm411_vm6 }
  0x64   : > { %6076 = vmatpush3.bf16.msra.mxu0 %v6679_v6  ;;  %6601 = vmatpush3.bf16.msra.mxu1 %v6679_v6  ;;  %v1052_v19 = vshll.u32 %v992_v14, 16  ;;  %v1056_v20 = vshrl.u32 %v992_v14, 16  ;;  %v1062_v24 = vshll.u32 %v993_v15, 16  ;;  %v396_v32 = vld [vmem:[#allocation2 + $0x98] sm:$0x1]  ;;  %v347_v34 = vsel %vm7158_vm5, 0, %v346_v26  ;;  %vm7192_vm11 = vmand %vm733_vm7, %vm361_vm4 }
  0x65   : > { %6077 = vmatprep.subr.bf16.mxu0 %v6680_v7  ;;  %6594 = vmatprep.subr.bf16.mxu1 %v6680_v7  ;;  %v1045_v28 = vrot.slane %v1043_v17, 4  ;;  %v1048_v29 = vrot.slane %v1046_v18, 5  ;;  %v397_v35 = vsel %vm7165_vm8, 0, %v396_v32  ;;  %v603_v36 = vrot.slane %v601_v27, 7  ;;  %v6687_v37 = vld [vmem:[#allocation7 + $0x30] sm:$0xff]   ;;  %v6688_v43 = vld [vmem:[#allocation7 + $0x78] sm:$0xff]   ;;  %vm7332_vm14 = vmor %vm1602_vm12, %vm1603_vm13 }
  0x66   : > { %v1054_v30 = vrot.slane %v1052_v19, 5  ;;  %v1058_v31 = vrot.slane %v1056_v20, 4  ;;  %v1064_v33 = vrot.slane %v1062_v24, 5  ;;  %348 = vst [vmem:[#allocation2 + $0x90] sm:$0x1] %v347_v34  ;;  %v609_v42 = vshrl.u32 %v293_v25, 16 }
  0x67   : > { %v1049_v39 = vor.u32 %v1048_v29, %v1045_v28  ;;  %398 = vst [vmem:[#allocation2 + $0x98] sm:$0x1] %v397_v35  ;;  %v612_v44 = vshll.u32 %v293_v25, 16  ;;  %v607_v48 = vrot.slane %v603_v36, 4  ;;  %v606_v50 = vor.u32 %v604_v41, %v603_v36  ;;  %v6689_v56 = vld [vmem:[#allocation7 + $0x38] sm:$0xff]   ;;  %v6692_v59 = vld [vmem:[#allocation7 + $0xc0] sm:$0xff]  }
  0x68   : > { %6078 = vmatpush3.bf16.msra.mxu0 %v6681_v8  ;;  %6602 = vmatpush3.bf16.msra.mxu1 %v6681_v8  ;;  %v1059_v40 = vor.u32 %v1058_v31, %v1054_v30  ;;  %v611_v49 = vrot.slane %v609_v42, 7  ;;  %v6690_v62 = vld [vmem:[#allocation2] sm:$0xff]   ;;  %v6693_v63 = vld [vmem:[#allocation7 + $0x140] sm:$0xff]   ;;  %v313_v5 = vld [vmem:[#allocation2 + $0xc] sm:$0x1]  ;;  %s5499_s14 = sshll.u32 %s8430_s22, 4  ;;  %s8497_s14 = int_to_ptr.vmem [resolvable:$true] %s5499_s14 }
  0x69   : > { %6079 = vmatprep.subr.bf16.mxu0 %v6682_v9  ;;  %6595 = vmatprep.subr.bf16.mxu1 %v6682_v9  ;;  %v1050_v45 = vrot.slane %v1049_v39, 4  ;;  %v6695_v2 = vld [vmem:[#allocation7 + $0x100] sm:$0xff]   ;;  %v314_v6 = vsel %vm7158_vm5, 0, %v313_v5  ;;  %v363_v7 = vld [vmem:[#allocation2 + $0x14] sm:$0x1]  ;;  %s5481_s11 = scalar_lea.sflag [#allocation6], %s7140_s12 }
  0x6a   : > { %v1060_v46 = vrot.slane %v1059_v40, 4  ;;  %v614_v53 = vor.u32 %v612_v44, %v611_v49  ;;  %v616_v54 = vrot.slane %v611_v49, 4  ;;  %v270_v3 = vld [vmem:[%s7146_s30] sm:$0xf]  ;;  %v271_v4 = vld [vmem:[%s7146_s30 + $0x4] sm:$0xf] }
  0x6b   : > { %v1055_v51 = vsel %vm7176_vm9, %v1050_v45, %v1054_v30  ;;  %v414_v8 = vshrl.u32 %v270_v3, 16  ;;  %v417_v9 = vshll.u32 %v270_v3, 16  ;;  %315 = vst [vmem:[#allocation2 + $0xc] sm:$0x1] %v314_v6  ;;  %v425_v13 = vshll.u32 %v271_v4, 16  ;;  %v6703_v44 = vld [vmem:[#allocation7 + $0x148] sm:$0xff]  }
  0x6c   : > { %6080 = vmatpush3.bf16.msra.mxu0 %v6683_v11  ;;  %6603 = vmatpush3.bf16.msra.mxu1 %v6683_v11  ;;  %v1065_v52 = vsel %vm7176_vm9, %v1060_v46, %v1064_v33  ;;  %v615_v58 = vsel %vm7182_vm10, %v607_v48, %v614_v53  ;;  %v422_v11 = vshrl.u32 %v271_v4, 16  ;;  %v294_v14 = vld [vmem:[%s7146_s30 + $0x60] sm:$0xf]  ;;  %v295_v15 = vld [vmem:[%s7146_s30 + $0x64] sm:$0xf]  ;;  %s6852_s17 = scalar_lea.vmem %s8497_s14, 2048 }
  0x6d   : > { %6081 = vmatprep.subr.bf16.mxu0 %v6684_v12  ;;  %6596 = vmatprep.subr.bf16.mxu1 %v6684_v12  ;;  %v5655_v57 = vcombine.low %v1055_v51, %v1065_v52  ;;  %v812_v60 = vld [vmem:[#allocation2 + $0x90] sm:$0xf]  ;;  %815 = vst [vmem:[#allocation2 + $0x94] sm:$0xf] %v615_v58  ;;  %v364_v12 = vsel %vm7165_vm8, 0, %v363_v7  ;;  %v621_v24 = vshll.u32 %v294_v14, 16  ;;  %p6853_p4 = scmp.ne.s32.totalorder %s8497_s14, %s6852_s17 }
  0x6e   : > { %v816_v61 = vld [vmem:[#allocation2 + $0x98] sm:$0x1]  ;;  %v813_v0 = vsel %vm7192_vm11, %v606_v50, %v812_v60  ;;  %365 = vst [vmem:[#allocation2 + $0x14] sm:$0x1] %v364_v12  ;;  %v424_v17 = vrot.slane %v422_v11, 7  ;;  %v626_v31 = vshrl.u32 %v295_v15, 16 }
  0x6f   : > { %4438 = vmatprep.mubr.bf16.mxu0 %v5655_v57  ;;  %v817_v1 = vsel %vm7158_vm5, %v616_v54, %v816_v61  ;;  %814 = vst [vmem:[#allocation2 + $0x90] sm:$0xf] %v813_v0  ;;  %v349_v18 = vld [vmem:[#allocation2 + $0x9c] sm:$0x1]  ;;  %v399_v19 = vld [vmem:[#allocation2 + $0xa4] sm:$0x1]  ;;  %p6854_p6 = pnand %p6853_p4, %p7089_p12 }
  0x70   : > { %6082 = vmatpush3.bf16.msra.mxu0 %v6685_v16  ;;  %6604 = vmatpush3.bf16.msra.mxu1 %v6685_v16  ;;  %818 = vst [vmem:[#allocation2 + $0x98] sm:$0x1] %v817_v1  ;;  %v416_v16 = vrot.slane %v414_v8, 7  ;;  %v350_v20 = vsel %vm7158_vm5, 0, %v349_v18  ;;  %v400_v21 = vsel %vm7165_vm8, 0, %v399_v19  ;;  %v427_v26 = vor.u32 %v425_v13, %v424_v17  ;;  %v6705_v1 = vld [vmem:[#allocation7 + $0x108] sm:$0xff]  }
  0x71   : > { %6083 = vmatprep.subr.bf16.mxu0 %v6686_v23  ;;  %6597 = vmatprep.subr.bf16.mxu1 %v6686_v23  ;;  %v618_v23 = vshrl.u32 %v294_v14, 16  ;;  %v429_v27 = vrot.slane %v424_v17, 4  ;;  %351 = vst [vmem:[#allocation2 + $0x9c] sm:$0x1] %v350_v20  ;;  %401 = vst [vmem:[#allocation2 + $0xa4] sm:$0x1] %v400_v21  ;;  %p6855_p8 = pneg %p6854_p6 }
  0x72   : > { %v420_v25 = vrot.slane %v416_v16, 4  ;;  %v419_v29 = vor.u32 %v417_v9, %v416_v16  ;;  %v629_v35 = vshll.u32 %v295_v15, 16  ;;  %v735_v46 = vld [vmem:[#allocation2 + $0xc] sm:$0xf]  ;;  %v628_v57 = vrot.slane %v626_v31, 7  ;;  %v6694_v5 = vld [vmem:[#allocation7 + $0x80] sm:$0xff]  }
  0x73   : > { %v620_v30 = vrot.slane %v618_v23, 7  ;;  %v272_v13 = vld [vmem:[%s7146_s30 + $0x8] sm:$0xf]  ;;  %v316_v17 = vld [vmem:[#allocation2 + $0x18] sm:$0x1]  ;;  %s6961_s6 = smov [#allocation9]  }
  0x74   : > { %6084 = vmatpush3.bf16.msra.mxu0 %v6687_v37  ;;  %6605 = vmatpush3.bf16.msra.mxu1 %v6687_v37  ;;  %v1028_v28 = vld [vmem:[#allocation2 + $0x94] sm:$0xf]  ;;  %v428_v34 = vsel %vm7182_vm10, %v420_v25, %v427_v26  ;;  %v736_v53 = vsel %vm7192_vm11, %v419_v29, %v735_v46  ;;  %v633_v0 = vrot.slane %v628_v57, 4  ;;  %v366_v18 = vld [vmem:[#allocation2 + $0x20] sm:$0x1]  ;;  %v317_v21 = vsel %vm7158_vm5, 0, %v316_v17 }
  0x75   : > { %6085 = vmatprep.subr.bf16.mxu0 %v6688_v43  ;;  %6598 = vmatprep.subr.bf16.mxu1 %v6688_v43  ;;  %v1340_v32 = vshll.u32 %v1028_v28, 16  ;;  %v1344_v33 = vshrl.u32 %v1028_v28, 16  ;;  %738 = vst [vmem:[#allocation2 + $0x10] sm:$0xf] %v428_v34  ;;  %v623_v39 = vor.u32 %v621_v24, %v620_v30  ;;  %v739_v48 = vld [vmem:[#allocation2 + $0x14] sm:$0x1] }
  0x76   : > { %v1027_v36 = vld [vmem:[#allocation2 + $0x90] sm:$0xf]  ;;  %v624_v49 = vrot.slane %v620_v30, 4  ;;  %737 = vst [vmem:[#allocation2 + $0xc] sm:$0xf] %v736_v53  ;;  %v6696_v19 = vld [vmem:[#allocation7 + $0xc8] sm:$0xff]  }
  0x77   : > { %v1029_v37 = vld [vmem:[#allocation2 + $0x98] sm:$0x1]  ;;  %v1331_v40 = vshrl.u32 %v1027_v36, 16  ;;  %v1334_v41 = vshll.u32 %v1027_v36, 16  ;;  %v1342_v42 = vrot.slane %v1340_v32, 5  ;;  %v1346_v43 = vrot.slane %v1344_v33, 4 }
  0x78   : > { %6086 = vmatpush3.bf16.msra.mxu0 %v6689_v56  ;;  %6606 = vmatpush3.bf16.msra.mxu1 %v6689_v56  ;;  %v1350_v45 = vshll.u32 %v1029_v37, 16  ;;  %v740_v56 = vsel %vm7158_vm5, %v429_v27, %v739_v48  ;;  %v819_v58 = vld [vmem:[#allocation2 + $0x9c] sm:$0xf]  ;;  %v6691_v12 = vld [vmem:[#allocation2 + $0x90] sm:$0xff]   ;;  %318 = vst [vmem:[#allocation2 + $0x18] sm:$0x1] %v317_v21 }
  0x79   : > { %6183 = vmatprep.subr.bf16.mxu1 %v6692_v59  ;;  %6295 = vmatprep.subr.bf16.mxu0 %v6693_v63  ;;  %v1333_v50 = vrot.slane %v1331_v40, 4  ;;  %v1336_v51 = vrot.slane %v1334_v41, 5  ;;  %v1347_v52 = vor.u32 %v1346_v43, %v1342_v42  ;;  %v823_v59 = vld [vmem:[#allocation2 + $0xa4] sm:$0x1]  ;;  %741 = vst [vmem:[#allocation2 + $0x14] sm:$0x1] %v740_v56  ;;  %v631_v63 = vor.u32 %v629_v35, %v628_v57 }
  0x7a   : > { %v1352_v54 = vrot.slane %v1350_v45, 5  ;;  %v824_v9 = vsel %vm7158_vm5, %v633_v0, %v823_v59  ;;  %v367_v27 = vsel %vm7165_vm8, 0, %v366_v18  ;;  %v431_v30 = vshrl.u32 %v272_v13, 16  ;;  %v6697_v31 = vld [vmem:[#allocation7 + $0x88] sm:$0xff]   ;;  %v6700_v36 = vld [vmem:[#allocation7 + $0xd0] sm:$0xff]   ;;  %v6702_v57 = vld [vmem:[#allocation7 + $0xd8] sm:$0xff]  }
  0x7b   : > { %4439 = vmatmul.mubr.bf16.vlgmr.msra.gmra.mrb[0].mxu0 %v6690_v62  ;;  %v1337_v60 = vor.u32 %v1336_v51, %v1333_v50  ;;  %v1348_v61 = vrot.slane %v1347_v52, 4  ;;  %v820_v62 = vsel %vm7192_vm11, %v623_v39, %v819_v58  ;;  %v632_v8 = vsel %vm7182_vm10, %v624_v49, %v631_v63  ;;  %825 = vst [vmem:[#allocation2 + $0xa4] sm:$0x1] %v824_v9  ;;  %v273_v40 = vld [vmem:[%s7146_s30 + $0xc] sm:$0xf]  ;;  %v6701_v52 = vld [vmem:[#allocation7 + $0x90] sm:$0xff]  }
  0x7c   : > { %6296 = vmatpush3.bf16.msra.mxu0 %v6695_v2  ;;  %821 = vst [vmem:[#allocation2 + $0x9c] sm:$0xf] %v820_v62  ;;  %v995_v4 = vld [vmem:[#allocation2 + $0x10] sm:$0xf]  ;;  %822 = vst [vmem:[#allocation2 + $0xa0] sm:$0xf] %v632_v8 }
  0x7d   : > { %6297 = vmatprep.subr.bf16.mxu0 %v6703_v44  ;;  %v1338_v2 = vrot.slane %v1337_v60, 4  ;;  %v1353_v3 = vsel %vm7176_vm9, %v1348_v61, %v1352_v54  ;;  %v1076_v6 = vshll.u32 %v995_v4, 16  ;;  %v1080_v7 = vshrl.u32 %v995_v4, 16  ;;  %v994_v20 = vld [vmem:[#allocation2 + $0xc] sm:$0xf]  ;;  %v6708_v17 = vld [vmem:[#allocation7 + $0xe0] sm:$0xff]  }
  0x7e   : > { %v1067_v24 = vshrl.u32 %v994_v20, 16  ;;  %v1070_v25 = vshll.u32 %v994_v20, 16  ;;  %368 = vst [vmem:[#allocation2 + $0x20] sm:$0x1] %v367_v27  ;;  %v7239_v41 = vrot.slane %v431_v30, 7  ;;  %v6698_v0 = vld [vmem:[#allocation2 + $0xc] sm:$0xff]  }
  0x7f   : > { %v1343_v11 = vsel %vm7176_vm9, %v1338_v2, %v1342_v42  ;;  %v7231_v15 = vrot.slane %v1076_v6, 5  ;;  %v1082_v16 = vrot.slane %v1080_v7, 4  ;;  %v434_v42 = vshll.u32 %v272_v13, 16  ;;  %v296_v53 = vld [vmem:[%s7146_s30 + $0x68] sm:$0xf]  ;;  %v6704_v6 = vld [vmem:[#allocation7 + $0x98] sm:$0xff]  }
  0x80   : > { %6298 = vmatpush3.bf16.msra.mxu0 %v6705_v1  ;;  %v5667_v14 = vcombine.low %v1343_v11, %v1353_v3  ;;  %v996_v23 = vld [vmem:[#allocation2 + $0x14] sm:$0x1]  ;;  %v1069_v32 = vrot.slane %v1067_v24, 4  ;;  %v1072_v33 = vrot.slane %v1070_v25, 5  ;;  %v437_v59 = vrot.slane %v7239_v41, 4  ;;  %v6709_v30 = vld [vmem:[#allocation7 + $0xa0] sm:$0xff]  }
  0x81   : > { %v1083_v26 = vor.u32 %v1082_v16, %v7231_v15  ;;  %v1086_v28 = vshll.u32 %v996_v23, 16  ;;  %v436_v58 = vor.u32 %v434_v42, %v7239_v41  ;;  %v352_v60 = vld [vmem:[#allocation2 + $0xa8] sm:$0x1]  ;;  %v439_v1 = vshrl.u32 %v273_v40, 16  ;;  %v742_v2 = vld [vmem:[#allocation2 + $0x18] sm:$0xf] }
  0x82   : > { %4534 = vmatprep.mubr.bf16.mxu1 %v5667_v14  ;;  %v1073_v43 = vor.u32 %v1072_v33, %v1069_v32  ;;  %v1032_v45 = vld [vmem:[#allocation2 + $0xa4] sm:$0x1]  ;;  %v442_v7 = vshll.u32 %v273_v40, 16  ;;  %v402_v11 = vld [vmem:[#allocation2 + $0xb0] sm:$0x1]  ;;  %v353_v18 = vsel %vm7158_vm5, 0, %v352_v60 }
  0x83   : > { %4535 = vmatmul.mubr.bf16.vlgmr.msra.gmra.mrb[0].mxu1 %v6691_v12  ;;  %v1030_v29 = vld [vmem:[#allocation2 + $0x9c] sm:$0xf]  ;;  %v1084_v34 = vrot.slane %v1083_v26, 4  ;;  %v1088_v37 = vrot.slane %v1086_v28, 5  ;;  %v1031_v44 = vld [vmem:[#allocation2 + $0xa0] sm:$0xf]  ;;  %v743_v8 = vsel %vm7192_vm11, %v436_v58, %v742_v2 }
  0x84   : > { %6184 = vmatpush3.bf16.msra.mxu1 %v6694_v5  ;;  %v1355_v35 = vshrl.u32 %v1030_v29, 16  ;;  %v1358_v39 = vshll.u32 %v1030_v29, 16  ;;  %v1364_v50 = vshll.u32 %v1031_v44, 16  ;;  %v1368_v51 = vshrl.u32 %v1031_v44, 16  ;;  %v297_v3 = vld [vmem:[%s7146_s30 + $0x6c] sm:$0xf] }
  0x85   : > { %6185 = vmatprep.subr.bf16.mxu1 %v6696_v19  ;;  %v1089_v48 = vsel %vm7176_vm9, %v1084_v34, %v1088_v37  ;;  %v1074_v54 = vrot.slane %v1073_v43, 4  ;;  %v1374_v56 = vshll.u32 %v1032_v45, 16  ;;  %v746_v9 = vld [vmem:[#allocation2 + $0x20] sm:$0x1]  ;;  %v441_v16 = vrot.slane %v439_v1, 7  ;;  %s6856_s7 = sshll.u32 %s6961_s6, 4  ;;  %s6857_s7 = int_to_ptr.vmem [resolvable:$false] %s6856_s7 }
  0x86   : > { %v1357_v46 = vrot.slane %v1355_v35, 4  ;;  %v1360_v49 = vrot.slane %v1358_v39, 5  ;;  %v1366_v62 = vrot.slane %v1364_v50, 5  ;;  %v1370_v63 = vrot.slane %v1368_v51, 4  ;;  %744 = vst [vmem:[#allocation2 + $0x18] sm:$0xf] %v743_v8  ;;  %p6859_p10 = scmp.lt.s32.totalorder %s8497_s14, %s6857_s7 }
  0x87   : > { %v1079_v4 = vsel %vm7176_vm9, %v1074_v54, %v7231_v15  ;;  %v1376_v5 = vrot.slane %v1374_v56, 5  ;;  %v403_v15 = vsel %vm7165_vm8, 0, %v402_v11  ;;  %v635_v19 = vshrl.u32 %v296_v53, 16  ;;  %v6699_v24 = vld [vmem:[#allocation2 + $0x9c] sm:$0xff]   ;;  %354 = vst [vmem:[#allocation2 + $0xa8] sm:$0x1] %v353_v18 }
  0x88   : > { %6186 = vmatpush3.bf16.msra.mxu1 %v6697_v31  ;;  %v1361_v61 = vor.u32 %v1360_v49, %v1357_v46  ;;  %v5656_v12 = vcombine.low %v1079_v4, %v1089_v48  ;;  %v1371_v14 = vor.u32 %v1370_v63, %v1366_v62  ;;  %v638_v20 = vshll.u32 %v296_v53, 16  ;;  %404 = vst [vmem:[#allocation2 + $0xb0] sm:$0x1] %v403_v15  ;;  %v6715_v31 = vld [vmem:[#allocation7 + $0x150] sm:$0xff]   ;;  %v6710_v35 = vld [vmem:[#allocation7 + $0xe8] sm:$0xff]   ;;  %s6858_s27 = scalar_lea.vmem %s6857_s7, 4096 }
  0x89   : > { %6187 = vmatprep.subr.bf16.mxu1 %v6700_v36  ;;  %v444_v25 = vor.u32 %v442_v7, %v441_v16  ;;  %v446_v26 = vrot.slane %v441_v16, 4  ;;  %v637_v27 = vrot.slane %v635_v19, 7  ;;  %v643_v28 = vshrl.u32 %v297_v3, 16  ;;  %v274_v36 = vld [vmem:[%s7146_s30 + $0x10] sm:$0xf]  ;;  %6299 = vmatprep.subr.bf16.mxu0 %v6715_v31  ;;  %v6711_v53 = vld [vmem:[#allocation7 + $0xa8] sm:$0xff]   ;;  %p6860_p13 = scmp.lt.s32.totalorder %s6858_s27, %s6852_s17 }
  0x8a   : > { %v1362_v13 = vrot.slane %v1361_v61, 4  ;;  %4446 = vmatprep.mubr.bf16.mxu0 %v5656_v12  ;;  %v1372_v23 = vrot.slane %v1371_v14, 4  ;;  %v646_v29 = vshll.u32 %v297_v3, 16  ;;  %v275_v42 = vld [vmem:[%s7146_s30 + $0x14] sm:$0xf]  ;;  %v448_v46 = vshrl.u32 %v274_v36, 16 }
  0x8b   : > { %4447 = vmatmul.mubr.bf16.gmra.mrb[4].mxu0 %v6698_v0  ;;  %v445_v33 = vsel %vm7182_vm10, %v437_v59, %v444_v25  ;;  %v747_v34 = vsel %vm7158_vm5, %v446_v26, %v746_v9  ;;  %v640_v39 = vor.u32 %v638_v20, %v637_v27  ;;  %v641_v40 = vrot.slane %v637_v27, 4  ;;  %v319_v43 = vld [vmem:[#allocation2 + $0x24] sm:$0x1]  ;;  %v369_v45 = vld [vmem:[#allocation2 + $0x2c] sm:$0x1]  ;;  %p6861_p3 = por %p6860_p13, %p6859_p10 }
  0x8c   : > { %6188 = vmatpush3.bf16.msra.mxu1 %v6701_v52  ;;  %v1367_v21 = vsel %vm7176_vm9, %v1362_v13, %v1366_v62  ;;  %v1377_v32 = vsel %vm7176_vm9, %v1372_v23, %v1376_v5  ;;  %745 = vst [vmem:[#allocation2 + $0x1c] sm:$0xf] %v445_v33  ;;  %748 = vst [vmem:[#allocation2 + $0x20] sm:$0x1] %v747_v34  ;;  %v645_v41 = vrot.slane %v643_v28, 7  ;;  %v320_v44 = vsel %vm7158_vm5, 0, %v319_v43 }
  0x8d   : > { %6189 = vmatprep.subr.bf16.mxu1 %v6702_v57  ;;  %v5668_v37 = vcombine.low %v1367_v21, %v1377_v32  ;;  %v451_v48 = vshll.u32 %v274_v36, 16  ;;  %v456_v49 = vshrl.u32 %v275_v42, 16  ;;  %v997_v50 = vld [vmem:[#allocation2 + $0x18] sm:$0xf]  ;;  %321 = vst [vmem:[#allocation2 + $0x24] sm:$0x1] %v320_v44  ;;  %p6862_p7 = pnand %p6861_p3, %p6855_p8 }
  0x8e   : > { %v648_v51 = vor.u32 %v646_v29, %v645_v41  ;;  %v650_v52 = vrot.slane %v645_v41, 4  ;;  %v370_v54 = vsel %vm7165_vm8, 0, %v369_v45  ;;  %v1091_v56 = vshrl.u32 %v997_v50, 16  ;;  %v7271_v60 = vld [vmem:[%s7146_s30 + $0x70] sm:$0xf] }
  0x8f   : > { %4542 = vmatprep.mubr.bf16.mxu1 %v5668_v37  ;;  %v1094_v57 = vshll.u32 %v997_v50, 16  ;;  %371 = vst [vmem:[#allocation2 + $0x2c] sm:$0x1] %v370_v54  ;;  %v450_v58 = vrot.slane %v448_v46, 7  ;;  %v458_v59 = vrot.slane %v456_v49, 7  ;;  %v459_v0 = vshll.u32 %v275_v42, 16 }
  0x90   : > { %6190 = vmatpush3.bf16.msra.mxu1 %v6704_v6  ;;  %v649_v61 = vsel %vm7182_vm10, %v641_v40, %v648_v51  ;;  %v826_v62 = vld [vmem:[#allocation2 + $0xa8] sm:$0xf]  ;;  %v830_v63 = vld [vmem:[#allocation2 + $0xb0] sm:$0x1]  ;;  %v652_v1 = vshrl.u32 %v7271_v60, 16  ;;  %v1093_v2 = vrot.slane %v1091_v56, 4 }
  0x91   : > { %6191 = vmatprep.subr.bf16.mxu1 %v6708_v17  ;;  %4543 = vmatmul.mubr.bf16.gmra.mrb[4].mxu1 %v6699_v24  ;;  %v1096_v3 = vrot.slane %v1094_v57, 5  ;;  %v827_v4 = vsel %vm7192_vm11, %v640_v39, %v826_v62  ;;  %829 = vst [vmem:[#allocation2 + $0xac] sm:$0xf] %v649_v61  ;;  %v831_v5 = vsel %vm7158_vm5, %v650_v52, %v830_v63  ;;  %v355_v6 = vld [vmem:[#allocation2 + $0xb4] sm:$0x1]  ;;  %v6714_v7 = vld [vmem:[#allocation7 + $0xf0] sm:$0xff]  }
  0x92   : > { %828 = vst [vmem:[#allocation2 + $0xa8] sm:$0xf] %v827_v4  ;;  %832 = vst [vmem:[#allocation2 + $0xb0] sm:$0x1] %v831_v5  ;;  %v453_v8 = vor.u32 %v451_v48, %v450_v58  ;;  %v454_v9 = vrot.slane %v450_v58, 4  ;;  %v461_v11 = vor.u32 %v459_v0, %v458_v59  ;;  %v463_v12 = vrot.slane %v458_v59, 4 }
  0x93   : > { %v7281_v13 = vld [vmem:[%s7146_s30 + $0x74] sm:$0xf]  ;;  %v405_v14 = vld [vmem:[#allocation2 + $0xbc] sm:$0x1]  ;;  %v999_v17 = vld [vmem:[#allocation2 + $0x20] sm:$0x1]  ;;  %v1097_v18 = vor.u32 %v1096_v3, %v1093_v2 }
  0x94   : > { %6192 = vmatpush3.bf16.msra.mxu1 %v6709_v30  ;;  %v998_v16 = vld [vmem:[#allocation2 + $0x1c] sm:$0xf]  ;;  %v1110_v20 = vshll.u32 %v999_v17, 16  ;;  %v462_v21 = vsel %vm7182_vm10, %v454_v9, %v461_v11  ;;  %v749_v24 = vld [vmem:[#allocation2 + $0x24] sm:$0xf]  ;;  %v356_v25 = vsel %vm7158_vm5, 0, %v355_v6 }
  0x95   : > { %6193 = vmatprep.subr.bf16.mxu1 %v6710_v35  ;;  %v1100_v15 = vshll.u32 %v998_v16, 16  ;;  %v1104_v19 = vshrl.u32 %v998_v16, 16  ;;  %v1098_v23 = vrot.slane %v1097_v18, 4  ;;  %752 = vst [vmem:[#allocation2 + $0x28] sm:$0xf] %v462_v21  ;;  %v406_v26 = vsel %vm7165_vm8, 0, %v405_v14 }
  0x96   : > { %v7289_v27 = vrot.slane %v652_v1, 7  ;;  %v750_v30 = vsel %vm7192_vm11, %v453_v8, %v749_v24  ;;  %v753_v31 = vld [vmem:[#allocation2 + $0x2c] sm:$0x1]  ;;  %357 = vst [vmem:[#allocation2 + $0xb4] sm:$0x1] %v356_v25  ;;  %v1112_v33 = vrot.slane %v1110_v20, 5 }
  0x97   : > { %v1102_v28 = vrot.slane %v1100_v15, 5  ;;  %v1106_v29 = vrot.slane %v1104_v19, 4  ;;  %407 = vst [vmem:[#allocation2 + $0xbc] sm:$0x1] %v406_v26  ;;  %v6716_v32 = vld [vmem:[#allocation7 + $0xb0] sm:$0xff]   ;;  %v754_v34 = vsel %vm7158_vm5, %v463_v12, %v753_v31  ;;  %v655_v35 = vshll.u32 %v7271_v60, 16 }
  0x98   : > { %6194 = vmatpush3.bf16.msra.mxu1 %v6711_v53  ;;  %751 = vst [vmem:[#allocation2 + $0x24] sm:$0xf] %v750_v30  ;;  %v660_v36 = vshrl.u32 %v7281_v13, 16  ;;  %v6717_v37 = vld [vmem:[#allocation7 + $0x110] sm:$0xff]   ;;  %755 = vst [vmem:[#allocation2 + $0x2c] sm:$0x1] %v754_v34 }
  0x99   : > { %6195 = vmatprep.subr.bf16.mxu1 %v6714_v7  ;;  %v1107_v39 = vor.u32 %v1106_v29, %v1102_v28  ;;  %v1034_v40 = vld [vmem:[#allocation2 + $0xac] sm:$0xf]  ;;  %v663_v41 = vshll.u32 %v7281_v13, 16  ;;  %v6718_v42 = vld [vmem:[#allocation7 + $0xf8] sm:$0xff]   ;;  %v1103_v43 = vsel %vm7176_vm9, %v1098_v23, %v1102_v28  ;;  %v1033_v44 = vld [vmem:[#allocation2 + $0xa8] sm:$0xf]  ;;  %v657_v49 = vor.u32 %v655_v35, %v7289_v27  ;;  %6300 = vmatpush3.bf16.msra.mxu0 %v6717_v37 }
  0x9a   : > { %v1035_v45 = vld [vmem:[#allocation2 + $0xb0] sm:$0x1]  ;;  %v1388_v46 = vshll.u32 %v1034_v40, 16  ;;  %v1392_v48 = vshrl.u32 %v1034_v40, 16  ;;  %v1379_v51 = vshrl.u32 %v1033_v44, 16  ;;  %v1382_v52 = vshll.u32 %v1033_v44, 16 }
  0x9b   : > { %v1108_v50 = vrot.slane %v1107_v39, 4  ;;  %v1398_v53 = vshll.u32 %v1035_v45, 16  ;;  %v6706_v54 = vld [vmem:[#allocation2 + $0x18] sm:$0xff]   ;;  %v658_v58 = vrot.slane %v7289_v27, 4  ;;  %v662_v59 = vrot.slane %v660_v36, 7  ;;  %v6719_v1 = vld [vmem:[#allocation7 + $0xb8] sm:$0xff]  }
  0x9c   : > { %6196 = vmatpush3.bf16.msra.mxu1 %v6716_v32  ;;  %v1390_v56 = vrot.slane %v1388_v46, 5  ;;  %v1394_v57 = vrot.slane %v1392_v48, 4  ;;  %v1381_v61 = vrot.slane %v1379_v51, 4  ;;  %v1384_v62 = vrot.slane %v1382_v52, 5  ;;  %v1001_v0 = vld [vmem:[#allocation2 + $0x28] sm:$0xf] }
  0x9d   : > { %6197 = vmatprep.subr.bf16.mxu1 %v6718_v42  ;;  %v1113_v60 = vsel %vm7176_vm9, %v1108_v50, %v1112_v33  ;;  %v1400_v63 = vrot.slane %v1398_v53, 5  ;;  %v1124_v4 = vshll.u32 %v1001_v0, 16  ;;  %v1128_v5 = vshrl.u32 %v1001_v0, 16  ;;  %v833_v6 = vld [vmem:[#allocation2 + $0xb4] sm:$0xf]  ;;  %v6707_v20 = vld [vmem:[#allocation2 + $0xa8] sm:$0xff]  }
  0x9e   : > { %v5657_v2 = vcombine.low %v1103_v43, %v1113_v60  ;;  %v1395_v3 = vor.u32 %v1394_v57, %v1390_v56  ;;  %v837_v7 = vld [vmem:[#allocation2 + $0xbc] sm:$0x1]  ;;  %v1385_v8 = vor.u32 %v1384_v62, %v1381_v61  ;;  %v665_v11 = vor.u32 %v663_v41, %v662_v59  ;;  %v276_v36 = vld [vmem:[%s7146_s30 + $0x18] sm:$0xf]  ;;  %v277_v40 = vld [vmem:[%s7146_s30 + $0x1c] sm:$0xf] }
  0x9f   : > { %v1000_v9 = vld [vmem:[#allocation2 + $0x24] sm:$0xf]  ;;  %v667_v12 = vrot.slane %v662_v59, 4  ;;  %v834_v13 = vsel %vm7192_vm11, %v657_v49, %v833_v6  ;;  %v1002_v16 = vld [vmem:[#allocation2 + $0x2c] sm:$0x1]  ;;  %v1126_v15 = vrot.slane %v1124_v4, 5 }
  0xa0   : > { %6198 = vmatpush3.bf16.msra.mxu1 %v6719_v1  ;;  %4454 = vmatprep.mubr.bf16.mxu0 %v5657_v2  ;;  %v1396_v14 = vrot.slane %v1395_v3, 4  ;;  %v1115_v17 = vshrl.u32 %v1000_v9, 16  ;;  %v1118_v18 = vshll.u32 %v1000_v9, 16  ;;  %835 = vst [vmem:[#allocation2 + $0xb4] sm:$0xf] %v834_v13  ;;  %v1386_v19 = vrot.slane %v1385_v8, 4 }
  0xa1   : > { %4455 = vmatmul.mubr.bf16.gmra.mrb[8].mxu0 %v6706_v54  ;;  %v1130_v21 = vrot.slane %v1128_v5, 4  ;;  %v1134_v23 = vshll.u32 %v1002_v16, 16  ;;  %v666_v24 = vsel %vm7182_vm10, %v658_v58, %v665_v11  ;;  %v838_v28 = vsel %vm7158_vm5, %v667_v12, %v837_v7  ;;  %v6722_v32 = vld [vmem:[#allocation7 + $0x1c0] sm:$0xff]   ;;  %v6712_v39 = vld [vmem:[#allocation2 + $0x24] sm:$0xff]   ;;  %v322_v41 = vld [vmem:[#allocation2 + $0x30] sm:$0x1] }
  0xa2   : > { %v1401_v25 = vsel %vm7176_vm9, %v1396_v14, %v1400_v63  ;;  %v1117_v26 = vrot.slane %v1115_v17, 4  ;;  %v1120_v27 = vrot.slane %v1118_v18, 5  ;;  %836 = vst [vmem:[#allocation2 + $0xb8] sm:$0xf] %v666_v24  ;;  %v1391_v29 = vsel %vm7176_vm9, %v1386_v19, %v1390_v56  ;;  %839 = vst [vmem:[#allocation2 + $0xbc] sm:$0x1] %v838_v28  ;;  %6407 = vmatprep.subr.bf16.mxu1 %v6722_v32 }
  0xa3   : > { %v1131_v30 = vor.u32 %v1130_v21, %v1126_v15  ;;  %v1136_v31 = vrot.slane %v1134_v23, 5  ;;  %v5669_v33 = vcombine.low %v1391_v29, %v1401_v25  ;;  %v465_v42 = vshrl.u32 %v276_v36, 16  ;;  %v372_v51 = vld [vmem:[#allocation2 + $0x38] sm:$0x1]  ;;  %v6724_v53 = vld [vmem:[#allocation7 + $0x158] sm:$0xff]  }
  0xa4   : > { %v1121_v34 = vor.u32 %v1120_v27, %v1117_v26  ;;  %v323_v45 = vsel %vm7158_vm5, 0, %v322_v41  ;;  %v468_v46 = vshll.u32 %v276_v36, 16  ;;  %v373_v57 = vsel %vm7165_vm8, 0, %v372_v51  ;;  %6301 = vmatprep.subr.bf16.mxu0 %v6724_v53  ;;  %v6725_v2 = vld [vmem:[#allocation7 + $0x118] sm:$0xff]   ;;  %v1506_v9 = vld [vmem:[#allocation2] sm:$0xe] }
  0xa5   : > { %v1132_v35 = vrot.slane %v1131_v30, 4  ;;  %4550 = vmatprep.mubr.bf16.mxu1 %v5669_v33  ;;  %324 = vst [vmem:[#allocation2 + $0x30] sm:$0x1] %v323_v45  ;;  %v467_v52 = vrot.slane %v465_v42, 7  ;;  %374 = vst [vmem:[#allocation2 + $0x38] sm:$0x1] %v373_v57  ;;  %6302 = vmatpush3.bf16.msra.mxu0 %v6725_v2 }
  0xa6   : > { %v1122_v37 = vrot.slane %v1121_v34, 4  ;;  %4551 = vmatmul.mubr.bf16.gmra.mrb[8].mxu1 %v6707_v20  ;;  %v473_v1 = vshrl.u32 %v277_v40, 16  ;;  %v476_v6 = vshll.u32 %v277_v40, 16  ;;  %v1507_v11 = vld [vmem:[#allocation2 + $0x4] sm:$0xf]  ;;  %v5671_v20 = vrot.slane %v1506_v9, 9 }
  0xa7   : > { %v1137_v43 = vsel %vm7176_vm9, %v1132_v35, %v1136_v31  ;;  %v1036_v44 = vld [vmem:[#allocation2 + $0xb4] sm:$0xf]  ;;  %v470_v0 = vor.u32 %v468_v46, %v467_v52  ;;  %v471_v7 = vrot.slane %v467_v52, 4  ;;  %v1508_v16 = vld [vmem:[#allocation2 + $0x8] sm:$0x1]  ;;  %v1607_v17 = vrot.slane %v1507_v11, 5 }
  0xa8   : > { %v1127_v48 = vsel %vm7176_vm9, %v1122_v37, %v1126_v15  ;;  %v1403_v49 = vshrl.u32 %v1036_v44, 16  ;;  %v1406_v50 = vshll.u32 %v1036_v44, 16  ;;  %v475_v8 = vrot.slane %v473_v1, 7  ;;  %v6730_v26 = vld [vmem:[#allocation7 + $0x160] sm:$0xff]   ;;  %v6720_v29 = vld [vmem:[#allocation2 + $0xc] sm:$0xff]  }
  0xa9   : > { %v5658_v54 = vcombine.low %v1127_v48, %v1137_v43  ;;  %v1037_v56 = vld [vmem:[#allocation2 + $0xb8] sm:$0xf]  ;;  %v1038_v58 = vld [vmem:[#allocation2 + $0xbc] sm:$0x1]  ;;  %v1609_v31 = vrot.slane %v1607_v17, 4  ;;  %v1610_v32 = vrot.slane %v1508_v16, 5  ;;  %6303 = vmatprep.subr.bf16.mxu0 %v6730_v26  ;;  %v1608_v48 = vsel %vm7332_vm14, %v5671_v20, %v1607_v17 }
  0xaa   : > { %v1405_v59 = vrot.slane %v1403_v49, 4  ;;  %v1408_v60 = vrot.slane %v1406_v50, 5  ;;  %v1412_v61 = vshll.u32 %v1037_v56, 16  ;;  %v1416_v62 = vshrl.u32 %v1037_v56, 16  ;;  %v6713_v24 = vld [vmem:[#allocation2 + $0xb4] sm:$0xff]   ;;  %v6731_v16 = vld [vmem:[#allocation7 + $0x1c8] sm:$0xff]  }
  0xab   : > { %4462 = vmatprep.mubr.bf16.mxu0 %v5658_v54  ;;  %v1422_v63 = vshll.u32 %v1038_v58, 16  ;;  %v478_v18 = vor.u32 %v476_v6, %v475_v8  ;;  %v480_v15 = vrot.slane %v475_v8, 4  ;;  %v278_v36 = vld [vmem:[%s7146_s30 + $0x20] sm:$0xf]  ;;  %v279_v37 = vld [vmem:[%s7146_s30 + $0x24] sm:$0xf]  ;;  %v1611_v49 = vsel %vm7332_vm14, %v1609_v31, %v1610_v32 }
  0xac   : > { %v1409_v3 = vor.u32 %v1408_v60, %v1405_v59  ;;  %v1414_v4 = vrot.slane %v1412_v61, 5  ;;  %v1418_v5 = vrot.slane %v1416_v62, 4  ;;  %4463 = vmatmul.mubr.bf16.gmra.mrb[12].mxu0 %v6712_v39  ;;  %v756_v19 = vld [vmem:[#allocation2 + $0x30] sm:$0xf]  ;;  %v760_v28 = vld [vmem:[#allocation2 + $0x38] sm:$0x1] }
  0xad   : > { %v1424_v14 = vrot.slane %v1422_v63, 5  ;;  %v757_v25 = vsel %vm7192_vm11, %v470_v0, %v756_v19  ;;  %v479_v27 = vsel %vm7182_vm10, %v471_v7, %v478_v18  ;;  %v761_v34 = vsel %vm7158_vm5, %v480_v15, %v760_v28  ;;  %v325_v39 = vld [vmem:[#allocation2 + $0x3c] sm:$0x1]  ;;  %v375_v40 = vld [vmem:[#allocation2 + $0x44] sm:$0x1] }
  0xae   : > { %v1410_v12 = vrot.slane %v1409_v3, 4  ;;  %v1419_v13 = vor.u32 %v1418_v5, %v1414_v4  ;;  %758 = vst [vmem:[#allocation2 + $0x30] sm:$0xf] %v757_v25  ;;  %759 = vst [vmem:[#allocation2 + $0x34] sm:$0xf] %v479_v27  ;;  %v482_v41 = vshrl.u32 %v278_v36, 16  ;;  %v5687_v0 = vcombine.low %v1608_v48, %v1611_v49 }
  0xaf   : > { %762 = vst [vmem:[#allocation2 + $0x38] sm:$0x1] %v761_v34  ;;  %v485_v42 = vshll.u32 %v278_v36, 16  ;;  %v326_v43 = vsel %vm7158_vm5, 0, %v325_v39  ;;  %v376_v44 = vsel %vm7165_vm8, 0, %v375_v40  ;;  %v490_v45 = vshrl.u32 %v279_v37, 16 }
  0xb0   : > { %v1415_v21 = vsel %vm7176_vm9, %v1410_v12, %v1414_v4  ;;  %v1420_v23 = vrot.slane %v1419_v13, 4  ;;  %v493_v46 = vshll.u32 %v279_v37, 16  ;;  %327 = vst [vmem:[#allocation2 + $0x3c] sm:$0x1] %v326_v43  ;;  %377 = vst [vmem:[#allocation2 + $0x44] sm:$0x1] %v376_v44 }
  0xb1   : > { %v484_v50 = vrot.slane %v482_v41, 7  ;;  %v1509_v51 = vld [vmem:[#allocation2 + $0xc] sm:$0xe]  ;;  %v6732_v52 = vld [vmem:[#allocation7 + $0x120] sm:$0xff]   ;;  %v492_v53 = vrot.slane %v490_v45, 7  ;;  %v6733_v39 = vld [vmem:[#allocation7 + $0x188] sm:$0xff]  }
  0xb2   : > { %v1425_v33 = vsel %vm7176_vm9, %v1420_v23, %v1424_v14  ;;  %v1510_v54 = vld [vmem:[#allocation2 + $0x10] sm:$0xf]  ;;  %v1511_v56 = vld [vmem:[#allocation2 + $0x14] sm:$0x1]  ;;  %v5672_v57 = vrot.slane %v1509_v51, 9  ;;  %6304 = vmatpush3.bf16.msra.mxu0 %v6732_v52  ;;  %v6723_v1 = vld [vmem:[#allocation7 + $0x180] sm:$0xff]  }
  0xb3   : > { %v5670_v35 = vcombine.low %v1415_v21, %v1425_v33  ;;  %v488_v59 = vrot.slane %v484_v50, 4  ;;  %v1614_v60 = vrot.slane %v1510_v54, 5  ;;  %v495_v2 = vor.u32 %v493_v46, %v492_v53  ;;  %v6726_v8 = vld [vmem:[#allocation2 + $0x18] sm:$0xff]   ;;  %v280_v14 = vld [vmem:[%s7146_s30 + $0x28] sm:$0xf]  ;;  %v6728_v49 = vld [vmem:[#allocation2 + $0x24] sm:$0xff]  }
  0xb4   : > { %v487_v6 = vor.u32 %v485_v42, %v484_v50  ;;  %v497_v7 = vrot.slane %v492_v53, 4  ;;  %v1617_v19 = vrot.slane %v1511_v56, 5  ;;  %v281_v20 = vld [vmem:[%s7146_s30 + $0x2c] sm:$0xf]  ;;  %v499_v26 = vshrl.u32 %v280_v14, 16 }
  0xb5   : > { %4558 = vmatprep.mubr.bf16.mxu1 %v5670_v35  ;;  %v1003_v58 = vld [vmem:[#allocation2 + $0x30] sm:$0xf]  ;;  %v1004_v61 = vld [vmem:[#allocation2 + $0x34] sm:$0xf]  ;;  %v496_v13 = vsel %vm7182_vm10, %v488_v59, %v495_v2  ;;  %v1616_v15 = vrot.slane %v1614_v60, 4  ;;  %v1615_v31 = vsel %vm7332_vm14, %v5672_v57, %v1614_v60  ;;  %v502_v43 = vshll.u32 %v280_v14, 16 }
  0xb6   : > { %4559 = vmatmul.mubr.bf16.gmra.mrb[12].mxu1 %v6713_v24  ;;  %v1139_v62 = vshrl.u32 %v1003_v58, 16  ;;  %v1142_v63 = vshll.u32 %v1003_v58, 16  ;;  %v1005_v3 = vld [vmem:[#allocation2 + $0x38] sm:$0x1]  ;;  %v1148_v4 = vshll.u32 %v1004_v61, 16  ;;  %v1152_v5 = vshrl.u32 %v1004_v61, 16 }
  0xb7   : > { %4599 = vmatprep.mubr.bf16.mxu1 %v6720_v29  ;;  %v1158_v12 = vshll.u32 %v1005_v3, 16  ;;  %766 = vst [vmem:[#allocation2 + $0x40] sm:$0xf] %v496_v13  ;;  %v763_v24 = vld [vmem:[#allocation2 + $0x3c] sm:$0xf]  ;;  %v1618_v35 = vsel %vm7332_vm14, %v1616_v15, %v1617_v19  ;;  %v6721_v41 = vld [vmem:[#allocation2 + $0x30] sm:$0xff]  }
  0xb8   : > { %v1141_v9 = vrot.slane %v1139_v62, 4  ;;  %v1144_v11 = vrot.slane %v1142_v63, 5  ;;  %v1150_v17 = vrot.slane %v1148_v4, 5  ;;  %v1154_v18 = vrot.slane %v1152_v5, 4  ;;  %v767_v25 = vld [vmem:[#allocation2 + $0x44] sm:$0x1] }
  0xb9   : > { %v1160_v23 = vrot.slane %v1158_v12, 5  ;;  %v764_v28 = vsel %vm7192_vm11, %v487_v6, %v763_v24  ;;  %v768_v29 = vsel %vm7158_vm5, %v497_v7, %v767_v25  ;;  %v328_v32 = vld [vmem:[#allocation2 + $0x48] sm:$0x1]  ;;  %v378_v33 = vld [vmem:[#allocation2 + $0x50] sm:$0x1]  ;;  %v501_v42 = vrot.slane %v499_v26, 7 }
  0xba   : > { %v1145_v21 = vor.u32 %v1144_v11, %v1141_v9  ;;  %v1155_v27 = vor.u32 %v1154_v18, %v1150_v17  ;;  %765 = vst [vmem:[#allocation2 + $0x3c] sm:$0xf] %v764_v28  ;;  %769 = vst [vmem:[#allocation2 + $0x44] sm:$0x1] %v768_v29  ;;  %v329_v36 = vsel %vm7158_vm5, 0, %v328_v32  ;;  %v379_v37 = vsel %vm7165_vm8, 0, %v378_v33 }
  0xbb   : > { %330 = vst [vmem:[#allocation2 + $0x48] sm:$0x1] %v329_v36  ;;  %380 = vst [vmem:[#allocation2 + $0x50] sm:$0x1] %v379_v37  ;;  %v507_v44 = vshrl.u32 %v281_v20, 16  ;;  %v510_v48 = vshll.u32 %v281_v20, 16  ;;  %v5688_v54 = vcombine.low %v1615_v31, %v1618_v35  ;;  %v504_v3 = vor.u32 %v502_v43, %v501_v42 }
  0xbc   : > { %v1146_v34 = vrot.slane %v1145_v21, 4  ;;  %v1156_v40 = vrot.slane %v1155_v27, 4  ;;  %v1512_v45 = vld [vmem:[#allocation2 + $0x18] sm:$0xe]  ;;  %v1513_v50 = vld [vmem:[#allocation2 + $0x1c] sm:$0xf] }
  0xbd   : > { %v1514_v51 = vld [vmem:[#allocation2 + $0x20] sm:$0x1]  ;;  %v5673_v52 = vrot.slane %v1512_v45, 9  ;;  %v505_v56 = vrot.slane %v501_v42, 4  ;;  %v509_v57 = vrot.slane %v507_v44, 7  ;;  %v1621_v60 = vrot.slane %v1513_v50, 5 }
  0xbe   : > { %4600 = vmatmul.mubr.bf16.vlgmr.msra.gmra.mrb[16].mxu1 %v5687_v0  ;;  %v1151_v46 = vsel %vm7176_vm9, %v1146_v34, %v1150_v17  ;;  %v1161_v53 = vsel %vm7176_vm9, %v1156_v40, %v1160_v23  ;;  %v1007_v59 = vld [vmem:[#allocation2 + $0x40] sm:$0xf]  ;;  %v1624_v61 = vrot.slane %v1514_v51, 5  ;;  %v6734_v25 = vld [vmem:[#allocation2 + $0x30] sm:$0xff]   ;;  %v282_v29 = vld [vmem:[%s7146_s30 + $0x30] sm:$0xf] }
  0xbf   : > { %6408 = vmatpush3.bf16.msra.mxu1 %v6723_v1  ;;  %4607 = vmatprep.mubr.bf16.mxu1 %v6726_v8  ;;  %v5659_v58 = vcombine.low %v1151_v46, %v1161_v53  ;;  %v1172_v62 = vshll.u32 %v1007_v59, 16  ;;  %v1176_v63 = vshrl.u32 %v1007_v59, 16  ;;  %v512_v0 = vor.u32 %v510_v48, %v509_v57  ;;  %v6736_v2 = vld [vmem:[#allocation7 + $0x168] sm:$0xff]   ;;  %v6740_v31 = vld [vmem:[#allocation7 + $0x1d0] sm:$0xff]   ;;  %v331_v34 = vld [vmem:[#allocation2 + $0x54] sm:$0x1] }
  0xc0   : > { %6409 = vmatprep.subr.bf16.mxu1 %v6731_v16  ;;  %v514_v1 = vrot.slane %v509_v57, 4  ;;  %v1623_v4 = vrot.slane %v1621_v60, 4  ;;  %v6737_v5 = vld [vmem:[#allocation7 + $0x128] sm:$0xff]   ;;  %v1622_v12 = vsel %vm7332_vm14, %v5673_v52, %v1621_v60  ;;  %6305 = vmatprep.subr.bf16.mxu0 %v6736_v2  ;;  %v283_v33 = vld [vmem:[%s7146_s30 + $0x34] sm:$0xf]  ;;  %v332_v37 = vsel %vm7158_vm5, 0, %v331_v34 }
  0xc1   : > { %4470 = vmatprep.mubr.bf16.mxu0 %v5659_v58  ;;  %v1006_v6 = vld [vmem:[#allocation2 + $0x3c] sm:$0xf]  ;;  %v1008_v7 = vld [vmem:[#allocation2 + $0x44] sm:$0x1]  ;;  %v1174_v8 = vrot.slane %v1172_v62, 5  ;;  %v1178_v9 = vrot.slane %v1176_v63, 4  ;;  %v513_v11 = vsel %vm7182_vm10, %v505_v56, %v512_v0  ;;  %6306 = vmatpush3.bf16.msra.mxu0 %v6737_v5 }
  0xc2   : > { %4471 = vmatmul.mubr.bf16.gmra.mrb[16].mxu0 %v6721_v41  ;;  %v1163_v13 = vshrl.u32 %v1006_v6, 16  ;;  %v1166_v14 = vshll.u32 %v1006_v6, 16  ;;  %v1182_v16 = vshll.u32 %v1008_v7, 16  ;;  %773 = vst [vmem:[#allocation2 + $0x4c] sm:$0xf] %v513_v11  ;;  %v1625_v17 = vsel %vm7332_vm14, %v1623_v4, %v1624_v61  ;;  %v6741_v41 = vld [vmem:[#allocation7 + $0x190] sm:$0xff]  }
  0xc3   : > { %6410 = vmatpush3.bf16.msra.mxu1 %v6733_v39  ;;  %v1179_v18 = vor.u32 %v1178_v9, %v1174_v8  ;;  %v770_v15 = vld [vmem:[#allocation2 + $0x48] sm:$0xf]  ;;  %v774_v19 = vld [vmem:[#allocation2 + $0x50] sm:$0x1]  ;;  %v5689_v28 = vcombine.low %v1622_v12, %v1625_v17  ;;  %v381_v35 = vld [vmem:[#allocation2 + $0x5c] sm:$0x1] }
  0xc4   : > { %v1165_v20 = vrot.slane %v1163_v13, 4  ;;  %v1168_v21 = vrot.slane %v1166_v14, 5  ;;  %v1184_v23 = vrot.slane %v1182_v16, 5  ;;  %v771_v24 = vsel %vm7192_vm11, %v504_v3, %v770_v15  ;;  %6411 = vmatprep.subr.bf16.mxu1 %v6740_v31  ;;  %v6727_v43 = vld [vmem:[#allocation2 + $0x3c] sm:$0xff]   ;;  %333 = vst [vmem:[#allocation2 + $0x54] sm:$0x1] %v332_v37 }
  0xc5   : > { %v1180_v26 = vrot.slane %v1179_v18, 4  ;;  %772 = vst [vmem:[#allocation2 + $0x48] sm:$0xf] %v771_v24  ;;  %v775_v27 = vsel %vm7158_vm5, %v514_v1, %v774_v19  ;;  %v382_v39 = vsel %vm7165_vm8, 0, %v381_v35  ;;  %v516_v40 = vshrl.u32 %v282_v29, 16  ;;  %v6744_v50 = vld [vmem:[#allocation7 + $0x170] sm:$0xff]  }
  0xc6   : > { %4608 = vmatmul.mubr.bf16.gmra.mrb[20].mxu1 %v5688_v54  ;;  %v1169_v32 = vor.u32 %v1168_v21, %v1165_v20  ;;  %776 = vst [vmem:[#allocation2 + $0x50] sm:$0x1] %v775_v27  ;;  %383 = vst [vmem:[#allocation2 + $0x5c] sm:$0x1] %v382_v39  ;;  %v519_v44 = vshll.u32 %v282_v29, 16  ;;  %v524_v45 = vshrl.u32 %v283_v33, 16  ;;  %6307 = vmatprep.subr.bf16.mxu0 %v6744_v50 }
  0xc7   : > { %4615 = vmatprep.mubr.bf16.mxu1 %v6728_v49  ;;  %v1185_v36 = vsel %vm7176_vm9, %v1180_v26, %v1184_v23  ;;  %v527_v46 = vshll.u32 %v283_v33, 16  ;;  %v518_v49 = vrot.slane %v516_v40, 7  ;;  %v1515_v56 = vld [vmem:[#allocation2 + $0x24] sm:$0xe]  ;;  %6412 = vmatpush3.bf16.msra.mxu1 %v6741_v41  ;;  %v6745_v57 = vld [vmem:[#allocation7 + $0x130] sm:$0xff]   ;;  %v6738_v39 = vld [vmem:[#allocation2 + $0x3c] sm:$0xff]  }
  0xc8   : > { %v1170_v42 = vrot.slane %v1169_v32, 4  ;;  %v526_v54 = vrot.slane %v524_v45, 7  ;;  %v1516_v60 = vld [vmem:[#allocation2 + $0x28] sm:$0xf]  ;;  %v1517_v2 = vld [vmem:[#allocation2 + $0x2c] sm:$0x1]  ;;  %6308 = vmatpush3.bf16.msra.mxu0 %v6745_v57 }
  0xc9   : > { %v1010_v48 = vld [vmem:[#allocation2 + $0x4c] sm:$0xf]  ;;  %v522_v59 = vrot.slane %v518_v49, 4  ;;  %v521_v0 = vor.u32 %v519_v44, %v518_v49  ;;  %v5674_v7 = vrot.slane %v1515_v56, 9  ;;  %v1628_v12 = vrot.slane %v1516_v60, 5  ;;  %v6748_v44 = vld [vmem:[#allocation7 + $0x1d8] sm:$0xff]  }
  0xca   : > { %v1175_v51 = vsel %vm7176_vm9, %v1170_v42, %v1174_v8  ;;  %v1196_v52 = vshll.u32 %v1010_v48, 16  ;;  %v1200_v53 = vshrl.u32 %v1010_v48, 16  ;;  %v529_v1 = vor.u32 %v527_v46, %v526_v54  ;;  %v284_v26 = vld [vmem:[%s7146_s30 + $0x38] sm:$0xf]  ;;  %v285_v27 = vld [vmem:[%s7146_s30 + $0x3c] sm:$0xf]  ;;  %6413 = vmatprep.subr.bf16.mxu1 %v6748_v44 }
  0xcb   : > { %v5660_v58 = vcombine.low %v1175_v51, %v1185_v36  ;;  %v531_v6 = vrot.slane %v526_v54, 4  ;;  %v777_v16 = vld [vmem:[#allocation2 + $0x54] sm:$0xf]  ;;  %v1629_v23 = vsel %vm7332_vm14, %v5674_v7, %v1628_v12  ;;  %v1630_v24 = vrot.slane %v1628_v12, 4  ;;  %v334_v29 = vld [vmem:[#allocation2 + $0x60] sm:$0x1] }
  0xcc   : > { %v1009_v61 = vld [vmem:[#allocation2 + $0x48] sm:$0xf]  ;;  %v1198_v62 = vrot.slane %v1196_v52, 5  ;;  %v1202_v63 = vrot.slane %v1200_v53, 4  ;;  %v530_v11 = vsel %vm7182_vm10, %v522_v59, %v529_v1  ;;  %v778_v19 = vsel %vm7192_vm11, %v521_v0, %v777_v16  ;;  %v1518_v48 = vld [vmem:[#allocation2 + $0x30] sm:$0xe] }
  0xcd   : > { %4478 = vmatprep.mubr.bf16.mxu0 %v5660_v58  ;;  %v1011_v3 = vld [vmem:[#allocation2 + $0x50] sm:$0x1]  ;;  %v1187_v4 = vshrl.u32 %v1009_v61, 16  ;;  %v1190_v5 = vshll.u32 %v1009_v61, 16  ;;  %780 = vst [vmem:[#allocation2 + $0x58] sm:$0xf] %v530_v11 }
  0xce   : > { %4616 = vmatmul.mubr.bf16.gmra.mrb[24].mxu1 %v5689_v28  ;;  %4479 = vmatmul.mubr.bf16.gmra.mrb[20].mxu0 %v6727_v43  ;;  %v1203_v8 = vor.u32 %v1202_v63, %v1198_v62  ;;  %v1206_v9 = vshll.u32 %v1011_v3, 16  ;;  %v781_v17 = vld [vmem:[#allocation2 + $0x5c] sm:$0x1]  ;;  %779 = vst [vmem:[#allocation2 + $0x54] sm:$0xf] %v778_v19  ;;  %v533_v32 = vshrl.u32 %v284_v26, 16 }
  0xcf   : > { %4623 = vmatprep.mubr.bf16.mxu1 %v6734_v25  ;;  %v1189_v13 = vrot.slane %v1187_v4, 4  ;;  %v1192_v14 = vrot.slane %v1190_v5, 5  ;;  %v782_v20 = vsel %vm7158_vm5, %v531_v6, %v781_v17  ;;  %v1631_v25 = vrot.slane %v1517_v2, 5  ;;  %v384_v31 = vld [vmem:[#allocation2 + $0x68] sm:$0x1] }
  0xd0   : > { %v1204_v18 = vrot.slane %v1203_v8, 4  ;;  %v1208_v15 = vrot.slane %v1206_v9, 5  ;;  %783 = vst [vmem:[#allocation2 + $0x5c] sm:$0x1] %v782_v20  ;;  %v536_v33 = vshll.u32 %v284_v26, 16  ;;  %v335_v36 = vsel %vm7158_vm5, 0, %v334_v29 }
  0xd1   : > { %v1193_v21 = vor.u32 %v1192_v14, %v1189_v13  ;;  %v1632_v35 = vsel %vm7332_vm14, %v1630_v24, %v1631_v25  ;;  %v385_v37 = vsel %vm7165_vm8, 0, %v384_v31  ;;  %336 = vst [vmem:[#allocation2 + $0x60] sm:$0x1] %v335_v36  ;;  %v535_v41 = vrot.slane %v533_v32, 7  ;;  %v6729_v46 = vld [vmem:[#allocation2 + $0x48] sm:$0xff]  }
  0xd2   : > { %v1209_v28 = vsel %vm7176_vm9, %v1204_v18, %v1208_v15  ;;  %v5690_v40 = vcombine.low %v1629_v23, %v1632_v35  ;;  %386 = vst [vmem:[#allocation2 + $0x68] sm:$0x1] %v385_v37  ;;  %v541_v42 = vshrl.u32 %v285_v27, 16  ;;  %v544_v43 = vshll.u32 %v285_v27, 16  ;;  %v1519_v49 = vld [vmem:[#allocation2 + $0x34] sm:$0xf] }
  0xd3   : > { %v1194_v34 = vrot.slane %v1193_v21, 4  ;;  %v539_v52 = vrot.slane %v535_v41, 4  ;;  %v5675_v57 = vrot.slane %v1518_v48, 9  ;;  %v1635_v58 = vrot.slane %v1519_v49, 5  ;;  %v1520_v3 = vld [vmem:[#allocation2 + $0x38] sm:$0x1] }
  0xd4   : > { %v1013_v51 = vld [vmem:[#allocation2 + $0x58] sm:$0xf]  ;;  %v543_v53 = vrot.slane %v541_v42, 7  ;;  %v538_v61 = vor.u32 %v536_v33, %v535_v41  ;;  %v1638_v21 = vrot.slane %v1520_v3, 5  ;;  %v287_v23 = vld [vmem:[%s7146_s30 + $0x44] sm:$0xf] }
  0xd5   : > { %v1199_v45 = vsel %vm7176_vm9, %v1194_v34, %v1198_v62  ;;  %v1220_v54 = vshll.u32 %v1013_v51, 16  ;;  %v1224_v56 = vshrl.u32 %v1013_v51, 16  ;;  %v1012_v59 = vld [vmem:[#allocation2 + $0x54] sm:$0xf]  ;;  %v1637_v17 = vrot.slane %v1635_v58, 4  ;;  %v6742_v25 = vld [vmem:[#allocation2 + $0x48] sm:$0xff]  }
  0xd6   : > { %v5661_v50 = vcombine.low %v1199_v45, %v1209_v28  ;;  %4624 = vmatmul.mubr.bf16.gmra.mrb[28].mxu1 %v5690_v40  ;;  %v546_v63 = vor.u32 %v544_v43, %v543_v53  ;;  %v1211_v62 = vshrl.u32 %v1012_v59, 16  ;;  %v1214_v0 = vshll.u32 %v1012_v59, 16  ;;  %v286_v18 = vld [vmem:[%s7146_s30 + $0x40] sm:$0xf]  ;;  %v337_v24 = vld [vmem:[#allocation2 + $0x6c] sm:$0x1] }
  0xd7   : > { %4631 = vmatprep.mubr.bf16.mxu1 %v6738_v39  ;;  %v1014_v60 = vld [vmem:[#allocation2 + $0x5c] sm:$0x1]  ;;  %v1222_v1 = vrot.slane %v1220_v54, 5  ;;  %v1226_v2 = vrot.slane %v1224_v56, 4  ;;  %v548_v6 = vrot.slane %v543_v53, 4  ;;  %v1636_v20 = vsel %vm7332_vm14, %v5675_v57, %v1635_v58  ;;  %v6735_v34 = vld [vmem:[#allocation2 + $0x54] sm:$0xff]  }
  0xd8   : > { %4486 = vmatprep.mubr.bf16.mxu0 %v5661_v50  ;;  %v1230_v4 = vshll.u32 %v1014_v60, 16  ;;  %v547_v5 = vsel %vm7182_vm10, %v539_v52, %v546_v63  ;;  %v1213_v7 = vrot.slane %v1211_v62, 4  ;;  %v1216_v8 = vrot.slane %v1214_v0, 5  ;;  %v784_v11 = vld [vmem:[#allocation2 + $0x60] sm:$0xf]  ;;  %v6749_v43 = vld [vmem:[#allocation7 + $0x198] sm:$0xff]  }
  0xd9   : > { %4487 = vmatmul.mubr.bf16.gmra.mrb[24].mxu0 %v6729_v46  ;;  %v1227_v9 = vor.u32 %v1226_v2, %v1222_v1  ;;  %787 = vst [vmem:[#allocation2 + $0x64] sm:$0xf] %v547_v5  ;;  %v788_v12 = vld [vmem:[#allocation2 + $0x68] sm:$0x1]  ;;  %v785_v14 = vsel %vm7192_vm11, %v538_v61, %v784_v11  ;;  %v338_v26 = vsel %vm7158_vm5, 0, %v337_v24  ;;  %v550_v28 = vshrl.u32 %v286_v18, 16  ;;  %6414 = vmatpush3.bf16.msra.mxu1 %v6749_v43 }
  0xda   : > { %v1232_v13 = vrot.slane %v1230_v4, 5  ;;  %v789_v16 = vsel %vm7158_vm5, %v548_v6, %v788_v12  ;;  %v1217_v15 = vor.u32 %v1216_v8, %v1213_v7  ;;  %786 = vst [vmem:[#allocation2 + $0x60] sm:$0xf] %v785_v14  ;;  %v387_v27 = vld [vmem:[#allocation2 + $0x74] sm:$0x1]  ;;  %v553_v29 = vshll.u32 %v286_v18, 16 }
  0xdb   : > { %v1228_v19 = vrot.slane %v1227_v9, 4  ;;  %790 = vst [vmem:[#allocation2 + $0x68] sm:$0x1] %v789_v16  ;;  %v558_v31 = vshrl.u32 %v287_v23, 16  ;;  %v1639_v35 = vsel %vm7332_vm14, %v1637_v17, %v1638_v21  ;;  %339 = vst [vmem:[#allocation2 + $0x6c] sm:$0x1] %v338_v26 }
  0xdc   : > { %v1218_v32 = vrot.slane %v1217_v15, 4  ;;  %v388_v36 = vsel %vm7165_vm8, 0, %v387_v27  ;;  %v5691_v37 = vcombine.low %v1636_v20, %v1639_v35  ;;  %v552_v39 = vrot.slane %v550_v28, 7  ;;  %v1521_v42 = vld [vmem:[#allocation2 + $0x3c] sm:$0xe]  ;;  %v6750_v49 = vld [vmem:[#allocation7 + $0x178] sm:$0xff]  }
  0xdd   : > { %v1233_v33 = vsel %vm7176_vm9, %v1228_v19, %v1232_v13  ;;  %389 = vst [vmem:[#allocation2 + $0x74] sm:$0x1] %v388_v36  ;;  %v560_v40 = vrot.slane %v558_v31, 7  ;;  %v561_v41 = vshll.u32 %v287_v23, 16  ;;  %v1522_v45 = vld [vmem:[#allocation2 + $0x40] sm:$0xf]  ;;  %6309 = vmatprep.subr.bf16.mxu0 %v6750_v49 }
  0xde   : > { %v1223_v44 = vsel %vm7176_vm9, %v1218_v32, %v1222_v1  ;;  %v1523_v46 = vld [vmem:[#allocation2 + $0x44] sm:$0x1]  ;;  %v5676_v48 = vrot.slane %v1521_v42, 9  ;;  %4632 = vmatmul.mubr.bf16.gmra.mrb[32].mxu1 %v5691_v37  ;;  %v555_v52 = vor.u32 %v553_v29, %v552_v39  ;;  %v556_v53 = vrot.slane %v552_v39, 4  ;;  %v6751_v56 = vld [vmem:[#allocation7 + $0x138] sm:$0xff]   ;;  %v6755_v11 = vld [vmem:[#allocation7 + $0x1e0] sm:$0xff]  }
  0xdf   : > { %v5662_v50 = vcombine.low %v1223_v44, %v1233_v33  ;;  %v563_v54 = vor.u32 %v561_v41, %v560_v40  ;;  %v565_v59 = vrot.slane %v560_v40, 4  ;;  %4639 = vmatprep.mubr.bf16.mxu1 %v6742_v25  ;;  %v1642_v60 = vrot.slane %v1522_v45, 5  ;;  %v6746_v9 = vld [vmem:[#allocation2 + $0x54] sm:$0xff]   ;;  %6310 = vmatpush3.bf16.msra.mxu0 %v6751_v56  ;;  %v288_v25 = vld [vmem:[%s7146_s30 + $0x48] sm:$0xf] }
  0xe0   : > { %v1016_v51 = vld [vmem:[#allocation2 + $0x64] sm:$0xf]  ;;  %v1645_v8 = vrot.slane %v1523_v46, 5  ;;  %6415 = vmatprep.subr.bf16.mxu1 %v6755_v11  ;;  %v7440_v20 = vld [vmem:[#allocation7 + $0x200] sm:$0xff]   ;;  %v390_v29 = vld [vmem:[#allocation2 + $0x80] sm:$0x1] }
  0xe1   : > { %v1244_v57 = vshll.u32 %v1016_v51, 16  ;;  %v1248_v58 = vshrl.u32 %v1016_v51, 16  ;;  %4494 = vmatprep.mubr.bf16.mxu0 %v5662_v50  ;;  %v1015_v61 = vld [vmem:[#allocation2 + $0x60] sm:$0xf]  ;;  %v564_v62 = vsel %vm7182_vm10, %v556_v53, %v563_v54  ;;  %v1643_v6 = vsel %vm7332_vm14, %v5676_v48, %v1642_v60  ;;  %v289_v26 = vld [vmem:[%s7146_s30 + $0x4c] sm:$0xf]  ;;  %6543 = vmatprep.subr.bf16.mxu0 %v7440_v20 }
  0xe2   : > { %v1017_v63 = vld [vmem:[#allocation2 + $0x68] sm:$0x1]  ;;  %4495 = vmatmul.mubr.bf16.gmra.mrb[28].mxu0 %v6735_v34  ;;  %v1235_v0 = vshrl.u32 %v1015_v61, 16  ;;  %v1238_v1 = vshll.u32 %v1015_v61, 16  ;;  %794 = vst [vmem:[#allocation2 + $0x70] sm:$0xf] %v564_v62 }
  0xe3   : > { %v1246_v2 = vrot.slane %v1244_v57, 5  ;;  %v1250_v3 = vrot.slane %v1248_v58, 4  ;;  %v1254_v4 = vshll.u32 %v1017_v63, 16  ;;  %v791_v5 = vld [vmem:[#allocation2 + $0x6c] sm:$0xf]  ;;  %v1644_v7 = vrot.slane %v1642_v60, 4 }
  0xe4   : > { %v1237_v12 = vrot.slane %v1235_v0, 4  ;;  %v1240_v13 = vrot.slane %v1238_v1, 5  ;;  %v792_v16 = vsel %vm7192_vm11, %v555_v52, %v791_v5  ;;  %v795_v17 = vld [vmem:[#allocation2 + $0x74] sm:$0x1]  ;;  %v6757_v27 = vld [vmem:[#allocation7 + $0x1a0] sm:$0xff]   ;;  %v567_v31 = vshrl.u32 %v288_v25, 16 }
  0xe5   : > { %v1251_v14 = vor.u32 %v1250_v3, %v1246_v2  ;;  %v1256_v18 = vrot.slane %v1254_v4, 5  ;;  %793 = vst [vmem:[#allocation2 + $0x6c] sm:$0xf] %v792_v16  ;;  %v796_v15 = vsel %vm7158_vm5, %v565_v59, %v795_v17  ;;  %v1646_v19 = vsel %vm7332_vm14, %v1644_v7, %v1645_v8  ;;  %v340_v28 = vld [vmem:[#allocation2 + $0x78] sm:$0x1]  ;;  %v6760_v37 = vld [vmem:[#allocation7 + $0x1e8] sm:$0xff]   ;;  %6416 = vmatpush3.bf16.msra.mxu1 %v6757_v27 }
  0xe6   : > { %v1241_v21 = vor.u32 %v1240_v13, %v1237_v12  ;;  %797 = vst [vmem:[#allocation2 + $0x74] sm:$0x1] %v796_v15  ;;  %v5692_v24 = vcombine.low %v1643_v6, %v1646_v19  ;;  %v570_v32 = vshll.u32 %v288_v25, 16  ;;  %v341_v35 = vsel %vm7158_vm5, 0, %v340_v28  ;;  %v6739_v43 = vld [vmem:[#allocation2 + $0x60] sm:$0xff]   ;;  %6417 = vmatprep.subr.bf16.mxu1 %v6760_v37 }
  0xe7   : > { %v1252_v23 = vrot.slane %v1251_v14, 4  ;;  %v391_v36 = vsel %vm7165_vm8, 0, %v390_v29  ;;  %342 = vst [vmem:[#allocation2 + $0x78] sm:$0x1] %v341_v35  ;;  %v569_v40 = vrot.slane %v567_v31, 7  ;;  %v575_v41 = vshrl.u32 %v289_v26, 16 }
  0xe8   : > { %v1242_v33 = vrot.slane %v1241_v21, 4  ;;  %4640 = vmatmul.mubr.bf16.gmra.mrb[36].mxu1 %v5692_v24  ;;  %392 = vst [vmem:[#allocation2 + $0x80] sm:$0x1] %v391_v36  ;;  %v578_v46 = vshll.u32 %v289_v26, 16  ;;  %v1524_v51 = vld [vmem:[#allocation2 + $0x48] sm:$0xe] }
  0xe9   : > { %v1257_v34 = vsel %vm7176_vm9, %v1252_v23, %v1256_v18  ;;  %v1019_v39 = vld [vmem:[#allocation2 + $0x70] sm:$0xf]  ;;  %4647 = vmatprep.mubr.bf16.mxu1 %v6746_v9  ;;  %v573_v49 = vrot.slane %v569_v40, 4  ;;  %v577_v50 = vrot.slane %v575_v41, 7  ;;  %v1525_v52 = vld [vmem:[#allocation2 + $0x4c] sm:$0xf]  ;;  %v572_v57 = vor.u32 %v570_v32, %v569_v40 }
  0xea   : > { %v1247_v42 = vsel %vm7176_vm9, %v1242_v33, %v1246_v2  ;;  %v1268_v44 = vshll.u32 %v1019_v39, 16  ;;  %v1272_v45 = vshrl.u32 %v1019_v39, 16  ;;  %v1526_v1 = vld [vmem:[#allocation2 + $0x50] sm:$0x1]  ;;  %v5677_v2 = vrot.slane %v1524_v51, 9  ;;  %v6762_v8 = vld [vmem:[#allocation7 + $0x1a8] sm:$0xff]  }
  0xeb   : > { %v5663_v48 = vcombine.low %v1247_v42, %v1257_v34  ;;  %v580_v61 = vor.u32 %v578_v46, %v577_v50  ;;  %v582_v63 = vrot.slane %v577_v50, 4  ;;  %v1649_v3 = vrot.slane %v1525_v52, 5  ;;  %v6752_v19 = vld [vmem:[#allocation2 + $0x60] sm:$0xff]   ;;  %6418 = vmatpush3.bf16.msra.mxu1 %v6762_v8  ;;  %v290_v27 = vld [vmem:[%s7146_s30 + $0x50] sm:$0xf]  ;;  %v6770_v8 = vld [vmem:[#allocation7 + $0x1f8] sm:$0xff]  }
  0xec   : > { %v1018_v53 = vld [vmem:[#allocation2 + $0x6c] sm:$0xf]  ;;  %v1270_v54 = vrot.slane %v1268_v44, 5  ;;  %v1274_v56 = vrot.slane %v1272_v45, 4  ;;  %v1652_v7 = vrot.slane %v1526_v1, 5  ;;  %v584_v34 = vshrl.u32 %v290_v27, 16 }
  0xed   : > { %4502 = vmatprep.mubr.bf16.mxu0 %v5663_v48  ;;  %v1020_v58 = vld [vmem:[#allocation2 + $0x74] sm:$0x1]  ;;  %v1259_v59 = vshrl.u32 %v1018_v53, 16  ;;  %v1262_v60 = vshll.u32 %v1018_v53, 16  ;;  %v581_v6 = vsel %vm7182_vm10, %v573_v49, %v580_v61  ;;  %v1650_v14 = vsel %vm7332_vm14, %v5677_v2, %v1649_v3  ;;  %v6743_v24 = vld [vmem:[#allocation2 + $0x6c] sm:$0xff]  }
  0xee   : > { %4503 = vmatmul.mubr.bf16.gmra.mrb[32].mxu0 %v6739_v43  ;;  %v1275_v62 = vor.u32 %v1274_v56, %v1270_v54  ;;  %v1278_v0 = vshll.u32 %v1020_v58, 16  ;;  %v798_v12 = vld [vmem:[#allocation2 + $0x78] sm:$0xf]  ;;  %801 = vst [vmem:[#allocation2 + $0x7c] sm:$0xf] %v581_v6  ;;  %v1651_v15 = vrot.slane %v1649_v3, 4 }
  0xef   : > { %v1261_v4 = vrot.slane %v1259_v59, 4  ;;  %v1264_v5 = vrot.slane %v1262_v60, 5  ;;  %v802_v13 = vld [vmem:[#allocation2 + $0x80] sm:$0x1]  ;;  %v799_v17 = vsel %vm7192_vm11, %v572_v57, %v798_v12  ;;  %v291_v28 = vld [vmem:[%s7146_s30 + $0x54] sm:$0xf] }
  0xf0   : > { %v1276_v9 = vrot.slane %v1275_v62, 4  ;;  %v1280_v11 = vrot.slane %v1278_v0, 5  ;;  %v803_v18 = vsel %vm7158_vm5, %v582_v63, %v802_v13  ;;  %800 = vst [vmem:[#allocation2 + $0x78] sm:$0xf] %v799_v17  ;;  %v1653_v25 = vsel %vm7332_vm14, %v1651_v15, %v1652_v7  ;;  %v343_v29 = vld [vmem:[#allocation2 + $0x84] sm:$0x1] }
  0xf1   : > { %v1265_v16 = vor.u32 %v1264_v5, %v1261_v4  ;;  %804 = vst [vmem:[#allocation2 + $0x80] sm:$0x1] %v803_v18  ;;  %v5693_v26 = vcombine.low %v1650_v14, %v1653_v25  ;;  %v344_v32 = vsel %vm7158_vm5, 0, %v343_v29  ;;  %v393_v33 = vld [vmem:[#allocation2 + $0x8c] sm:$0x1]  ;;  %v587_v35 = vshll.u32 %v290_v27, 16 }
  0xf2   : > { %v1281_v23 = vsel %vm7176_vm9, %v1276_v9, %v1280_v11  ;;  %v6765_v36 = vld [vmem:[#allocation7 + $0x1f0] sm:$0xff]   ;;  %345 = vst [vmem:[#allocation2 + $0x84] sm:$0x1] %v344_v32  ;;  %v394_v39 = vsel %vm7165_vm8, 0, %v393_v33  ;;  %v592_v40 = vshrl.u32 %v291_v28, 16  ;;  %v595_v41 = vshll.u32 %v291_v28, 16 }
  0xf3   : > { %v1266_v21 = vrot.slane %v1265_v16, 4  ;;  %4648 = vmatmul.mubr.bf16.gmra.mrb[40].mxu1 %v5693_v26  ;;  %395 = vst [vmem:[#allocation2 + $0x8c] sm:$0x1] %v394_v39  ;;  %v586_v43 = vrot.slane %v584_v34, 7  ;;  %6419 = vmatprep.subr.bf16.mxu1 %v6765_v36  ;;  %v6767_v44 = vld [vmem:[#allocation7 + $0x1b0] sm:$0xff]  }
  0xf4   : > { %4655 = vmatprep.mubr.bf16.mxu1 %v6752_v19  ;;  %v594_v48 = vrot.slane %v592_v40, 7  ;;  %6420 = vmatpush3.bf16.msra.mxu1 %v6767_v44  ;;  %v1527_v61 = vld [vmem:[#allocation2 + $0x54] sm:$0xe]  ;;  %v1528_v1 = vld [vmem:[#allocation2 + $0x58] sm:$0xf]  ;;  %v6754_v15 = vld [vmem:[#allocation2 + $0x6c] sm:$0xff]  }
  0xf5   : > { %v1271_v31 = vsel %vm7176_vm9, %v1266_v21, %v1270_v54  ;;  %v1022_v42 = vld [vmem:[#allocation2 + $0x7c] sm:$0xf]  ;;  %v589_v51 = vor.u32 %v587_v35, %v586_v43  ;;  %v590_v58 = vrot.slane %v586_v43, 4  ;;  %v5678_v6 = vrot.slane %v1527_v61, 9  ;;  %v7481_v19 = vld [vmem:[#allocation2 + $0xc] sm:$0xe]  ;;  %6421 = vmatprep.subr.bf16.mxu1 %v6770_v8 }
  0xf6   : > { %v5664_v37 = vcombine.low %v1271_v31, %v1281_v23  ;;  %v1292_v45 = vshll.u32 %v1022_v42, 16  ;;  %v1296_v46 = vshrl.u32 %v1022_v42, 16  ;;  %v597_v59 = vor.u32 %v595_v41, %v594_v48  ;;  %v1529_v2 = vld [vmem:[#allocation2 + $0x5c] sm:$0x1]  ;;  %v7485_v25 = vld [vmem:[#allocation2 + $0x10] sm:$0xf] }
  0xf7   : > { %v1021_v49 = vld [vmem:[#allocation2 + $0x78] sm:$0xf]  ;;  %v599_v60 = vrot.slane %v594_v48, 4  ;;  %v1656_v7 = vrot.slane %v1528_v1, 5  ;;  %v1659_v14 = vrot.slane %v1529_v2, 5  ;;  %v5735_v28 = vrot.slane %v7481_v19, 9 }
  0xf8   : > { %4510 = vmatprep.mubr.bf16.mxu0 %v5664_v37  ;;  %v1023_v50 = vld [vmem:[#allocation2 + $0x80] sm:$0x1]  ;;  %v1283_v52 = vshrl.u32 %v1021_v49, 16  ;;  %v1286_v53 = vshll.u32 %v1021_v49, 16  ;;  %v1294_v54 = vrot.slane %v1292_v45, 5  ;;  %v1298_v56 = vrot.slane %v1296_v46, 4 }
  0xf9   : > { %4511 = vmatmul.mubr.bf16.gmra.mrb[36].mxu0 %v6743_v24  ;;  %v1302_v57 = vshll.u32 %v1023_v50, 16  ;;  %v598_v4 = vsel %vm7182_vm10, %v590_v58, %v597_v59  ;;  %v805_v5 = vld [vmem:[#allocation2 + $0x84] sm:$0xf]  ;;  %v1657_v17 = vsel %vm7332_vm14, %v5678_v6, %v1656_v7  ;;  %v1658_v18 = vrot.slane %v1656_v7, 4  ;;  %v6747_v24 = vld [vmem:[#allocation2 + $0x78] sm:$0xff]   ;;  %v6772_v50 = vld [vmem:[#allocation7 + $0x1b8] sm:$0xff]  }
  0xfa   : > { %v1285_v63 = vrot.slane %v1283_v52, 4  ;;  %v1288_v62 = vrot.slane %v1286_v53, 5  ;;  %v1299_v0 = vor.u32 %v1298_v56, %v1294_v54  ;;  %v806_v12 = vsel %vm7192_vm11, %v589_v51, %v805_v5  ;;  %808 = vst [vmem:[#allocation2 + $0x88] sm:$0xf] %v598_v4  ;;  %v809_v13 = vld [vmem:[#allocation2 + $0x8c] sm:$0x1]  ;;  %6422 = vmatpush3.bf16.msra.mxu1 %v6772_v50 }
  0xfb   : > { %v1304_v3 = vrot.slane %v1302_v57, 5  ;;  %807 = vst [vmem:[#allocation2 + $0x84] sm:$0xf] %v806_v12  ;;  %v810_v16 = vsel %vm7158_vm5, %v599_v60, %v809_v13  ;;  %v7487_v26 = vld [vmem:[#allocation2 + $0x14] sm:$0x1]  ;;  %v1660_v27 = vsel %vm7332_vm14, %v1658_v18, %v1659_v14  ;;  %v2551_v29 = vrot.slane %v7485_v25, 5 }
  0xfc   : > { %v1289_v9 = vor.u32 %v1288_v62, %v1285_v63  ;;  %v1300_v11 = vrot.slane %v1299_v0, 4  ;;  %811 = vst [vmem:[#allocation2 + $0x8c] sm:$0x1] %v810_v16  ;;  %v1530_v31 = vld [vmem:[#allocation2 + $0x60] sm:$0xe]  ;;  %v5694_v34 = vcombine.low %v1657_v17, %v1660_v27  ;;  %v2554_v42 = vrot.slane %v7487_v26, 5 }
  0xfd   : > { %v1531_v32 = vld [vmem:[#allocation2 + $0x64] sm:$0xf]  ;;  %v1532_v35 = vld [vmem:[#allocation2 + $0x68] sm:$0x1]  ;;  %v5679_v36 = vrot.slane %v1530_v31, 9  ;;  %v2553_v41 = vrot.slane %v2551_v29, 4 }
  0xfe   : > { %v1290_v21 = vrot.slane %v1289_v9, 4  ;;  %v1305_v23 = vsel %vm7176_vm9, %v1300_v11, %v1304_v3  ;;  %v1663_v37 = vrot.slane %v1531_v32, 5  ;;  %v1941_v39 = vld [vmem:[#allocation2 + $0xc] sm:$0xf]  ;;  %v1666_v43 = vrot.slane %v1532_v35, 5  ;;  %4656 = vmatmul.mubr.bf16.gmra.mrb[44].mxu1 %v5694_v34  ;;  %v6758_v1 = vld [vmem:[#allocation2 + $0x78] sm:$0xff]  }
  0xff   : > { %v1942_v44 = vld [vmem:[#allocation2 + $0x10] sm:$0xf]  ;;  %v1990_v48 = vshrl.u32 %v1941_v39, 16  ;;  %v1993_v49 = vshll.u32 %v1941_v39, 16  ;;  %4663 = vmatprep.mubr.bf16.mxu1 %v6754_v15  ;;  %v1943_v52 = vld [vmem:[#allocation2 + $0x14] sm:$0x1]  ;;  %v2555_v25 = vsel %vm7332_vm14, %v2553_v41, %v2554_v42 }
 0x100   : > { %v1295_v33 = vsel %vm7176_vm9, %v1290_v21, %v1294_v54  ;;  %v1664_v45 = vsel %vm7332_vm14, %v5679_v36, %v1663_v37  ;;  %v1665_v46 = vrot.slane %v1663_v37, 4  ;;  %v1999_v53 = vshll.u32 %v1942_v44, 16  ;;  %v2456_v21 = vld [vmem:[#allocation2 + $0x18] sm:$0xe]  ;;  %v2457_v27 = vld [vmem:[#allocation2 + $0x1c] sm:$0xf] }
 0x101   : > { %v5665_v40 = vcombine.low %v1295_v33, %v1305_v23  ;;  %v1025_v51 = vld [vmem:[#allocation2 + $0x88] sm:$0xf]  ;;  %v2003_v54 = vshrl.u32 %v1942_v44, 16  ;;  %v1992_v0 = vrot.slane %v1990_v48, 4  ;;  %v1995_v5 = vrot.slane %v1993_v49, 5  ;;  %v6785_v10 = vld [vmem:[#allocation2 + $0x6c] sm:$0xff]  }
 0x102   : > { %v1024_v56 = vld [vmem:[#allocation2 + $0x84] sm:$0xf]  ;;  %v1316_v57 = vshll.u32 %v1025_v51, 16  ;;  %v1320_v58 = vshrl.u32 %v1025_v51, 16  ;;  %v1667_v59 = vsel %vm7332_vm14, %v1665_v46, %v1666_v43  ;;  %v2001_v8 = vrot.slane %v1999_v53, 5 }
 0x103   : > { %4518 = vmatprep.mubr.bf16.mxu0 %v5665_v40  ;;  %v1026_v60 = vld [vmem:[#allocation2 + $0x8c] sm:$0x1]  ;;  %v1307_v61 = vshrl.u32 %v1024_v56, 16  ;;  %v1310_v63 = vshll.u32 %v1024_v56, 16  ;;  %v5695_v62 = vcombine.low %v1664_v45, %v1667_v59  ;;  %v2005_v9 = vrot.slane %v2003_v54, 4  ;;  %v6753_v33 = vld [vmem:[#allocation2 + $0x84] sm:$0xff]  }
 0x104   : > { %4519 = vmatmul.mubr.bf16.gmra.mrb[40].mxu0 %v6747_v24  ;;  %v1318_v2 = vrot.slane %v1316_v57, 5  ;;  %v1322_v3 = vrot.slane %v1320_v58, 4  ;;  %v1326_v4 = vshll.u32 %v1026_v60, 16  ;;  %v1996_v13 = vor.u32 %v1995_v5, %v1992_v0  ;;  %v2458_v31 = vld [vmem:[#allocation2 + $0x20] sm:$0x1] }
 0x105   : > { %v1309_v6 = vrot.slane %v1307_v61, 4  ;;  %v1312_v7 = vrot.slane %v1310_v63, 5  ;;  %v2009_v14 = vshll.u32 %v1943_v52, 16  ;;  %v2006_v17 = vor.u32 %v2005_v9, %v2001_v8  ;;  %v1533_v36 = vld [vmem:[#allocation2 + $0x6c] sm:$0xe] }
 0x106   : > { %v1323_v11 = vor.u32 %v1322_v3, %v1318_v2  ;;  %v1328_v12 = vrot.slane %v1326_v4, 5  ;;  %4664 = vmatmul.mubr.bf16.gmra.mrb[48].mxu1 %v5695_v62  ;;  %v1997_v15 = vrot.slane %v1996_v13, 4  ;;  %v2552_v24 = vsel %vm7332_vm14, %v5735_v28, %v2551_v29  ;;  %v1534_v37 = vld [vmem:[#allocation2 + $0x70] sm:$0xf]  ;;  %v1535_v40 = vld [vmem:[#allocation2 + $0x74] sm:$0x1] }
 0x107   : > { %v1313_v16 = vor.u32 %v1312_v7, %v1309_v6  ;;  %v2011_v19 = vrot.slane %v2009_v14, 5  ;;  %v2007_v26 = vrot.slane %v2006_v17, 4  ;;  %4671 = vmatprep.mubr.bf16.mxu1 %v6758_v1  ;;  %v2558_v35 = vrot.slane %v2457_v27, 5  ;;  %v1944_v42 = vld [vmem:[#allocation2 + $0x18] sm:$0xf] }
 0x108   : > { %v1324_v18 = vrot.slane %v1323_v11, 4  ;;  %v2002_v34 = vsel %vm7176_vm9, %v1997_v15, %v2001_v8  ;;  %v5736_v39 = vrot.slane %v2456_v21, 9  ;;  %v5680_v41 = vrot.slane %v1533_v36, 9  ;;  %v1945_v48 = vld [vmem:[#allocation2 + $0x1c] sm:$0xf]  ;;  %v6759_v8 = vld [vmem:[#allocation2 + $0x84] sm:$0xff]  }
 0x109   : > { %v1314_v23 = vrot.slane %v1313_v16, 4  ;;  %v2012_v29 = vsel %vm7176_vm9, %v2007_v26, %v2011_v19  ;;  %v5751_v44 = vcombine.low %v2552_v24, %v2555_v25  ;;  %v2560_v45 = vrot.slane %v2558_v35, 4  ;;  %v1946_v49 = vld [vmem:[#allocation2 + $0x20] sm:$0x1]  ;;  %v2459_v62 = vld [vmem:[#allocation2 + $0x24] sm:$0xe] }
 0x10a   : > { %v1329_v32 = vsel %vm7176_vm9, %v1324_v18, %v1328_v12  ;;  %v2561_v46 = vrot.slane %v2458_v31, 5  ;;  %v1670_v50 = vrot.slane %v1534_v37, 5  ;;  %v1673_v51 = vrot.slane %v1535_v40, 5  ;;  %v2460_v0 = vld [vmem:[#allocation2 + $0x28] sm:$0xf]  ;;  %v6761_v26 = vld [vmem:[#allocation7 + $0x208] sm:$0xff]  }
 0x10b   : > { %v1319_v28 = vsel %vm7176_vm9, %v1314_v23, %v1318_v2  ;;  %v2014_v52 = vshrl.u32 %v1944_v42, 16  ;;  %v2017_v53 = vshll.u32 %v1944_v42, 16  ;;  %v5719_v54 = vcombine.low %v2002_v34, %v2012_v29  ;;  %v2461_v5 = vld [vmem:[#allocation2 + $0x2c] sm:$0x1]  ;;  %v1536_v12 = vld [vmem:[#allocation2 + $0x78] sm:$0xe] }
 0x10c   : > { %v5666_v43 = vcombine.low %v1319_v28, %v1329_v32  ;;  %v2023_v56 = vshll.u32 %v1945_v48, 16  ;;  %v2027_v57 = vshrl.u32 %v1945_v48, 16  ;;  %v2033_v58 = vshll.u32 %v1946_v49, 16  ;;  %v1537_v17 = vld [vmem:[#allocation2 + $0x7c] sm:$0xf]  ;;  %v6763_v48 = vld [vmem:[#allocation2 + $0x90] sm:$0xff]  }
 0x10d   : > { %v2559_v59 = vsel %vm7332_vm14, %v5736_v39, %v2558_v35  ;;  %v1671_v60 = vsel %vm7332_vm14, %v5680_v41, %v1670_v50  ;;  %v1672_v61 = vrot.slane %v1670_v50, 4  ;;  %v2016_v63 = vrot.slane %v2014_v52, 4  ;;  %v1538_v18 = vld [vmem:[#allocation2 + $0x80] sm:$0x1]  ;;  %v1947_v25 = vld [vmem:[#allocation2 + $0x24] sm:$0xf] }
 0x10e   : > { %4526 = vmatprep.mubr.bf16.mxu0 %v5666_v43  ;;  %v2562_v1 = vsel %vm7332_vm14, %v2560_v45, %v2561_v46  ;;  %v2019_v2 = vrot.slane %v2017_v53, 5  ;;  %v2025_v3 = vrot.slane %v2023_v56, 5  ;;  %v2029_v4 = vrot.slane %v2027_v57, 4  ;;  %v1949_v34 = vld [vmem:[#allocation2 + $0x2c] sm:$0x1] }
 0x10f   : > { %4527 = vmatmul.mubr.bf16.gmra.mrb[44].mxu0 %v6753_v33  ;;  %v1674_v6 = vsel %vm7332_vm14, %v1672_v61, %v1673_v51  ;;  %v2035_v7 = vrot.slane %v2033_v58, 5  ;;  %v5737_v9 = vrot.slane %v2459_v62, 9  ;;  %v2565_v11 = vrot.slane %v2460_v0, 5  ;;  %v1948_v33 = vld [vmem:[#allocation2 + $0x28] sm:$0xf] }
 0x110   : > { %4760 = vmatprep.mubr.bf16.mxu0 %v5751_v44  ;;  %v5696_v13 = vcombine.low %v1671_v60, %v1674_v6  ;;  %v2020_v14 = vor.u32 %v2019_v2, %v2016_v63  ;;  %v2030_v16 = vor.u32 %v2029_v4, %v2025_v3  ;;  %v5681_v15 = vrot.slane %v1536_v12, 9  ;;  %v2462_v52 = vld [vmem:[#allocation2 + $0x30] sm:$0xe]  ;;  %v6766_v53 = vld [vmem:[#allocation7 + $0x210] sm:$0xff]   ;;  %v2464_v58 = vld [vmem:[#allocation2 + $0x38] sm:$0x1] }
 0x111   : > { %v2567_v19 = vrot.slane %v2565_v11, 4  ;;  %v2568_v21 = vrot.slane %v2461_v5, 5  ;;  %v1677_v23 = vrot.slane %v1537_v17, 5  ;;  %v1680_v24 = vrot.slane %v1538_v18, 5  ;;  %v1539_v62 = vld [vmem:[#allocation2 + $0x84] sm:$0xe] }
 0x112   : > { %v5752_v27 = vcombine.low %v2559_v59, %v2562_v1  ;;  %4672 = vmatmul.mubr.bf16.gmra.mrb[52].mxu1 %v5696_v13  ;;  %v2021_v31 = vrot.slane %v2020_v14, 4  ;;  %v2031_v32 = vrot.slane %v2030_v16, 4  ;;  %v2038_v37 = vshrl.u32 %v1947_v25, 16  ;;  %v1541_v4 = vld [vmem:[#allocation2 + $0x8c] sm:$0x1]  ;;  %v6771_v12 = vld [vmem:[#allocation7 + $0x218] sm:$0xff]  }
 0x113   : > { %4679 = vmatprep.mubr.bf16.mxu1 %v6759_v8  ;;  %v1678_v35 = vsel %vm7332_vm14, %v5681_v15, %v1677_v23  ;;  %v1679_v36 = vrot.slane %v1677_v23, 4  ;;  %v2041_v29 = vshll.u32 %v1947_v25, 16  ;;  %v2047_v42 = vshll.u32 %v1948_v33, 16  ;;  %v1951_v16 = vld [vmem:[#allocation2 + $0x34] sm:$0xf]  ;;  %v6775_v25 = vld [vmem:[#allocation7 + $0x220] sm:$0xff]  }
 0x114   : > { %v2026_v28 = vsel %vm7176_vm9, %v2021_v31, %v2025_v3  ;;  %v2036_v39 = vsel %vm7176_vm9, %v2031_v32, %v2035_v7  ;;  %v2040_v41 = vrot.slane %v2038_v37, 4  ;;  %v2051_v45 = vshrl.u32 %v1948_v33, 16  ;;  %v1540_v3 = vld [vmem:[#allocation2 + $0x88] sm:$0xf]  ;;  %v1952_v17 = vld [vmem:[#allocation2 + $0x38] sm:$0x1] }
 0x115   : > { %v1681_v40 = vsel %vm7332_vm14, %v1679_v36, %v1680_v24  ;;  %v2043_v44 = vrot.slane %v2041_v29, 5  ;;  %v2057_v46 = vshll.u32 %v1949_v34, 16  ;;  %v2566_v49 = vsel %vm7332_vm14, %v5737_v9, %v2565_v11  ;;  %v1950_v11 = vld [vmem:[#allocation2 + $0x30] sm:$0xf]  ;;  %v6764_v24 = vld [vmem:[#allocation2 + $0x9c] sm:$0xff]  }
 0x116   : > { %v5697_v43 = vcombine.low %v1678_v35, %v1681_v40  ;;  %v2569_v50 = vsel %vm7332_vm14, %v2567_v19, %v2568_v21  ;;  %v2049_v51 = vrot.slane %v2047_v42, 5  ;;  %v2053_v57 = vrot.slane %v2051_v45, 4  ;;  %v2465_v33 = vld [vmem:[#allocation2 + $0x3c] sm:$0xe]  ;;  %v2466_v34 = vld [vmem:[#allocation2 + $0x40] sm:$0xf] }
 0x117   : > { %4761 = vmatmul.mubr.bf16.vlgmr.msra.gmra.mrb[48].mxu0 %v5719_v54  ;;  %v5720_v54 = vcombine.low %v2026_v28, %v2036_v39  ;;  %v2044_v56 = vor.u32 %v2043_v44, %v2040_v41  ;;  %v2059_v59 = vrot.slane %v2057_v46, 5  ;;  %v5738_v60 = vrot.slane %v2462_v52, 9  ;;  %v2467_v29 = vld [vmem:[#allocation2 + $0x44] sm:$0x1]  ;;  %v1542_v39 = vld [vmem:[#allocation2 + $0x90] sm:$0xe] }
 0x118   : > { %6544 = vmatpush3.bf16.msra.mxu0 %v7440_v20  ;;  %4768 = vmatprep.mubr.bf16.mxu0 %v5752_v27  ;;  %v2463_v20 = vld [vmem:[#allocation2 + $0x34] sm:$0xf]  ;;  %v2575_v63 = vrot.slane %v2464_v58, 5  ;;  %v5753_v0 = vcombine.low %v2566_v49, %v2569_v50  ;;  %v2054_v2 = vor.u32 %v2053_v57, %v2049_v51  ;;  %v5682_v5 = vrot.slane %v1539_v62, 9  ;;  %v1544_v50 = vld [vmem:[#allocation2 + $0x98] sm:$0x1] }
 0x119   : > { %6545 = vmatprep.subr.bf16.mxu0 %v6761_v26  ;;  %v2572_v61 = vrot.slane %v2463_v20, 5  ;;  %v2045_v1 = vrot.slane %v2044_v56, 4  ;;  %v1684_v8 = vrot.slane %v1540_v3, 5  ;;  %v1687_v9 = vrot.slane %v1541_v4, 5  ;;  %v1543_v44 = vld [vmem:[#allocation2 + $0x94] sm:$0xf] }
 0x11a   : > { %4680 = vmatmul.mubr.bf16.gmra.mrb[56].mxu1 %v5697_v43  ;;  %v2055_v14 = vrot.slane %v2054_v2, 4  ;;  %v2062_v18 = vshrl.u32 %v1950_v11, 16  ;;  %v2065_v23 = vshll.u32 %v1950_v11, 16  ;;  %v2071_v32 = vshll.u32 %v1951_v16, 16  ;;  %v1953_v57 = vld [vmem:[#allocation2 + $0x3c] sm:$0xf] }
 0x11b   : > { %4687 = vmatprep.mubr.bf16.mxu1 %v6763_v48  ;;  %v7535_v6 = vsel %vm7332_vm14, %v5738_v60, %v2572_v61  ;;  %v2574_v7 = vrot.slane %v2572_v61, 4  ;;  %v2050_v13 = vsel %vm7176_vm9, %v2045_v1, %v2049_v51  ;;  %v1685_v19 = vsel %vm7332_vm14, %v5682_v5, %v1684_v8  ;;  %v6778_v51 = vld [vmem:[#allocation7 + $0x228] sm:$0xff]  }
 0x11c   : > { %6546 = vmatpush3.bf16.msra.mxu0 %v6761_v26  ;;  %v1686_v21 = vrot.slane %v1684_v8, 4  ;;  %v2060_v26 = vsel %vm7176_vm9, %v2055_v14, %v2059_v59  ;;  %v2064_v31 = vrot.slane %v2062_v18, 4  ;;  %v2067_v37 = vrot.slane %v2065_v23, 5  ;;  %v1954_v60 = vld [vmem:[#allocation2 + $0x40] sm:$0xf] }
 0x11d   : > { %6547 = vmatprep.subr.bf16.mxu0 %v6766_v53  ;;  %v2576_v15 = vsel %vm7332_vm14, %v2574_v7, %v2575_v63  ;;  %v5721_v35 = vcombine.low %v2050_v13, %v2060_v26  ;;  %v2075_v28 = vshrl.u32 %v1951_v16, 16  ;;  %v2073_v41 = vrot.slane %v2071_v32, 5  ;;  %v1955_v61 = vld [vmem:[#allocation2 + $0x44] sm:$0x1]  ;;  %v6781_v7 = vld [vmem:[#allocation7 + $0x230] sm:$0xff]  }
 0x11e   : > { %v5754_v27 = vcombine.low %v7535_v6, %v2576_v15  ;;  %v1688_v36 = vsel %vm7332_vm14, %v1686_v21, %v1687_v9  ;;  %v2081_v42 = vshll.u32 %v1952_v17, 16  ;;  %v5739_v43 = vrot.slane %v2465_v33, 9  ;;  %v6768_v6 = vld [vmem:[#allocation2 + $0xa8] sm:$0xff]   ;;  %v2470_v26 = vld [vmem:[#allocation2 + $0x50] sm:$0x1] }
 0x11f   : > { %4769 = vmatmul.mubr.bf16.gmra.mrb[52].mxu0 %v5720_v54  ;;  %v5698_v40 = vcombine.low %v1685_v19, %v1688_v36  ;;  %v2068_v45 = vor.u32 %v2067_v37, %v2064_v31  ;;  %v2077_v46 = vrot.slane %v2075_v28, 4  ;;  %v2579_v48 = vrot.slane %v2466_v34, 5  ;;  %v2468_v19 = vld [vmem:[#allocation2 + $0x48] sm:$0xe]  ;;  %v1545_v34 = vld [vmem:[#allocation2 + $0x9c] sm:$0xe] }
 0x120   : > { %4776 = vmatprep.mubr.bf16.mxu0 %v5753_v0  ;;  %6548 = vmatpush3.bf16.msra.mxu0 %v6766_v53  ;;  %v2582_v49 = vrot.slane %v2467_v29, 5  ;;  %v2083_v52 = vrot.slane %v2081_v42, 5  ;;  %v5683_v53 = vrot.slane %v1542_v39, 9  ;;  %v1691_v54 = vrot.slane %v1543_v44, 5  ;;  %v1546_v28 = vld [vmem:[#allocation2 + $0xa0] sm:$0xf] }
 0x121   : > { %6549 = vmatprep.subr.bf16.mxu0 %v6771_v12  ;;  %v1694_v56 = vrot.slane %v1544_v50, 5  ;;  %v2069_v20 = vrot.slane %v2068_v45, 4  ;;  %v2078_v58 = vor.u32 %v2077_v46, %v2073_v41  ;;  %v2581_v59 = vrot.slane %v2579_v48, 4  ;;  %v1547_v29 = vld [vmem:[#allocation2 + $0xa4] sm:$0x1] }
 0x122   : > { %4688 = vmatmul.mubr.bf16.gmra.mrb[60].mxu1 %v5698_v40  ;;  %v1692_v63 = vsel %vm7332_vm14, %v5683_v53, %v1691_v54  ;;  %v1693_v62 = vrot.slane %v1691_v54, 4  ;;  %v2086_v0 = vshrl.u32 %v1953_v57, 16  ;;  %v2089_v1 = vshll.u32 %v1953_v57, 16  ;;  %v1956_v44 = vld [vmem:[#allocation2 + $0x48] sm:$0xf]  ;;  %v6769_v57 = vld [vmem:[#allocation2 + $0xb4] sm:$0xff]  }
 0x123   : > { %4695 = vmatprep.mubr.bf16.mxu1 %v6764_v24  ;;  %v2074_v2 = vsel %vm7176_vm9, %v2069_v20, %v2073_v41  ;;  %v2079_v3 = vrot.slane %v2078_v58, 4  ;;  %v2580_v4 = vsel %vm7332_vm14, %v5739_v43, %v2579_v48  ;;  %v2095_v5 = vshll.u32 %v1954_v60, 16  ;;  %v2469_v24 = vld [vmem:[#allocation2 + $0x4c] sm:$0xf] }
 0x124   : > { %6550 = vmatpush3.bf16.msra.mxu0 %v6771_v12  ;;  %v2583_v8 = vsel %vm7332_vm14, %v2581_v59, %v2582_v49  ;;  %v1695_v9 = vsel %vm7332_vm14, %v1693_v62, %v1694_v56  ;;  %v2088_v11 = vrot.slane %v2086_v0, 4  ;;  %v2091_v12 = vrot.slane %v2089_v1, 5  ;;  %v1957_v45 = vld [vmem:[#allocation2 + $0x4c] sm:$0xf]  ;;  %v1958_v49 = vld [vmem:[#allocation2 + $0x50] sm:$0x1] }
 0x125   : > { %6551 = vmatprep.subr.bf16.mxu0 %v6775_v25  ;;  %v2084_v13 = vsel %vm7176_vm9, %v2079_v3, %v2083_v52  ;;  %v5699_v14 = vcombine.low %v1692_v63, %v1695_v9  ;;  %v2097_v16 = vrot.slane %v2095_v5, 5  ;;  %v2099_v17 = vshrl.u32 %v1954_v60, 16  ;;  %v2472_v63 = vld [vmem:[#allocation2 + $0x58] sm:$0xf]  ;;  %v2473_v3 = vld [vmem:[#allocation2 + $0x5c] sm:$0x1] }
 0x126   : > { %v2092_v18 = vor.u32 %v2091_v12, %v2088_v11  ;;  %v2105_v15 = vshll.u32 %v1955_v61, 16  ;;  %v5722_v21 = vcombine.low %v2074_v2, %v2084_v13  ;;  %v5755_v31 = vcombine.low %v2580_v4, %v2583_v8  ;;  %v2471_v61 = vld [vmem:[#allocation2 + $0x54] sm:$0xe]  ;;  %v1548_v4 = vld [vmem:[#allocation2 + $0xa8] sm:$0xe] }
 0x127   : > { %4777 = vmatmul.mubr.bf16.gmra.mrb[56].mxu0 %v5721_v35  ;;  %v2101_v23 = vrot.slane %v2099_v17, 4  ;;  %v2586_v33 = vrot.slane %v2469_v24, 5  ;;  %v6784_v35 = vld [vmem:[#allocation7 + $0x238] sm:$0xff]   ;;  %v5684_v39 = vrot.slane %v1545_v34, 9  ;;  %v1698_v43 = vrot.slane %v1546_v28, 5 }
 0x128   : > { %4784 = vmatprep.mubr.bf16.mxu0 %v5754_v27  ;;  %6552 = vmatpush3.bf16.msra.mxu0 %v6775_v25  ;;  %v5740_v27 = vrot.slane %v2468_v19, 9  ;;  %v2093_v32 = vrot.slane %v2092_v18, 4  ;;  %v2589_v25 = vrot.slane %v2470_v26, 5  ;;  %v2107_v37 = vrot.slane %v2105_v15, 5  ;;  %v1549_v9 = vld [vmem:[#allocation2 + $0xac] sm:$0xf] }
 0x129   : > { %6553 = vmatprep.subr.bf16.mxu0 %v6778_v51  ;;  %v2102_v36 = vor.u32 %v2101_v23, %v2097_v16  ;;  %v2588_v42 = vrot.slane %v2586_v33, 4  ;;  %v1701_v48 = vrot.slane %v1547_v29, 5  ;;  %v2110_v50 = vshrl.u32 %v1956_v44, 16  ;;  %v1550_v11 = vld [vmem:[#allocation2 + $0xb0] sm:$0x1] }
 0x12a   : > { %4696 = vmatmul.mubr.bf16.gmra.mrb[64].mxu1 %v5699_v14  ;;  %v2098_v40 = vsel %vm7176_vm9, %v2093_v32, %v2097_v16  ;;  %v2587_v41 = vsel %vm7332_vm14, %v5740_v27, %v2586_v33  ;;  %v1699_v53 = vsel %vm7332_vm14, %v5684_v39, %v1698_v43  ;;  %v1700_v54 = vrot.slane %v1698_v43, 4  ;;  %v1959_v17 = vld [vmem:[#allocation2 + $0x54] sm:$0xf]  ;;  %v1960_v23 = vld [vmem:[#allocation2 + $0x58] sm:$0xf] }
 0x12b   : > { %4703 = vmatprep.mubr.bf16.mxu1 %v6768_v6  ;;  %v2103_v46 = vrot.slane %v2102_v36, 4  ;;  %v2590_v52 = vsel %vm7332_vm14, %v2588_v42, %v2589_v25  ;;  %v2119_v56 = vshll.u32 %v1957_v45, 16  ;;  %v2112_v59 = vrot.slane %v2110_v50, 4  ;;  %v301_v50 = vld [vmem:[%s7146_s30 + $0x7c] sm:$0xf] }
 0x12c   : > { %6554 = vmatpush3.bf16.msra.mxu0 %v6778_v51  ;;  %v2113_v51 = vshll.u32 %v1956_v44, 16  ;;  %v5756_v58 = vcombine.low %v2587_v41, %v2590_v52  ;;  %v1702_v0 = vsel %vm7332_vm14, %v1700_v54, %v1701_v48  ;;  %v2123_v2 = vshrl.u32 %v1957_v45, 16  ;;  %v358_v54 = vld [vmem:[#allocation2 + $0xc0] sm:$0x1] }
 0x12d   : > { %6555 = vmatprep.subr.bf16.mxu0 %v6781_v7  ;;  %v2108_v20 = vsel %vm7176_vm9, %v2103_v46, %v2107_v37  ;;  %v2121_v1 = vrot.slane %v2119_v56, 5  ;;  %v5700_v5 = vcombine.low %v1699_v53, %v1702_v0  ;;  %v5741_v8 = vrot.slane %v2471_v61, 9  ;;  %v2475_v61 = vld [vmem:[#allocation2 + $0x64] sm:$0xf] }
 0x12e   : > { %v2115_v60 = vrot.slane %v2113_v51, 5  ;;  %v5723_v62 = vcombine.low %v2098_v40, %v2108_v20  ;;  %v2125_v12 = vrot.slane %v2123_v2, 4  ;;  %v2593_v13 = vrot.slane %v2472_v63, 5  ;;  %v2476_v2 = vld [vmem:[#allocation2 + $0x68] sm:$0x1] }
 0x12f   : > { %4785 = vmatmul.mubr.bf16.gmra.mrb[60].mxu0 %v5722_v21  ;;  %v2596_v14 = vrot.slane %v2473_v3, 5  ;;  %v5685_v16 = vrot.slane %v1548_v4, 9  ;;  %v1705_v19 = vrot.slane %v1549_v9, 5  ;;  %v1708_v21 = vrot.slane %v1550_v11, 5 }
 0x130   : > { %4792 = vmatprep.mubr.bf16.mxu0 %v5755_v31  ;;  %6556 = vmatpush3.bf16.msra.mxu0 %v6781_v7  ;;  %v2116_v6 = vor.u32 %v2115_v60, %v2112_v59  ;;  %v2129_v7 = vshll.u32 %v1958_v49, 16  ;;  %v2126_v24 = vor.u32 %v2125_v12, %v2121_v1  ;;  %v2594_v26 = vsel %vm7332_vm14, %v5741_v8, %v2593_v13  ;;  %v1961_v31 = vld [vmem:[#allocation2 + $0x5c] sm:$0x1]  ;;  %v300_v49 = vld [vmem:[%s7146_s30 + $0x78] sm:$0xf] }
 0x131   : > { %6557 = vmatprep.subr.bf16.mxu0 %v6784_v35  ;;  %v2595_v27 = vrot.slane %v2593_v13, 4  ;;  %v2134_v32 = vshrl.u32 %v1959_v17, 16  ;;  %v1706_v25 = vsel %vm7332_vm14, %v5685_v16, %v1705_v19  ;;  %v1707_v34 = vrot.slane %v1705_v19, 4  ;;  %v1551_v8 = vld [vmem:[#allocation2 + $0xb4] sm:$0xe] }
 0x132   : > { %4704 = vmatmul.mubr.bf16.gmra.mrb[68].mxu1 %v5700_v5  ;;  %v2117_v18 = vrot.slane %v2116_v6, 4  ;;  %v2131_v15 = vrot.slane %v2129_v7, 5  ;;  %v2127_v36 = vrot.slane %v2126_v24, 4  ;;  %v2143_v29 = vshll.u32 %v1960_v23, 16  ;;  %v1553_v16 = vld [vmem:[#allocation2 + $0xbc] sm:$0x1] }
 0x133   : > { %4711 = vmatprep.mubr.bf16.mxu1 %v6769_v57  ;;  %v2597_v37 = vsel %vm7332_vm14, %v2595_v27, %v2596_v14  ;;  %v2136_v28 = vrot.slane %v2134_v32, 4  ;;  %v1709_v41 = vsel %vm7332_vm14, %v1707_v34, %v1708_v21  ;;  %v2147_v43 = vshrl.u32 %v1960_v23, 16  ;;  %v2474_v57 = vld [vmem:[#allocation2 + $0x60] sm:$0xe]  ;;  %v1552_v14 = vld [vmem:[#allocation2 + $0xb8] sm:$0xf] }
 0x134   : > { %6558 = vmatpush3.bf16.msra.mxu0 %v6784_v35  ;;  %v2122_v33 = vsel %vm7176_vm9, %v2117_v18, %v2121_v1  ;;  %v2137_v35 = vshll.u32 %v1959_v17, 16  ;;  %v5757_v40 = vcombine.low %v2594_v26, %v2597_v37  ;;  %v2132_v44 = vsel %vm7176_vm9, %v2127_v36, %v2131_v15  ;;  %v1962_v21 = vld [vmem:[#allocation2 + $0x60] sm:$0xf]  ;;  %v1963_v23 = vld [vmem:[#allocation2 + $0x64] sm:$0xf] }
 0x135   : > { %v5701_v45 = vcombine.low %v1706_v25, %v1709_v41  ;;  %v2145_v46 = vrot.slane %v2143_v29, 5  ;;  %v2153_v48 = vshll.u32 %v1961_v31, 16  ;;  %v5724_v51 = vcombine.low %v2122_v33, %v2132_v44  ;;  %v1964_v32 = vld [vmem:[#allocation2 + $0x68] sm:$0x1]  ;;  %v2477_v37 = vld [vmem:[#allocation2 + $0x6c] sm:$0xe] }
 0x136   : > { %v2139_v42 = vrot.slane %v2137_v35, 5  ;;  %v2149_v53 = vrot.slane %v2147_v43, 4  ;;  %v669_v56 = vshrl.u32 %v300_v49, 16  ;;  %v672_v59 = vshll.u32 %v300_v49, 16  ;;  %v2479_v44 = vld [vmem:[#allocation2 + $0x74] sm:$0x1] }
 0x137   : > { %4793 = vmatmul.mubr.bf16.gmra.mrb[64].mxu0 %v5723_v62  ;;  %v2155_v20 = vrot.slane %v2153_v48, 5  ;;  %v677_v60 = vshrl.u32 %v301_v50, 16  ;;  %v680_v1 = vshll.u32 %v301_v50, 16  ;;  %v5742_v5 = vrot.slane %v2474_v57, 9 }
 0x138   : > { %4800 = vmatprep.mubr.bf16.mxu0 %v5756_v58  ;;  %v2140_v52 = vor.u32 %v2139_v42, %v2136_v28  ;;  %v359_v58 = vsel %vm7158_vm5, 0, %v358_v54  ;;  %v2150_v62 = vor.u32 %v2149_v53, %v2145_v46  ;;  %v671_v0 = vrot.slane %v669_v56, 7  ;;  %v2478_v28 = vld [vmem:[#allocation2 + $0x70] sm:$0xf]  ;;  %v2887_v56 = vld [vmem:[#allocation2 + $0x1c] sm:$0xf] }
 0x139   : > { %360 = vst [vmem:[#allocation2 + $0xc0] sm:$0x1] %v359_v58  ;;  %v7592_v4 = vrot.slane %v677_v60, 7  ;;  %v2600_v6 = vrot.slane %v2475_v61, 5  ;;  %v2603_v7 = vrot.slane %v2476_v2, 5  ;;  %v5686_v26 = vrot.slane %v1551_v8, 9 }
 0x13a   : > { %4712 = vmatmul.mubr.bf16.gmra.mrb[72].mxu1 %v5701_v45  ;;  %v2141_v63 = vrot.slane %v2140_v52, 4  ;;  %v2151_v11 = vrot.slane %v2150_v62, 4  ;;  %v674_v12 = vor.u32 %v672_v59, %v671_v0  ;;  %v675_v13 = vrot.slane %v671_v0, 4  ;;  %v2886_v45 = vld [vmem:[#allocation2 + $0x18] sm:$0xf] }
 0x13b   : > { %v682_v17 = vor.u32 %v680_v1, %v7592_v4  ;;  %v684_v18 = vrot.slane %v7592_v4, 4  ;;  %v2601_v15 = vsel %vm7332_vm14, %v5742_v5, %v2600_v6  ;;  %v2602_v19 = vrot.slane %v2600_v6, 4  ;;  %v2888_v62 = vld [vmem:[#allocation2 + $0x20] sm:$0x1] }
 0x13c   : > { %v2146_v9 = vsel %vm7176_vm9, %v2141_v63, %v2145_v46  ;;  %v2156_v24 = vsel %vm7176_vm9, %v2151_v11, %v2155_v20  ;;  %v1712_v27 = vrot.slane %v1552_v14, 5  ;;  %v1715_v31 = vrot.slane %v1553_v16, 5  ;;  %v1966_v14 = vld [vmem:[#allocation2 + $0x70] sm:$0xf] }
 0x13d   : > { %v5725_v25 = vcombine.low %v2146_v9, %v2156_v24  ;;  %v683_v34 = vsel %vm7182_vm10, %v675_v13, %v682_v17  ;;  %v2604_v35 = vsel %vm7332_vm14, %v2602_v19, %v2603_v7  ;;  %v2158_v36 = vshrl.u32 %v1962_v21, 16  ;;  %v1965_v7 = vld [vmem:[#allocation2 + $0x6c] sm:$0xf] }
 0x13e   : > { %843 = vst [vmem:[#allocation2 + $0xc4] sm:$0xf] %v683_v34  ;;  %v7612_v41 = vsel %vm7332_vm14, %v5686_v26, %v1712_v27  ;;  %v1714_v42 = vrot.slane %v1712_v27, 4  ;;  %v2161_v43 = vshll.u32 %v1962_v21, 16  ;;  %v2167_v48 = vshll.u32 %v1963_v23, 16 }
 0x13f   : > { %4801 = vmatmul.mubr.bf16.gmra.mrb[68].mxu0 %v5724_v51  ;;  %v2160_v46 = vrot.slane %v2158_v36, 4  ;;  %v2171_v49 = vshrl.u32 %v1963_v23, 16  ;;  %v2177_v50 = vshll.u32 %v1964_v32, 16  ;;  %v5743_v54 = vrot.slane %v2477_v37, 9  ;;  %v1967_v23 = vld [vmem:[#allocation2 + $0x74] sm:$0x1] }
 0x140   : > { %4808 = vmatprep.mubr.bf16.mxu0 %v5757_v40  ;;  %v5758_v40 = vcombine.low %v2601_v15, %v2604_v35  ;;  %v840_v47 = vld [vmem:[#allocation2 + $0xc0] sm:$0xf]  ;;  %v1716_v52 = vsel %vm7332_vm14, %v1714_v42, %v1715_v31  ;;  %v2163_v53 = vrot.slane %v2161_v43, 5  ;;  %v2169_v20 = vrot.slane %v2167_v48, 5  ;;  %v2480_v36 = vld [vmem:[#allocation2 + $0x78] sm:$0xe] }
 0x141   : > { %v841_v51 = vsel %vm7192_vm11, %v674_v12, %v840_v47  ;;  %v5702_v57 = vcombine.low %v7612_v41, %v1716_v52  ;;  %v2173_v58 = vrot.slane %v2171_v49, 4  ;;  %v2179_v59 = vrot.slane %v2177_v50, 5  ;;  %v2481_v37 = vld [vmem:[#allocation2 + $0x7c] sm:$0xf]  ;;  %v2482_v48 = vld [vmem:[#allocation2 + $0x80] sm:$0x1] }
 0x142   : > { %842 = vst [vmem:[#allocation2 + $0xc0] sm:$0xf] %v841_v51  ;;  %v2164_v60 = vor.u32 %v2163_v53, %v2160_v46  ;;  %v2607_v61 = vrot.slane %v2478_v28, 5  ;;  %v2610_v63 = vrot.slane %v2479_v44, 5  ;;  %v2935_v0 = vshrl.u32 %v2886_v45, 16 }
 0x143   : > { %v2174_v1 = vor.u32 %v2173_v58, %v2169_v20  ;;  %v2938_v2 = vshll.u32 %v2886_v45, 16  ;;  %v2944_v5 = vshll.u32 %v2887_v56, 16  ;;  %v2948_v6 = vshrl.u32 %v2887_v56, 16  ;;  %v2889_v53 = vld [vmem:[#allocation2 + $0x24] sm:$0xf] }
 0x144   : > { %v2165_v9 = vrot.slane %v2164_v60, 4  ;;  %v2608_v11 = vsel %vm7332_vm14, %v5743_v54, %v2607_v61  ;;  %v2609_v12 = vrot.slane %v2607_v61, 4  ;;  %v2937_v13 = vrot.slane %v2935_v0, 4  ;;  %v2891_v0 = vld [vmem:[#allocation2 + $0x2c] sm:$0x1] }
 0x145   : > { %v2175_v17 = vrot.slane %v2174_v1, 4  ;;  %v2940_v15 = vrot.slane %v2938_v2, 5  ;;  %v2946_v19 = vrot.slane %v2944_v5, 5  ;;  %v2950_v21 = vrot.slane %v2948_v6, 4  ;;  %v1968_v1 = vld [vmem:[#allocation2 + $0x78] sm:$0xf] }
 0x146   : > { %v2170_v24 = vsel %vm7176_vm9, %v2165_v9, %v2169_v20  ;;  %v2611_v26 = vsel %vm7332_vm14, %v2609_v12, %v2610_v63  ;;  %v2954_v27 = vshll.u32 %v2888_v62, 16  ;;  %v2182_v31 = vshrl.u32 %v1965_v7, 16  ;;  %v6774_v5 = vld [vmem:[#allocation2 + $0x18] sm:$0xff]  }
 0x147   : > { %4809 = vmatmul.mubr.bf16.gmra.mrb[72].mxu0 %v5725_v25  ;;  %v2180_v32 = vsel %vm7176_vm9, %v2175_v17, %v2179_v59  ;;  %v5759_v25 = vcombine.low %v2608_v11, %v2611_v26  ;;  %v2941_v34 = vor.u32 %v2940_v15, %v2937_v13  ;;  %v2951_v35 = vor.u32 %v2950_v21, %v2946_v19  ;;  %v2890_v59 = vld [vmem:[#allocation2 + $0x28] sm:$0xf]  ;;  %v1969_v11 = vld [vmem:[#allocation2 + $0x7c] sm:$0xf] }
 0x148   : > { %4816 = vmatprep.mubr.bf16.mxu0 %v5758_v40  ;;  %v5726_v40 = vcombine.low %v2170_v24, %v2180_v32  ;;  %v2956_v41 = vrot.slane %v2954_v27, 5  ;;  %v2184_v42 = vrot.slane %v2182_v31, 4  ;;  %v2185_v43 = vshll.u32 %v1965_v7, 16 }
 0x149   : > { %v6773_v28 = vld [vmem:[#allocation2 + $0xc0] sm:$0xff]   ;;  %v2942_v44 = vrot.slane %v2941_v34, 4  ;;  %v2952_v45 = vrot.slane %v2951_v35, 4  ;;  %v2191_v47 = vshll.u32 %v1966_v14, 16  ;;  %v2195_v46 = vshrl.u32 %v1966_v14, 16 }
 0x14a   : > { %4719 = vmatprep.mubr.bf16.mxu1 %v6773_v28  ;;  %v2187_v49 = vrot.slane %v2185_v43, 5  ;;  %v2201_v50 = vshll.u32 %v1967_v23, 16  ;;  %v5744_v51 = vrot.slane %v2480_v36, 9  ;;  %v2614_v52 = vrot.slane %v2481_v37, 5  ;;  %v1970_v34 = vld [vmem:[#allocation2 + $0x80] sm:$0x1] }
 0x14b   : > { %4720 = vmatmul.mubr.bf16.gmra.mrb[76].mxu1 %v5702_v57  ;;  %v2947_v54 = vsel %vm7176_vm9, %v2942_v44, %v2946_v19  ;;  %v2957_v56 = vsel %vm7176_vm9, %v2952_v45, %v2956_v41  ;;  %v2193_v20 = vrot.slane %v2191_v47, 5  ;;  %v2197_v58 = vrot.slane %v2195_v46, 4  ;;  %v2484_v47 = vld [vmem:[#allocation2 + $0x88] sm:$0xf]  ;;  %v2485_v46 = vld [vmem:[#allocation2 + $0x8c] sm:$0x1] }
 0x14c   : > { %v5783_v60 = vcombine.low %v2947_v54, %v2957_v56  ;;  %v2188_v61 = vor.u32 %v2187_v49, %v2184_v42  ;;  %v2203_v63 = vrot.slane %v2201_v50, 5  ;;  %v2615_v62 = vsel %vm7332_vm14, %v5744_v51, %v2614_v52 }
 0x14d   : > { %v2198_v57 = vor.u32 %v2197_v58, %v2193_v20  ;;  %v2616_v6 = vrot.slane %v2614_v52, 4  ;;  %v2617_v7 = vrot.slane %v2482_v48, 5  ;;  %v2959_v9 = vshrl.u32 %v2889_v53, 16  ;;  %v2892_v52 = vld [vmem:[#allocation2 + $0x30] sm:$0xf] }
 0x14e   : > { %v7580_v39 = vpop.f32.mrb[0].mxu0  ;;  %4921 = vmatprep.mubr.bf16.mxu1 %v5783_v60  ;;  %v2189_v13 = vrot.slane %v2188_v61, 4  ;;  %v2962_v14 = vshll.u32 %v2889_v53, 16  ;;  %v2968_v17 = vshll.u32 %v2890_v59, 16  ;;  %v2972_v15 = vshrl.u32 %v2890_v59, 16 }
 0x14f   : > { %v7590_v3 = vpop.f32.mrb[1].mxu0  ;;  %4817 = vmatmul.mubr.bf16.gmra.mrb[76].mxu0 %v5726_v40  ;;  %v2199_v19 = vrot.slane %v2198_v57, 4  ;;  %v2618_v21 = vsel %vm7332_vm14, %v2616_v6, %v2617_v7  ;;  %v2961_v23 = vrot.slane %v2959_v9, 4  ;;  %v2978_v24 = vshll.u32 %v2891_v0, 16  ;;  %v2483_v40 = vld [vmem:[#allocation2 + $0x84] sm:$0xe] }
 0x150   : > { %v7602_v33 = vpop.f32.mrb[2].mxu0  ;;  %4824 = vmatprep.mubr.bf16.mxu0 %v5759_v25  ;;  %v2194_v27 = vsel %vm7176_vm9, %v2189_v13, %v2193_v20  ;;  %v5760_v31 = vcombine.low %v2615_v62, %v2618_v21  ;;  %v2964_v32 = vrot.slane %v2962_v14, 5  ;;  %v2970_v25 = vrot.slane %v2968_v17, 5  ;;  %v2893_v59 = vld [vmem:[#allocation2 + $0x34] sm:$0xf]  ;;  %v6776_v62 = vld [vmem:[#allocation2 + $0x24] sm:$0xff]  }
 0x151   : > { %v7608_v29 = vpop.f32.mrb[3].mxu0  ;;  %v2204_v35 = vsel %vm7176_vm9, %v2199_v19, %v2203_v63  ;;  %v2974_v36 = vrot.slane %v2972_v15, 4  ;;  %v2980_v37 = vrot.slane %v2978_v24, 5  ;;  %v2206_v28 = vshrl.u32 %v1968_v1, 16  ;;  %v1971_v9 = vld [vmem:[#allocation2 + $0x84] sm:$0xf] }
 0x152   : > { %v5727_v42 = vcombine.low %v2194_v27, %v2204_v35  ;;  %v2965_v43 = vor.u32 %v2964_v32, %v2961_v23  ;;  %v2209_v44 = vshll.u32 %v1968_v1, 16  ;;  %v2215_v45 = vshll.u32 %v1969_v11, 16  ;;  %v2894_v1 = vld [vmem:[#allocation2 + $0x38] sm:$0x1] }
 0x153   : > { %4922 = vmatmul.mubr.bf16.vlgmr.msra.gmra.mrb[80].mxu1 %v6774_v5  ;;  %v2975_v48 = vor.u32 %v2974_v36, %v2970_v25  ;;  %v2208_v49 = vrot.slane %v2206_v28, 4  ;;  %v2219_v50 = vshrl.u32 %v1969_v11, 16  ;;  %v2225_v51 = vshll.u32 %v1970_v34, 16 }
 0x154   : > { %v2966_v54 = vrot.slane %v2965_v43, 4  ;;  %v2211_v56 = vrot.slane %v2209_v44, 5  ;;  %v2217_v20 = vrot.slane %v2215_v45, 5  ;;  %v5745_v58 = vrot.slane %v2483_v40, 9  ;;  %v1973_v43 = vld [vmem:[#allocation2 + $0x8c] sm:$0x1] }
 0x155   : > { %v2976_v60 = vrot.slane %v2975_v48, 4  ;;  %v2221_v61 = vrot.slane %v2219_v50, 4  ;;  %v2227_v63 = vrot.slane %v2225_v51, 5  ;;  %v2621_v0 = vrot.slane %v2484_v47, 5  ;;  %v2486_v48 = vld [vmem:[#allocation2 + $0x90] sm:$0xe] }
 0x156   : > { %v7619_v55 = vpop.f32.mrb[0].mxu1  ;;  %v2971_v57 = vsel %vm7176_vm9, %v2966_v54, %v2970_v25  ;;  %v2212_v5 = vor.u32 %v2211_v56, %v2208_v49  ;;  %v2624_v6 = vrot.slane %v2485_v46, 5  ;;  %v2983_v7 = vshrl.u32 %v2892_v52, 16  ;;  %v2487_v56 = vld [vmem:[#allocation2 + $0x94] sm:$0xf] }
 0x157   : > { %v7621_v8 = vpop.f32.mrb[1].mxu1  ;;  %4825 = vmatmul.mubr.bf16.gmra.mrb[80].mxu0 %v5727_v42  ;;  %v2981_v11 = vsel %vm7176_vm9, %v2976_v60, %v2980_v37  ;;  %v2222_v13 = vor.u32 %v2221_v61, %v2217_v20  ;;  %v2622_v14 = vsel %vm7332_vm14, %v5745_v58, %v2621_v0  ;;  %v2623_v17 = vrot.slane %v2621_v0, 4  ;;  %v1972_v42 = vld [vmem:[#allocation2 + $0x88] sm:$0xf]  ;;  %v2488_v61 = vld [vmem:[#allocation2 + $0x98] sm:$0x1] }
 0x158   : > { %v7625_v16 = vpop.f32.mrb[2].mxu1  ;;  %4832 = vmatprep.mubr.bf16.mxu0 %v5760_v31  ;;  %v5784_v19 = vcombine.low %v2971_v57, %v2981_v11  ;;  %v2213_v21 = vrot.slane %v2212_v5, 4  ;;  %v2985_v23 = vrot.slane %v2983_v7, 4  ;;  %v2986_v24 = vshll.u32 %v2892_v52, 16  ;;  %v2895_v57 = vld [vmem:[#allocation2 + $0x3c] sm:$0xf] }
 0x159   : > { %v7639_v2 = vpop.f32.mrb[3].mxu1  ;;  %v2223_v31 = vrot.slane %v2222_v13, 4  ;;  %v2625_v32 = vsel %vm7332_vm14, %v2623_v17, %v2624_v6  ;;  %v2992_v25 = vshll.u32 %v2893_v59, 16  ;;  %v2996_v34 = vshrl.u32 %v2893_v59, 16  ;;  %v2896_v13 = vld [vmem:[#allocation2 + $0x40] sm:$0xf] }
 0x15a   : > { %4929 = vmatprep.mubr.bf16.mxu1 %v5784_v19  ;;  %v2218_v36 = vsel %vm7176_vm9, %v2213_v21, %v2217_v20  ;;  %v5761_v37 = vcombine.low %v2622_v14, %v2625_v32  ;;  %v2988_v28 = vrot.slane %v2986_v24, 5  ;;  %v3002_v40 = vshll.u32 %v2894_v1, 16  ;;  %v6777_v24 = vld [vmem:[#allocation2 + $0x30] sm:$0xff]  }
 0x15b   : > { %v2228_v44 = vsel %vm7176_vm9, %v2223_v31, %v2227_v63  ;;  %4930 = vmatmul.mubr.bf16.gmra.mrb[84].mxu1 %v6776_v62  ;;  %v2994_v45 = vrot.slane %v2992_v25, 5  ;;  %v2998_v47 = vrot.slane %v2996_v34, 4  ;;  %v2230_v46 = vshrl.u32 %v1971_v9, 16  ;;  %v2897_v25 = vld [vmem:[#allocation2 + $0x44] sm:$0x1] }
 0x15c   : > { %v5728_v50 = vcombine.low %v2218_v36, %v2228_v44  ;;  %v2989_v51 = vor.u32 %v2988_v28, %v2985_v23  ;;  %v3004_v52 = vrot.slane %v3002_v40, 5  ;;  %v2233_v54 = vshll.u32 %v1971_v9, 16  ;;  %v1974_v40 = vld [vmem:[#allocation2 + $0x90] sm:$0xf] }
 0x15d   : > { %v2999_v20 = vor.u32 %v2998_v47, %v2994_v45  ;;  %v2232_v58 = vrot.slane %v2230_v46, 4  ;;  %v2239_v59 = vshll.u32 %v1972_v42, 16  ;;  %v2243_v60 = vshrl.u32 %v1972_v42, 16  ;;  %v1975_v47 = vld [vmem:[#allocation2 + $0x94] sm:$0xf] }
 0x15e   : > { %v7641_v12 = vpop.f32.mrb[4].mxu0  ;;  %v2990_v0 = vrot.slane %v2989_v51, 4  ;;  %v2235_v63 = vrot.slane %v2233_v54, 5  ;;  %v2249_v62 = vshll.u32 %v1973_v43, 16  ;;  %v5746_v1 = vrot.slane %v2486_v48, 9 }
 0x15f   : > { %v7645_v26 = vpop.f32.mrb[5].mxu0  ;;  %4833 = vmatmul.mubr.bf16.gmra.mrb[84].mxu0 %v5728_v50  ;;  %v3000_v5 = vrot.slane %v2999_v20, 4  ;;  %v2241_v6 = vrot.slane %v2239_v59, 5  ;;  %v2245_v7 = vrot.slane %v2243_v60, 4  ;;  %v2628_v11 = vrot.slane %v2487_v56, 5 }
 0x160   : > { %v7651_v41 = vpop.f32.mrb[6].mxu0  ;;  %4840 = vmatprep.mubr.bf16.mxu0 %v5761_v37  ;;  %v2995_v9 = vsel %vm7176_vm9, %v2990_v0, %v2994_v45  ;;  %v2236_v14 = vor.u32 %v2235_v63, %v2232_v58  ;;  %v2251_v17 = vrot.slane %v2249_v62, 5  ;;  %v2631_v19 = vrot.slane %v2488_v61, 5  ;;  %v1976_v54 = vld [vmem:[#allocation2 + $0x98] sm:$0x1] }
 0x161   : > { %v7667_v35 = vpop.f32.mrb[7].mxu0  ;;  %v3005_v21 = vsel %vm7176_vm9, %v3000_v5, %v3004_v52  ;;  %v2246_v23 = vor.u32 %v2245_v7, %v2241_v6  ;;  %v2629_v31 = vsel %vm7332_vm14, %v5746_v1, %v2628_v11  ;;  %v2630_v32 = vrot.slane %v2628_v11, 4  ;;  %v2489_v56 = vld [vmem:[#allocation2 + $0x9c] sm:$0xe]  ;;  %v2490_v61 = vld [vmem:[#allocation2 + $0xa0] sm:$0xf] }
 0x162   : > { %v5785_v34 = vcombine.low %v2995_v9, %v3005_v21  ;;  %v2237_v36 = vrot.slane %v2236_v14, 4  ;;  %v3007_v37 = vshrl.u32 %v2895_v57, 16  ;;  %v3010_v28 = vshll.u32 %v2895_v57, 16  ;;  %v2491_v5 = vld [vmem:[#allocation2 + $0xa4] sm:$0x1] }
 0x163   : > { %v2247_v42 = vrot.slane %v2246_v23, 4  ;;  %v2632_v43 = vsel %vm7332_vm14, %v2630_v32, %v2631_v19  ;;  %v3016_v44 = vshll.u32 %v2896_v13, 16  ;;  %v3020_v45 = vshrl.u32 %v2896_v13, 16 }
 0x164   : > { %v7653_v53 = vpop.f32.mrb[4].mxu1  ;;  %4937 = vmatprep.mubr.bf16.mxu1 %v5785_v34  ;;  %v2242_v48 = vsel %vm7176_vm9, %v2237_v36, %v2241_v6  ;;  %v5762_v50 = vcombine.low %v2629_v31, %v2632_v43  ;;  %v3009_v51 = vrot.slane %v3007_v37, 4  ;;  %v3012_v52 = vrot.slane %v3010_v28, 5  ;;  %v2898_v6 = vld [vmem:[#allocation2 + $0x48] sm:$0xf] }
 0x165   : > { %v7661_v15 = vpop.f32.mrb[5].mxu1  ;;  %v2252_v20 = vsel %vm7176_vm9, %v2247_v42, %v2251_v17  ;;  %4938 = vmatmul.mubr.bf16.gmra.mrb[88].mxu1 %v6777_v24  ;;  %v3018_v58 = vrot.slane %v3016_v44, 5  ;;  %v3022_v59 = vrot.slane %v3020_v45, 4  ;;  %v3026_v60 = vshll.u32 %v2897_v25, 16  ;;  %v6779_v44 = vld [vmem:[#allocation2 + $0x3c] sm:$0xff]  }
 0x166   : > { %v7663_v27 = vpop.f32.mrb[6].mxu1  ;;  %v5729_v63 = vcombine.low %v2242_v48, %v2252_v20  ;;  %v3013_v62 = vor.u32 %v3012_v52, %v3009_v51  ;;  %v2254_v1 = vshrl.u32 %v1974_v40, 16  ;;  %v2257_v57 = vshll.u32 %v1974_v40, 16  ;;  %v2899_v40 = vld [vmem:[#allocation2 + $0x4c] sm:$0xf] }
 0x167   : > { %v7673_v49 = vpop.f32.mrb[7].mxu1  ;;  %v3023_v7 = vor.u32 %v3022_v59, %v3018_v58  ;;  %v3028_v11 = vrot.slane %v3026_v60, 5  ;;  %v2263_v13 = vshll.u32 %v1975_v47, 16  ;;  %v2267_v9 = vshrl.u32 %v1975_v47, 16  ;;  %v2900_v47 = vld [vmem:[#allocation2 + $0x50] sm:$0x1] }
 0x168   : > { %4841 = vmatmul.mubr.bf16.gmra.mrb[88].mxu0 %v5729_v63  ;;  %v3014_v17 = vrot.slane %v3013_v62, 4  ;;  %v2256_v19 = vrot.slane %v2254_v1, 4  ;;  %v2259_v21 = vrot.slane %v2257_v57, 5  ;;  %v2273_v23 = vshll.u32 %v1976_v54, 16 }
 0x169   : > { %4848 = vmatprep.mubr.bf16.mxu0 %v5762_v50  ;;  %v3024_v24 = vrot.slane %v3023_v7, 4  ;;  %v2265_v31 = vrot.slane %v2263_v13, 5  ;;  %v2269_v32 = vrot.slane %v2267_v9, 4  ;;  %v5747_v25 = vrot.slane %v2489_v56, 9  ;;  %v1977_v56 = vld [vmem:[#allocation2 + $0x9c] sm:$0xf] }
 0x16a   : > { %v3019_v34 = vsel %vm7176_vm9, %v3014_v17, %v3018_v58  ;;  %v2260_v36 = vor.u32 %v2259_v21, %v2256_v19  ;;  %v2275_v37 = vrot.slane %v2273_v23, 5  ;;  %v2635_v28 = vrot.slane %v2490_v61, 5  ;;  %v1978_v61 = vld [vmem:[#allocation2 + $0xa0] sm:$0xf]  ;;  %v2492_v7 = vld [vmem:[#allocation2 + $0xa8] sm:$0xe] }
 0x16b   : > { %v3029_v42 = vsel %vm7176_vm9, %v3024_v24, %v3028_v11  ;;  %v2270_v43 = vor.u32 %v2269_v32, %v2265_v31  ;;  %v2638_v45 = vrot.slane %v2491_v5, 5  ;;  %v3031_v48 = vshrl.u32 %v2898_v6, 16  ;;  %v1979_v5 = vld [vmem:[#allocation2 + $0xa4] sm:$0x1]  ;;  %v2493_v17 = vld [vmem:[#allocation2 + $0xac] sm:$0xf] }
 0x16c   : > { %v5786_v50 = vcombine.low %v3019_v34, %v3029_v42  ;;  %v2261_v51 = vrot.slane %v2260_v36, 4  ;;  %v2636_v52 = vsel %vm7332_vm14, %v5747_v25, %v2635_v28  ;;  %v2637_v54 = vrot.slane %v2635_v28, 4  ;;  %v2494_v28 = vld [vmem:[#allocation2 + $0xb0] sm:$0x1] }
 0x16d   : > { %v2271_v20 = vrot.slane %v2270_v43, 4  ;;  %v3033_v58 = vrot.slane %v3031_v48, 4  ;;  %v3034_v59 = vshll.u32 %v2898_v6, 16  ;;  %v3040_v60 = vshll.u32 %v2899_v40, 16 }
 0x16e   : > { %4945 = vmatprep.mubr.bf16.mxu1 %v5786_v50  ;;  %v2266_v63 = vsel %vm7176_vm9, %v2261_v51, %v2265_v31  ;;  %v2639_v62 = vsel %vm7332_vm14, %v2637_v54, %v2638_v45  ;;  %v3044_v1 = vshrl.u32 %v2899_v40, 16  ;;  %v3050_v57 = vshll.u32 %v2900_v47, 16  ;;  %v2901_v45 = vld [vmem:[#allocation2 + $0x54] sm:$0xf] }
 0x16f   : > { %v2276_v11 = vsel %vm7176_vm9, %v2271_v20, %v2275_v37  ;;  %4946 = vmatmul.mubr.bf16.gmra.mrb[92].mxu1 %v6779_v44  ;;  %v5763_v13 = vcombine.low %v2636_v52, %v2639_v62  ;;  %v3036_v9 = vrot.slane %v3034_v59, 5  ;;  %v3042_v6 = vrot.slane %v3040_v60, 5  ;;  %v6780_v20 = vld [vmem:[#allocation2 + $0x48] sm:$0xff]   ;;  %v2902_v62 = vld [vmem:[#allocation2 + $0x58] sm:$0xf] }
 0x170   : > { %v5730_v19 = vcombine.low %v2266_v63, %v2276_v11  ;;  %v3046_v21 = vrot.slane %v3044_v1, 4  ;;  %v3052_v23 = vrot.slane %v3050_v57, 5  ;;  %v2278_v24 = vshrl.u32 %v1977_v56, 16  ;;  %v2903_v1 = vld [vmem:[#allocation2 + $0x5c] sm:$0x1] }
 0x171   : > { %v3037_v32 = vor.u32 %v3036_v9, %v3033_v58  ;;  %v2281_v25 = vshll.u32 %v1977_v56, 16  ;;  %v2287_v34 = vshll.u32 %v1978_v61, 16  ;;  %v2291_v36 = vshrl.u32 %v1978_v61, 16 }
 0x172   : > { %4849 = vmatmul.mubr.bf16.gmra.mrb[92].mxu0 %v5730_v19  ;;  %v3047_v37 = vor.u32 %v3046_v21, %v3042_v6  ;;  %v2280_v42 = vrot.slane %v2278_v24, 4  ;;  %v2297_v43 = vshll.u32 %v1979_v5, 16  ;;  %v5748_v44 = vrot.slane %v2492_v7, 9  ;;  %v1981_v19 = vld [vmem:[#allocation2 + $0xac] sm:$0xf] }
 0x173   : > { %4856 = vmatprep.mubr.bf16.mxu0 %v5763_v13  ;;  %v3038_v48 = vrot.slane %v3037_v32, 4  ;;  %v2283_v50 = vrot.slane %v2281_v25, 5  ;;  %v2289_v51 = vrot.slane %v2287_v34, 5  ;;  %v2293_v52 = vrot.slane %v2291_v36, 4  ;;  %v1982_v25 = vld [vmem:[#allocation2 + $0xb0] sm:$0x1] }
 0x174   : > { %v7683_v46 = vpop.f32.mrb[8].mxu0  ;;  %v3048_v54 = vrot.slane %v3047_v37, 4  ;;  %v2299_v56 = vrot.slane %v2297_v43, 5  ;;  %v2642_v58 = vrot.slane %v2493_v17, 5  ;;  %v2645_v59 = vrot.slane %v2494_v28, 5 }
 0x175   : > { %v7689_v0 = vpop.f32.mrb[9].mxu0  ;;  %v3043_v60 = vsel %vm7176_vm9, %v3038_v48, %v3042_v6  ;;  %v2284_v61 = vor.u32 %v2283_v50, %v2280_v42  ;;  %v2294_v63 = vor.u32 %v2293_v52, %v2289_v51  ;;  %v3055_v57 = vshrl.u32 %v2901_v45, 16  ;;  %v1980_v17 = vld [vmem:[#allocation2 + $0xa8] sm:$0xf]  ;;  %v2495_v42 = vld [vmem:[#allocation2 + $0xb4] sm:$0xe] }
 0x176   : > { %v7691_v14 = vpop.f32.mrb[10].mxu0  ;;  %v3053_v7 = vsel %vm7176_vm9, %v3048_v54, %v3052_v23  ;;  %v2643_v11 = vsel %vm7332_vm14, %v5748_v44, %v2642_v58  ;;  %v2644_v13 = vrot.slane %v2642_v58, 4  ;;  %v3058_v9 = vshll.u32 %v2901_v45, 16 }
 0x177   : > { %v7713_v5 = vpop.f32.mrb[11].mxu0  ;;  %v5787_v21 = vcombine.low %v3043_v60, %v3053_v7  ;;  %v2285_v24 = vrot.slane %v2284_v61, 4  ;;  %v2295_v6 = vrot.slane %v2294_v63, 4  ;;  %v3057_v32 = vrot.slane %v3055_v57, 4  ;;  %v2496_v61 = vld [vmem:[#allocation2 + $0xb8] sm:$0xf] }
 0x178   : > { %v2646_v36 = vsel %vm7332_vm14, %v2644_v13, %v2645_v59  ;;  %v3060_v28 = vrot.slane %v3058_v9, 5  ;;  %v3064_v37 = vshll.u32 %v2902_v62, 16  ;;  %v3068_v23 = vshrl.u32 %v2902_v62, 16  ;;  %v2497_v13 = vld [vmem:[#allocation2 + $0xbc] sm:$0x1] }
 0x179   : > { %v7705_v31 = vpop.f32.mrb[8].mxu1  ;;  %4953 = vmatprep.mubr.bf16.mxu1 %v5787_v21  ;;  %v2290_v44 = vsel %vm7176_vm9, %v2285_v24, %v2289_v51  ;;  %v2300_v45 = vsel %vm7176_vm9, %v2295_v6, %v2299_v56  ;;  %v5764_v48 = vcombine.low %v2643_v11, %v2646_v36  ;;  %v3074_v50 = vshll.u32 %v2903_v1, 16  ;;  %v2904_v11 = vld [vmem:[#allocation2 + $0x60] sm:$0xf]  ;;  %v2905_v36 = vld [vmem:[#allocation2 + $0x64] sm:$0xf] }
 0x17a   : > { %v7707_v40 = vpop.f32.mrb[9].mxu1  ;;  %v5731_v54 = vcombine.low %v2290_v44, %v2300_v45  ;;  %4954 = vmatmul.mubr.bf16.gmra.mrb[96].mxu1 %v6780_v20  ;;  %v3061_v58 = vor.u32 %v3060_v28, %v3057_v32  ;;  %v3066_v59 = vrot.slane %v3064_v37, 5  ;;  %v3070_v60 = vrot.slane %v3068_v23, 4 }
 0x17b   : > { %v7709_v47 = vpop.f32.mrb[10].mxu1  ;;  %v3076_v63 = vrot.slane %v3074_v50, 5  ;;  %v2302_v62 = vshrl.u32 %v1980_v17, 16  ;;  %v2305_v57 = vshll.u32 %v1980_v17, 16  ;;  %v2311_v7 = vshll.u32 %v1981_v19, 16 }
 0x17c   : > { %v7719_v34 = vpop.f32.mrb[11].mxu1  ;;  %4857 = vmatmul.mubr.bf16.gmra.mrb[96].mxu0 %v5731_v54  ;;  %v3062_v51 = vrot.slane %v3061_v58, 4  ;;  %v3071_v9 = vor.u32 %v3070_v60, %v3066_v59  ;;  %v2315_v21 = vshrl.u32 %v1981_v19, 16  ;;  %v2321_v56 = vshll.u32 %v1982_v25, 16  ;;  %v6782_v19 = vld [vmem:[#allocation2 + $0x54] sm:$0xff]  }
 0x17d   : > { %4864 = vmatprep.mubr.bf16.mxu0 %v5764_v48  ;;  %v2304_v24 = vrot.slane %v2302_v62, 4  ;;  %v2307_v20 = vrot.slane %v2305_v57, 5  ;;  %v2313_v6 = vrot.slane %v2311_v7, 5  ;;  %v5749_v32 = vrot.slane %v2495_v42, 9  ;;  %v2906_v60 = vld [vmem:[#allocation2 + $0x68] sm:$0x1] }
 0x17e   : > { %v3067_v28 = vsel %vm7176_vm9, %v3062_v51, %v3066_v59  ;;  %v3072_v17 = vrot.slane %v3071_v9, 4  ;;  %v2317_v37 = vrot.slane %v2315_v21, 4  ;;  %v2323_v23 = vrot.slane %v2321_v56, 5  ;;  %v1983_v59 = vld [vmem:[#allocation2 + $0xb4] sm:$0xf] }
 0x17f   : > { %v7723_v43 = vpop.f32.mrb[12].mxu0  ;;  %v2308_v45 = vor.u32 %v2307_v20, %v2304_v24  ;;  %v2649_v25 = vrot.slane %v2496_v61, 5  ;;  %v2652_v50 = vrot.slane %v2497_v13, 5  ;;  %v3079_v54 = vshrl.u32 %v2904_v11, 16 }
 0x180   : > { %v7731_v1 = vpop.f32.mrb[13].mxu0  ;;  %v3077_v48 = vsel %vm7176_vm9, %v3072_v17, %v3076_v63  ;;  %v2318_v42 = vor.u32 %v2317_v37, %v2313_v6  ;;  %v3082_v62 = vshll.u32 %v2904_v11, 16  ;;  %v3088_v57 = vshll.u32 %v2905_v36, 16  ;;  %v1984_v37 = vld [vmem:[#allocation2 + $0xb8] sm:$0xf] }
 0x181   : > { %v7737_v58 = vpop.f32.mrb[14].mxu0  ;;  %v5788_v7 = vcombine.low %v3067_v28, %v3077_v48  ;;  %v2309_v51 = vrot.slane %v2308_v45, 4  ;;  %v2650_v9 = vsel %vm7332_vm14, %v5749_v32, %v2649_v25  ;;  %v2651_v21 = vrot.slane %v2649_v25, 4  ;;  %v1985_v25 = vld [vmem:[#allocation2 + $0xbc] sm:$0x1] }
 0x182   : > { %v2319_v56 = vrot.slane %v2318_v42, 4  ;;  %v3081_v61 = vrot.slane %v3079_v54, 4  ;;  %v3084_v13 = vrot.slane %v3082_v62, 5  ;;  %v3090_v24 = vrot.slane %v3088_v57, 5 }
 0x183   : > { %4961 = vmatprep.mubr.bf16.mxu1 %v5788_v7  ;;  %v2314_v20 = vsel %vm7176_vm9, %v2309_v51, %v2313_v6  ;;  %v2653_v63 = vsel %vm7332_vm14, %v2651_v21, %v2652_v50  ;;  %v3092_v11 = vshrl.u32 %v2905_v36, 16  ;;  %v3098_v17 = vshll.u32 %v2906_v60, 16  ;;  %v408_v7 = vld [vmem:[#allocation2 + $0xc8] sm:$0x1]  ;;  %v7751_v51 = vpop.f32.mrb[15].mxu0 }
 0x184   : > { %v2324_v28 = vsel %vm7176_vm9, %v2319_v56, %v2323_v23  ;;  %4962 = vmatmul.mubr.bf16.gmra.mrb[100].mxu1 %v6782_v19  ;;  %v5765_v32 = vcombine.low %v2650_v9, %v2653_v63  ;;  %v3085_v45 = vor.u32 %v3084_v13, %v3081_v61  ;;  %v2326_v54 = vshrl.u32 %v1983_v59, 16  ;;  %v2498_v61 = vld [vmem:[#allocation2 + $0xc0] sm:$0xe] }
 0x185   : > { %v5732_v42 = vcombine.low %v2314_v20, %v2324_v28  ;;  %v3094_v62 = vrot.slane %v3092_v11, 4  ;;  %v3100_v57 = vrot.slane %v3098_v17, 5  ;;  %v2329_v6 = vshll.u32 %v1983_v59, 16  ;;  %v2499_v11 = vld [vmem:[#allocation2 + $0xc4] sm:$0xf] }
 0x186   : > { %v3086_v36 = vrot.slane %v3085_v45, 4  ;;  %v2328_v50 = vrot.slane %v2326_v54, 4  ;;  %v2335_v60 = vshll.u32 %v1984_v37, 16  ;;  %v2339_v21 = vshrl.u32 %v1984_v37, 16  ;;  %v2907_v17 = vld [vmem:[#allocation2 + $0x6c] sm:$0xf] }
 0x187   : > { %4865 = vmatmul.mubr.bf16.gmra.mrb[100].mxu0 %v5732_v42  ;;  %v3095_v23 = vor.u32 %v3094_v62, %v3090_v24  ;;  %v2331_v19 = vrot.slane %v2329_v6, 5  ;;  %v2345_v9 = vshll.u32 %v1985_v25, 16  ;;  %v7755_v56 = vadd.f32 %v7590_v3, %v7580_v39  ;;  %v2908_v3 = vld [vmem:[#allocation2 + $0x70] sm:$0xf]  ;;  %v6783_v25 = vld [vmem:[#allocation2 + $0x60] sm:$0xff]  }
 0x188   : > { %4872 = vmatprep.mubr.bf16.mxu0 %v5765_v32  ;;  %v3091_v59 = vsel %vm7176_vm9, %v3086_v36, %v3090_v24  ;;  %v2337_v13 = vrot.slane %v2335_v60, 5  ;;  %v2341_v20 = vrot.slane %v2339_v21, 4  ;;  %v7761_v63 = vadd.f32 %v7621_v8, %v7619_v55  ;;  %v2909_v54 = vld [vmem:[#allocation2 + $0x74] sm:$0x1] }
 0x189   : > { %v7729_v52 = vpop.f32.mrb[12].mxu1  ;;  %v3096_v37 = vrot.slane %v3095_v23, 4  ;;  %v2332_v28 = vor.u32 %v2331_v19, %v2328_v50  ;;  %v2347_v45 = vrot.slane %v2345_v9, 5  ;;  %v7765_v39 = vadd.f32 %v7608_v29, %v7602_v33  ;;  %v1986_v29 = vld [vmem:[#allocation2 + $0xc0] sm:$0xf] }
 0x18a   : > { %v7735_v44 = vpop.f32.mrb[13].mxu1  ;;  %8606 = vst [vmem:[#allocation16_spill] sm:$0xff] %v7761_v63  ;;  %v2342_v32 = vor.u32 %v2341_v20, %v2337_v13  ;;  %v7769_v24 = vadd.f32 %v7639_v2, %v7625_v16  ;;  %v409_v55 = vsel %vm7165_vm8, 0, %v408_v7  ;;  %v5750_v8 = vrot.slane %v2498_v61, 9  ;;  %v1987_v2 = vld [vmem:[#allocation2 + $0xc4] sm:$0xf] }
 0x18b   : > { %v7749_v48 = vpop.f32.mrb[14].mxu1  ;;  %v3101_v42 = vsel %vm7176_vm9, %v3096_v37, %v3100_v57  ;;  %v2333_v62 = vrot.slane %v2332_v28, 4  ;;  %410 = vst [vmem:[#allocation2 + $0xc8] sm:$0x1] %v409_v55  ;;  %v2656_v6 = vrot.slane %v2499_v11, 5  ;;  %v3103_v33 = vshrl.u32 %v2907_v17, 16 }
 0x18c   : > { %8607 = vst [vmem:[#allocation17_spill] sm:$0xff] %v7769_v24  ;;  %v7775_v36 = vpop.f32.mrb[15].mxu1  ;;  %v5789_v50 = vcombine.low %v3091_v59, %v3101_v42  ;;  %v2343_v60 = vrot.slane %v2342_v32, 4  ;;  %v3106_v21 = vshll.u32 %v2907_v17, 16  ;;  %v3112_v16 = vshll.u32 %v2908_v3, 16 }
 0x18d   : > { %v2338_v22 = vsel %vm7176_vm9, %v2333_v62, %v2337_v13  ;;  %v7783_v57 = vsel %vm7332_vm14, %v5750_v8, %v2656_v6  ;;  %v7785_v7 = vrot.slane %v2656_v6, 4  ;;  %v3105_v19 = vrot.slane %v3103_v33, 4  ;;  %v2910_v6 = vld [vmem:[#allocation2 + $0x78] sm:$0xf] }
 0x18e   : > { %4969 = vmatprep.mubr.bf16.mxu1 %v5789_v50  ;;  %v2348_v9 = vsel %vm7176_vm9, %v2343_v60, %v2347_v45  ;;  %v3108_v61 = vrot.slane %v3106_v21, 5  ;;  %v3114_v59 = vrot.slane %v3112_v16, 5  ;;  %v3116_v20 = vshrl.u32 %v2908_v3, 16 }
 0x18f   : > { %v5733_v17 = vcombine.low %v2338_v22, %v2348_v9  ;;  %4970 = vmatmul.mubr.bf16.gmra.mrb[104].mxu1 %v6783_v25  ;;  %v3122_v37 = vshll.u32 %v2909_v54, 16  ;;  %v2350_v13 = vshrl.u32 %v1986_v29, 16  ;;  %v2353_v28 = vshll.u32 %v1986_v29, 16  ;;  %v2911_v25 = vld [vmem:[#allocation2 + $0x7c] sm:$0xf] }
 0x190   : > { %v3109_v55 = vor.u32 %v3108_v61, %v3105_v19  ;;  %v3118_v8 = vrot.slane %v3116_v20, 4  ;;  %v2359_v42 = vshll.u32 %v1987_v2, 16  ;;  %v2363_v62 = vshrl.u32 %v1987_v2, 16  ;;  %v2912_v20 = vld [vmem:[#allocation2 + $0x80] sm:$0x1] }
 0x191   : > { %v7789_v11 = vpop.f32.mrb[16].mxu1  ;;  %4873 = vmatmul.mubr.bf16.gmra.mrb[104].mxu0 %v5733_v17  ;;  %v3124_v45 = vrot.slane %v3122_v37, 5  ;;  %v2352_v50 = vrot.slane %v2350_v13, 4  ;;  %v2355_v3 = vrot.slane %v2353_v28, 5  ;;  %v7797_v60 = vadd.f32 %v7645_v26, %v7641_v12  ;;  %v3398_v17 = vld [vmem:[#allocation2 + $0x18] sm:$0xe] }
 0x192   : > { %v7793_v33 = vpop.f32.mrb[17].mxu1  ;;  %v844_v29 = vld [vmem:[#allocation2 + $0xc8] sm:$0x1]  ;;  %v3110_v21 = vrot.slane %v3109_v55, 4  ;;  %v3119_v16 = vor.u32 %v3118_v8, %v3114_v59  ;;  %v7801_v22 = vrot.slane %v2359_v42, 5  ;;  %v2365_v2 = vrot.slane %v2363_v62, 4 }
 0x193   : > { %v7803_v19 = vpop.f32.mrb[18].mxu1  ;;  %v845_v9 = vsel %vm7158_vm5, %v684_v18, %v844_v29  ;;  %v2356_v61 = vor.u32 %v2355_v3, %v2352_v50  ;;  %v7811_v12 = vadd.f32 %v7661_v15, %v7653_v53  ;;  %v7815_v26 = vadd.f32 %v7667_v35, %v7651_v41  ;;  %v3399_v53 = vld [vmem:[#allocation2 + $0x1c] sm:$0xf]  ;;  %v3400_v15 = vld [vmem:[#allocation2 + $0x20] sm:$0x1] }
 0x194   : > { %846 = vst [vmem:[#allocation2 + $0xc8] sm:$0x1] %v845_v9  ;;  %v3115_v37 = vsel %vm7176_vm9, %v3110_v21, %v3114_v59  ;;  %v3120_v13 = vrot.slane %v3119_v16, 4  ;;  %v2366_v4 = vor.u32 %v2365_v2, %v7801_v22  ;;  %v7822_v18 = vadd.f32 %v7673_v49, %v7663_v27  ;;  %v3401_v28 = vld [vmem:[#allocation2 + $0x24] sm:$0xe]  ;;  %v7832_v29 = vpop.f32.mrb[19].mxu1 }
 0x195   : > { %v7777_v23 = vpop.f32.mrb[16].mxu0  ;;  %8608 = vst [vmem:[#allocation18_spill] sm:$0xff] %v7811_v12  ;;  %v7826_v41 = vrot.slane %v2356_v61, 4  ;;  %v3127_v35 = vshrl.u32 %v2910_v6, 16  ;;  %v3130_v8 = vshll.u32 %v2910_v6, 16  ;;  %v3136_v42 = vshll.u32 %v2911_v25, 16 }
 0x196   : > { %v7791_v32 = vpop.f32.mrb[17].mxu0  ;;  %8609 = vst [vmem:[#allocation19_spill] sm:$0xff] %v7822_v18  ;;  %v3125_v59 = vsel %vm7176_vm9, %v3120_v13, %v3124_v45  ;;  %v7830_v62 = vrot.slane %v2366_v4, 4  ;;  %v3140_v50 = vshrl.u32 %v2911_v25, 16  ;;  %v3146_v3 = vshll.u32 %v2912_v20, 16 }
 0x197   : > { %v7799_v54 = vpop.f32.mrb[18].mxu0  ;;  %v5790_v27 = vcombine.low %v3115_v37, %v3125_v59  ;;  %v2362_v49 = vsel %vm7176_vm9, %v7826_v41, %v7801_v22  ;;  %v3129_v21 = vrot.slane %v3127_v35, 4  ;;  %v3132_v16 = vrot.slane %v3130_v8, 5  ;;  %v3402_v2 = vld [vmem:[#allocation2 + $0x28] sm:$0xf] }
 0x198   : > { %v7824_v55 = vpop.f32.mrb[19].mxu0  ;;  %v3403_v6 = vld [vmem:[#allocation2 + $0x2c] sm:$0x1]  ;;  %v3138_v9 = vrot.slane %v3136_v42, 5  ;;  %v3142_v61 = vrot.slane %v3140_v50, 4  ;;  %v3148_v18 = vrot.slane %v3146_v3, 5  ;;  %v7842_v22 = vadd.f32 %v7689_v0, %v7683_v46 }
 0x199   : > { %v5799_v45 = vrot.slane %v3398_v17, 9  ;;  %4977 = vmatprep.mubr.bf16.mxu1 %v5790_v27  ;;  %v3133_v13 = vor.u32 %v3132_v16, %v3129_v21  ;;  %v3496_v25 = vrot.slane %v3399_v53, 5  ;;  %v3499_v20 = vrot.slane %v3400_v15, 5  ;;  %v2913_v15 = vld [vmem:[#allocation2 + $0x84] sm:$0xf]  ;;  %v6786_v3 = vld [vmem:[#allocation2 + $0x78] sm:$0xff]  }
 0x19a   : > { %v5800_v4 = vrot.slane %v3401_v28, 9  ;;  %4978 = vmatmul.mubr.bf16.gmra.mrb[108].mxu1 %v6785_v10  ;;  %v3143_v37 = vor.u32 %v3142_v61, %v3138_v9  ;;  %v3503_v59 = vrot.slane %v3402_v2, 5  ;;  %v3506_v24 = vrot.slane %v3403_v6, 5  ;;  %v2914_v0 = vld [vmem:[#allocation2 + $0x88] sm:$0xf]  ;;  %v7854_v27 = vpop.f32.mrb[20].mxu1 }
 0x19b   : > { %v2500_v41 = vld [vmem:[#allocation2 + $0xc8] sm:$0x1]  ;;  %v3134_v8 = vrot.slane %v3133_v13, 4  ;;  %v3497_v17 = vsel %vm7332_vm14, %v5799_v45, %v3496_v25  ;;  %v3498_v42 = vrot.slane %v3496_v25, 4  ;;  %v7848_v53 = vadd.f32 %v7707_v40, %v7705_v31  ;;  %v2915_v2 = vld [vmem:[#allocation2 + $0x8c] sm:$0x1] }
 0x19c   : > { %v1988_v35 = vld [vmem:[#allocation2 + $0xc8] sm:$0x1]  ;;  %v2659_v10 = vrot.slane %v2500_v41, 5  ;;  %v3144_v50 = vrot.slane %v3143_v37, 4  ;;  %v7852_v46 = vsel %vm7332_vm14, %v5800_v4, %v3503_v59  ;;  %v3505_v31 = vrot.slane %v3503_v59, 4  ;;  %v7871_v4 = vpop.f32.mrb[21].mxu1 }
 0x19d   : > { %8610 = vst [vmem:[#allocation20_spill] sm:$0xff] %v7848_v53  ;;  %v2369_v28 = vshll.u32 %v1988_v35, 16  ;;  %v3139_v21 = vsel %vm7176_vm9, %v3134_v8, %v3138_v9  ;;  %v3500_v16 = vsel %vm7332_vm14, %v3498_v42, %v3499_v20  ;;  %v7862_v40 = vadd.f32 %v7713_v5, %v7691_v14  ;;  %v3404_v6 = vld [vmem:[#allocation2 + $0x30] sm:$0xe]  ;;  %v3405_v59 = vld [vmem:[#allocation2 + $0x34] sm:$0xf] }
 0x19e   : > { %v2660_v45 = vsel %vm7332_vm14, %v7785_v7, %v2659_v10  ;;  %v3149_v9 = vsel %vm7176_vm9, %v3144_v50, %v3148_v18  ;;  %v5815_v25 = vcombine.low %v3497_v17, %v3500_v16  ;;  %v7876_v14 = vsel %vm7332_vm14, %v3505_v31, %v3506_v24  ;;  %v3406_v7 = vld [vmem:[#allocation2 + $0x38] sm:$0x1]  ;;  %v3407_v41 = vld [vmem:[#allocation2 + $0x3c] sm:$0xe]  ;;  %v3408_v17 = vld [vmem:[#allocation2 + $0x40] sm:$0xf] }
 0x19f   : > { %v2371_v13 = vrot.slane %v2369_v28, 5  ;;  %v5766_v20 = vcombine.low %v7783_v57, %v2660_v45  ;;  %v5791_v37 = vcombine.low %v3139_v21, %v3149_v9  ;;  %v7880_v5 = vadd.f32 %v7719_v34, %v7709_v47  ;;  %v7889_v24 = vpop.f32.mrb[22].mxu1  ;;  %v3409_v45 = vld [vmem:[#allocation2 + $0x44] sm:$0x1] }
 0x1a0   : > { %v3151_v57 = vshrl.u32 %v2913_v15, 16  ;;  %v3154_v8 = vshll.u32 %v2913_v15, 16  ;;  %v3160_v34 = vshll.u32 %v2914_v0, 16  ;;  %v3164_v10 = vshrl.u32 %v2914_v0, 16  ;;  %v7893_v21 = vpop.f32.mrb[23].mxu1 }
 0x1a1   : > { %v7838_v12 = vpop.f32.mrb[20].mxu0  ;;  %8611 = vst [vmem:[#allocation21_spill] sm:$0xff] %v7880_v5  ;;  %v2372_v18 = vsel %vm7176_vm9, %v7830_v62, %v2371_v13  ;;  %4880 = vmatprep.mubr.bf16.mxu0 %v5766_v20  ;;  %4985 = vmatprep.mubr.bf16.mxu1 %v5791_v37  ;;  %v3170_v28 = vshll.u32 %v2915_v2, 16  ;;  %v5801_v31 = vrot.slane %v3404_v6, 9  ;;  %v3510_v15 = vrot.slane %v3405_v59, 5 }
 0x1a2   : > { %v7864_v61 = vpop.f32.mrb[21].mxu0  ;;  %v5734_v47 = vcombine.low %v2362_v49, %v2372_v18  ;;  %4986 = vmatmul.mubr.bf16.gmra.mrb[112].mxu1 %v6786_v3  ;;  %v3153_v62 = vrot.slane %v3151_v57, 4  ;;  %v3156_v16 = vrot.slane %v3154_v8, 5  ;;  %v3162_v13 = vrot.slane %v3160_v34, 5  ;;  %v2916_v18 = vld [vmem:[#allocation2 + $0x90] sm:$0xf] }
 0x1a3   : > { %v7887_v42 = vpop.f32.mrb[22].mxu0  ;;  %v3166_v9 = vrot.slane %v3164_v10, 4  ;;  %v3172_v35 = vrot.slane %v3170_v28, 5  ;;  %v3513_v20 = vrot.slane %v3406_v7, 5  ;;  %v3511_v0 = vsel %vm7332_vm14, %v5801_v31, %v3510_v15  ;;  %v2917_v59 = vld [vmem:[#allocation2 + $0x94] sm:$0xf] }
 0x1a4   : > { %v7891_v50 = vpop.f32.mrb[23].mxu0  ;;  %4881 = vmatmul.mubr.bf16.gmra.mrb[108].mxu0 %v5734_v47  ;;  %v3157_v49 = vor.u32 %v3156_v16, %v3153_v62  ;;  %v3512_v2 = vrot.slane %v3510_v15, 4  ;;  %v5802_v37 = vrot.slane %v3407_v41, 9  ;;  %v3517_v3 = vrot.slane %v3408_v17, 5  ;;  %v2918_v47 = vld [vmem:[#allocation2 + $0x98] sm:$0x1] }
 0x1a5   : > { %6559 = vmatprep.mubr.bf16.mxu0 %v5815_v25  ;;  %v3167_v5 = vor.u32 %v3166_v9, %v3162_v13  ;;  %v3520_v57 = vrot.slane %v3409_v45, 5  ;;  %v7899_v6 = vadd.f32 %v7731_v1, %v7723_v43  ;;  %v7905_v25 = vadd.f32 %v7735_v44, %v7729_v52  ;;  %v3410_v17 = vld [vmem:[#allocation2 + $0x48] sm:$0xe]  ;;  %v3411_v16 = vld [vmem:[#allocation2 + $0x4c] sm:$0xf] }
 0x1a6   : > { %v3158_v8 = vrot.slane %v3157_v49, 4  ;;  %v3514_v7 = vsel %vm7332_vm14, %v3512_v2, %v3513_v20  ;;  %v7909_v41 = vadd.f32 %v7751_v51, %v7737_v58  ;;  %v6787_v1 = vld [vmem:[#allocation2 + $0x84] sm:$0xff]   ;;  %v7915_v28 = vsel %vm7332_vm14, %v5802_v37, %v3517_v3  ;;  %v3412_v31 = vld [vmem:[#allocation2 + $0x50] sm:$0x1]  ;;  %v3413_v15 = vld [vmem:[#allocation2 + $0x54] sm:$0xe] }
 0x1a7   : > { %8612 = vst [vmem:[#allocation22_spill] sm:$0xff] %v7905_v25  ;;  %v3168_v10 = vrot.slane %v3167_v5, 4  ;;  %v5817_v43 = vcombine.low %v3511_v0, %v3514_v7  ;;  %v3519_v62 = vrot.slane %v3517_v3, 4  ;;  %v7921_v44 = vadd.f32 %v7775_v36, %v7749_v48  ;;  %v7923_v5 = vpop.f32.mrb[24].mxu1  ;;  %v3414_v0 = vld [vmem:[#allocation2 + $0x58] sm:$0xf] }
 0x1a8   : > { %v3163_v52 = vsel %vm7176_vm9, %v3158_v8, %v3162_v13  ;;  %v3175_v58 = vshrl.u32 %v2916_v18, 16  ;;  %v3178_v51 = vshll.u32 %v2916_v18, 16  ;;  %v3184_v49 = vshll.u32 %v2917_v59, 16  ;;  %v7933_v2 = vpop.f32.mrb[25].mxu1  ;;  %v3415_v8 = vld [vmem:[#allocation2 + $0x5c] sm:$0x1] }
 0x1a9   : > { %8613 = vst [vmem:[#allocation23_spill] sm:$0xff] %v7921_v44  ;;  %v3173_v9 = vsel %vm7176_vm9, %v3168_v10, %v3172_v35  ;;  %v7931_v20 = vsel %vm7332_vm14, %v3519_v62, %v3520_v57  ;;  %v3188_v13 = vshrl.u32 %v2917_v59, 16  ;;  %v7939_v7 = vpop.f32.mrb[26].mxu1  ;;  %v8614_v57 = vcombine.low %v7852_v46, %v7876_v14 }
 0x1aa   : > { %v5792_v36 = vcombine.low %v3163_v52, %v3173_v9  ;;  %v5818_v37 = vcombine.low %v7915_v28, %v7931_v20  ;;  %v3177_v18 = vrot.slane %v3175_v58, 4  ;;  %v3180_v3 = vrot.slane %v3178_v51, 5  ;;  %v7946_v25 = vpop.f32.mrb[27].mxu1 }
 0x1ab   : > { %v3186_v59 = vrot.slane %v3184_v49, 5  ;;  %v3190_v10 = vrot.slane %v3188_v13, 4  ;;  %v3194_v62 = vshll.u32 %v2918_v47, 16  ;;  %v5803_v44 = vrot.slane %v3410_v17, 9  ;;  %v7950_v14 = vpop.f32.mrb[28].mxu1 }
 0x1ac   : > { %v7911_v34 = vpop.f32.mrb[24].mxu0  ;;  %6560 = vmatmul.mubr.bf16.vlgmr.msra.gmra.mrb[112].mxu0 %v8614_v57  ;;  %4993 = vmatprep.mubr.bf16.mxu1 %v5792_v36  ;;  %v3181_v28 = vor.u32 %v3180_v3, %v3177_v18  ;;  %v3524_v52 = vrot.slane %v3411_v16, 5  ;;  %v3527_v58 = vrot.slane %v3412_v31, 5  ;;  %v5804_v51 = vrot.slane %v3413_v15, 9  ;;  %v2919_v16 = vld [vmem:[#allocation2 + $0x9c] sm:$0xf] }
 0x1ad   : > { %v7925_v45 = vpop.f32.mrb[25].mxu0  ;;  %6563 = vmatprep.mubr.bf16.mxu0 %v5817_v43  ;;  %4994 = vmatmul.mubr.bf16.gmra.mrb[116].mxu1 %v6787_v1  ;;  %v3191_v20 = vor.u32 %v3190_v10, %v3186_v59  ;;  %v3196_v53 = vrot.slane %v3194_v62, 5  ;;  %v3531_v63 = vrot.slane %v3414_v0, 5  ;;  %v3534_v46 = vrot.slane %v3415_v8, 5  ;;  %v6788_v15 = vld [vmem:[#allocation2 + $0x90] sm:$0xff]   ;;  %v7976_v57 = vpop.f32.mrb[29].mxu1 }
 0x1ae   : > { %v7935_v48 = vpop.f32.mrb[26].mxu0  ;;  %v3182_v49 = vrot.slane %v3181_v28, 4  ;;  %v3525_v47 = vsel %vm7332_vm14, %v5803_v44, %v3524_v52  ;;  %v3526_v17 = vrot.slane %v3524_v52, 4  ;;  %v7956_v43 = vadd.f32 %v7791_v32, %v7777_v23  ;;  %v2920_v36 = vld [vmem:[#allocation2 + $0xa0] sm:$0xf] }
 0x1af   : > { %v7941_v35 = vpop.f32.mrb[27].mxu0  ;;  %v3192_v31 = vrot.slane %v3191_v20, 4  ;;  %v7960_v1 = vsel %vm7332_vm14, %v5804_v51, %v3531_v63  ;;  %v3533_v13 = vrot.slane %v3531_v63, 4  ;;  %v6201_v0 = vadd.f32 %v7793_v33, %v7789_v11  ;;  %v2921_v3 = vld [vmem:[#allocation2 + $0xa4] sm:$0x1] }
 0x1b0   : > { %v3187_v44 = vsel %vm7176_vm9, %v3182_v49, %v3186_v59  ;;  %v3528_v18 = vsel %vm7332_vm14, %v3526_v17, %v3527_v58  ;;  %v7970_v23 = vadd.f32 %v7824_v55, %v7799_v54  ;;  %v6204_v32 = vadd.f32 %v7832_v29, %v7803_v19  ;;  %v3416_v8 = vld [vmem:[#allocation2 + $0x60] sm:$0xe]  ;;  %v3417_v55 = vld [vmem:[#allocation2 + $0x64] sm:$0xf]  ;;  %v3418_v10 = vld [vmem:[#allocation2 + $0x68] sm:$0x1] }
 0x1b1   : > { %v3197_v11 = vsel %vm7176_vm9, %v3192_v31, %v3196_v53  ;;  %v5819_v33 = vcombine.low %v3525_v47, %v3528_v18  ;;  %v7982_v59 = vsel %vm7332_vm14, %v3533_v13, %v3534_v46  ;;  %v7985_v54 = vadd.f32 %v6201_v0, %v7755_v56  ;;  %v7989_v29 = vpop.f32.mrb[30].mxu1  ;;  %v3419_v58 = vld [vmem:[#allocation2 + $0x6c] sm:$0xe]  ;;  %v3420_v17 = vld [vmem:[#allocation2 + $0x70] sm:$0xf] }
 0x1b2   : > { %v5793_v62 = vcombine.low %v3187_v44, %v3197_v11  ;;  %v5820_v28 = vcombine.low %v7960_v1, %v7982_v59  ;;  %v7994_v53 = vadd.f32 %v6204_v32, %v7765_v39  ;;  %v3199_v52 = vshrl.u32 %v2919_v16, 16  ;;  %v7998_v20 = vpop.f32.mrb[31].mxu1  ;;  %v3421_v39 = vld [vmem:[#allocation2 + $0x74] sm:$0x1] }
 0x1b3   : > { %8615 = vst [vmem:[#allocation24_spill] sm:$0xff] %v7985_v54  ;;  %v3202_v56 = vshll.u32 %v2919_v16, 16  ;;  %v3208_v46 = vshll.u32 %v2920_v36, 16  ;;  %v3212_v49 = vshrl.u32 %v2920_v36, 16  ;;  %v3218_v47 = vshll.u32 %v2921_v3, 16  ;;  %v8002_v3 = vpop.f32.mrb[32].mxu1 }
 0x1b4   : > { %8616 = vst [vmem:[#allocation25_spill] sm:$0xff] %v7994_v53  ;;  %6564 = vmatmul.mubr.bf16.gmra.mrb[116].mxu0 %v5818_v37  ;;  %5001 = vmatprep.mubr.bf16.mxu1 %v5793_v62  ;;  %v3201_v31 = vrot.slane %v3199_v52, 4  ;;  %v5805_v13 = vrot.slane %v3416_v8, 9  ;;  %v3538_v1 = vrot.slane %v3417_v55, 5  ;;  %v3541_v0 = vrot.slane %v3418_v10, 5  ;;  %v8008_v55 = vpop.f32.mrb[33].mxu1 }
 0x1b5   : > { %v7948_v9 = vpop.f32.mrb[28].mxu0  ;;  %6567 = vmatprep.mubr.bf16.mxu0 %v5819_v33  ;;  %5002 = vmatmul.mubr.bf16.gmra.mrb[120].mxu1 %v6788_v15  ;;  %v3204_v44 = vrot.slane %v3202_v56, 5  ;;  %v3210_v18 = vrot.slane %v3208_v46, 5  ;;  %v3214_v32 = vrot.slane %v3212_v49, 4  ;;  %v3220_v11 = vrot.slane %v3218_v47, 5 }
 0x1b6   : > { %v7974_v63 = vpop.f32.mrb[29].mxu0  ;;  %v3539_v37 = vsel %vm7332_vm14, %v5805_v13, %v3538_v1  ;;  %v3540_v16 = vrot.slane %v3538_v1, 4  ;;  %v5806_v59 = vrot.slane %v3419_v58, 9  ;;  %v3545_v36 = vrot.slane %v3420_v17, 5  ;;  %v2922_v15 = vld [vmem:[#allocation2 + $0xa8] sm:$0xf] }
 0x1b7   : > { %v7987_v19 = vpop.f32.mrb[30].mxu0  ;;  %v3205_v62 = vor.u32 %v3204_v44, %v3201_v31  ;;  %v3215_v33 = vor.u32 %v3214_v32, %v3210_v18  ;;  %v3548_v52 = vrot.slane %v3421_v39, 5  ;;  %v8006_v8 = vadd.f32 %v7864_v61, %v7838_v12  ;;  %v2923_v49 = vld [vmem:[#allocation2 + $0xac] sm:$0xf]  ;;  %v2924_v47 = vld [vmem:[#allocation2 + $0xb0] sm:$0x1] }
 0x1b8   : > { %v7996_v51 = vpop.f32.mrb[31].mxu0  ;;  %v3542_v10 = vsel %vm7332_vm14, %v3540_v16, %v3541_v0  ;;  %v8014_v56 = vsel %vm7332_vm14, %v5806_v59, %v3545_v36  ;;  %v3547_v58 = vrot.slane %v3545_v36, 4  ;;  %v6207_v46 = vadd.f32 %v7871_v4, %v7854_v27  ;;  %v3422_v1 = vld [vmem:[#allocation2 + $0x78] sm:$0xe]  ;;  %v8026_v39 = vpop.f32.mrb[34].mxu1  ;;  %v6789_v44 = vld [vmem:[#allocation2 + $0x9c] sm:$0xff]  }
 0x1b9   : > { %v3206_v12 = vrot.slane %v3205_v62, 4  ;;  %v3216_v61 = vrot.slane %v3215_v33, 4  ;;  %v5821_v31 = vcombine.low %v3539_v37, %v3542_v10  ;;  %v8022_v13 = vadd.f32 %v7891_v50, %v7887_v42  ;;  %v3423_v16 = vld [vmem:[#allocation2 + $0x7c] sm:$0xf]  ;;  %v8037_v42 = vpop.f32.mrb[35].mxu1 }
 0x1ba   : > { %v3549_v27 = vsel %vm7332_vm14, %v3547_v58, %v3548_v52  ;;  %v8031_v4 = vadd.f32 %v6207_v46, %v7797_v60  ;;  %v6210_v32 = vadd.f32 %v7893_v21, %v7889_v24  ;;  %v3223_v37 = vshrl.u32 %v2922_v15, 16  ;;  %v3424_v33 = vld [vmem:[#allocation2 + $0x80] sm:$0x1]  ;;  %v3425_v52 = vld [vmem:[#allocation2 + $0x84] sm:$0xe] }
 0x1bb   : > { %v3211_v50 = vsel %vm7176_vm9, %v3206_v12, %v3210_v18  ;;  %v3221_v36 = vsel %vm7176_vm9, %v3216_v61, %v3220_v11  ;;  %v5822_v62 = vcombine.low %v8014_v56, %v3549_v27  ;;  %v3226_v60 = vshll.u32 %v2922_v15, 16  ;;  %v3426_v46 = vld [vmem:[#allocation2 + $0x88] sm:$0xf] }
 0x1bc   : > { %8617 = vst [vmem:[#allocation26_spill] sm:$0xff] %v8031_v4  ;;  %6568 = vmatmul.mubr.bf16.gmra.mrb[120].mxu0 %v5820_v28  ;;  %v5794_v24 = vcombine.low %v3211_v50, %v3221_v36  ;;  %v8047_v21 = vadd.f32 %v6210_v32, %v7815_v26  ;;  %v3225_v58 = vrot.slane %v3223_v37, 4  ;;  %v3232_v28 = vshll.u32 %v2923_v49, 16  ;;  %v3427_v4 = vld [vmem:[#allocation2 + $0x8c] sm:$0x1]  ;;  %v8049_v26 = vpop.f32.mrb[36].mxu1 }
 0x1bd   : > { %6571 = vmatprep.mubr.bf16.mxu0 %v5821_v31  ;;  %v3228_v18 = vrot.slane %v3226_v60, 5  ;;  %v3236_v12 = vshrl.u32 %v2923_v49, 16  ;;  %v3242_v53 = vshll.u32 %v2924_v47, 16  ;;  %v5807_v11 = vrot.slane %v3422_v1, 9  ;;  %v2925_v47 = vld [vmem:[#allocation2 + $0xb4] sm:$0xf] }
 0x1be   : > { %8618 = vst [vmem:[#allocation27_spill] sm:$0xff] %v8047_v21  ;;  %5009 = vmatprep.mubr.bf16.mxu1 %v5794_v24  ;;  %v3234_v56 = vrot.slane %v3232_v28, 5  ;;  %v3552_v15 = vrot.slane %v3423_v16, 5  ;;  %v3555_v61 = vrot.slane %v3424_v33, 5  ;;  %v5808_v27 = vrot.slane %v3425_v52, 9  ;;  %v8059_v24 = vpop.f32.mrb[37].mxu1 }
 0x1bf   : > { %5010 = vmatmul.mubr.bf16.gmra.mrb[124].mxu1 %v6789_v44  ;;  %v3229_v54 = vor.u32 %v3228_v18, %v3225_v58  ;;  %v3238_v50 = vrot.slane %v3236_v12, 4  ;;  %v3244_v31 = vrot.slane %v3242_v53, 5  ;;  %v3559_v36 = vrot.slane %v3426_v46, 5  ;;  %v2926_v1 = vld [vmem:[#allocation2 + $0xb8] sm:$0xf]  ;;  %v8071_v46 = vpop.f32.mrb[38].mxu1 }
 0x1c0   : > { %v3553_v32 = vsel %vm7332_vm14, %v5807_v11, %v3552_v15  ;;  %v3554_v37 = vrot.slane %v3552_v15, 4  ;;  %v3562_v60 = vrot.slane %v3427_v4, 5  ;;  %v8055_v49 = vadd.f32 %v7925_v45, %v7911_v34  ;;  %v2927_v52 = vld [vmem:[#allocation2 + $0xbc] sm:$0x1]  ;;  %v3429_v28 = vld [vmem:[#allocation2 + $0x94] sm:$0xf] }
 0x1c1   : > { %v8018_v17 = vpop.f32.mrb[32].mxu0  ;;  %v3230_v16 = vrot.slane %v3229_v54, 4  ;;  %v3239_v33 = vor.u32 %v3238_v50, %v3234_v56  ;;  %v3560_v44 = vsel %vm7332_vm14, %v5808_v27, %v3559_v36  ;;  %v3561_v53 = vrot.slane %v3559_v36, 4  ;;  %v3428_v54 = vld [vmem:[#allocation2 + $0x90] sm:$0xe] }
 0x1c2   : > { %v8024_v0 = vpop.f32.mrb[33].mxu0  ;;  %v3556_v58 = vsel %vm7332_vm14, %v3554_v37, %v3555_v61  ;;  %v6213_v4 = vadd.f32 %v7933_v2, %v7923_v5  ;;  %v8067_v34 = vadd.f32 %v7941_v35, %v7935_v48  ;;  %v6216_v45 = vadd.f32 %v7946_v25, %v7939_v7  ;;  %v3430_v2 = vld [vmem:[#allocation2 + $0x98] sm:$0x1]  ;;  %v3431_v15 = vld [vmem:[#allocation2 + $0x9c] sm:$0xe]  ;;  %v8079_v35 = vpop.f32.mrb[39].mxu1 }
 0x1c3   : > { %v8035_v59 = vpop.f32.mrb[34].mxu0  ;;  %v3235_v18 = vsel %vm7176_vm9, %v3230_v16, %v3234_v56  ;;  %v3240_v12 = vrot.slane %v3239_v33, 4  ;;  %v5823_v11 = vcombine.low %v3553_v32, %v3556_v58  ;;  %v3563_v5 = vsel %vm7332_vm14, %v3561_v53, %v3562_v60  ;;  %v3432_v56 = vld [vmem:[#allocation2 + $0xa0] sm:$0xf]  ;;  %v6790_v32 = vld [vmem:[#allocation2 + $0xa8] sm:$0xff]  }
 0x1c4   : > { %v8044_v10 = vpop.f32.mrb[35].mxu0  ;;  %8619 = vst [vmem:[#allocation28_spill] sm:$0xff] %v8067_v34  ;;  %6572 = vmatmul.mubr.bf16.gmra.mrb[124].mxu0 %v5822_v62  ;;  %v5824_v25 = vcombine.low %v3560_v44, %v3563_v5  ;;  %v8082_v7 = vadd.f32 %v6213_v4, %v7842_v22  ;;  %v8085_v62 = vadd.f32 %v6216_v45, %v7862_v40  ;;  %v3247_v61 = vshrl.u32 %v2925_v47, 16  ;;  %v3433_v33 = vld [vmem:[#allocation2 + $0xa4] sm:$0x1] }
 0x1c5   : > { %v3245_v36 = vsel %vm7176_vm9, %v3240_v12, %v3244_v31  ;;  %6575 = vmatprep.mubr.bf16.mxu0 %v5823_v11  ;;  %v3250_v37 = vshll.u32 %v2925_v47, 16  ;;  %v3256_v60 = vshll.u32 %v2926_v1, 16  ;;  %v3260_v16 = vshrl.u32 %v2926_v1, 16 }
 0x1c6   : > { %8620 = vst [vmem:[#allocation29_spill] sm:$0xff] %v8082_v7  ;;  %8621 = vst [vmem:[#allocation30_spill] sm:$0xff] %v8085_v62  ;;  %v8089_v50 = vpop.f32.mrb[40].mxu1  ;;  %v5795_v40 = vcombine.low %v3235_v18, %v3245_v36  ;;  %v3249_v53 = vrot.slane %v3247_v61, 4  ;;  %v3266_v58 = vshll.u32 %v2927_v52, 16  ;;  %v5809_v4 = vrot.slane %v3428_v54, 9 }
 0x1c7   : > { %v8095_v44 = vpop.f32.mrb[41].mxu1  ;;  %v3252_v62 = vrot.slane %v3250_v37, 5  ;;  %v3258_v31 = vrot.slane %v3256_v60, 5  ;;  %v3262_v12 = vrot.slane %v3260_v16, 4  ;;  %v3566_v11 = vrot.slane %v3429_v28, 5 }
 0x1c8   : > { %v8099_v5 = vpop.f32.mrb[42].mxu1  ;;  %5017 = vmatprep.mubr.bf16.mxu1 %v5795_v40  ;;  %v3268_v1 = vrot.slane %v3266_v58, 5  ;;  %v3569_v7 = vrot.slane %v3430_v2, 5  ;;  %v5810_v21 = vrot.slane %v3431_v15, 9  ;;  %v3573_v34 = vrot.slane %v3432_v56, 5  ;;  %v6791_v56 = vld [vmem:[#allocation2 + $0xb4] sm:$0xff]  }
 0x1c9   : > { %v8101_v47 = vpop.f32.mrb[43].mxu1  ;;  %5018 = vmatmul.mubr.bf16.gmra.mrb[128].mxu1 %v6790_v32  ;;  %v3253_v18 = vor.u32 %v3252_v62, %v3249_v53  ;;  %v3263_v61 = vor.u32 %v3262_v12, %v3258_v31  ;;  %v3567_v52 = vsel %vm7332_vm14, %v5809_v4, %v3566_v11  ;;  %v3568_v54 = vrot.slane %v3566_v11, 4  ;;  %v2928_v16 = vld [vmem:[#allocation2 + $0xc0] sm:$0xf]  ;;  %v2929_v40 = vld [vmem:[#allocation2 + $0xc4] sm:$0xf] }
 0x1ca   : > { %v3574_v36 = vsel %vm7332_vm14, %v5810_v21, %v3573_v34  ;;  %v3575_v37 = vrot.slane %v3573_v34, 4  ;;  %v3576_v60 = vrot.slane %v3433_v33, 5  ;;  %v8109_v28 = vadd.f32 %v7974_v63, %v7948_v9  ;;  %v2930_v34 = vld [vmem:[#allocation2 + $0xc8] sm:$0x1]  ;;  %v3436_v4 = vld [vmem:[#allocation2 + $0xb0] sm:$0x1] }
 0x1cb   : > { %v3254_v2 = vrot.slane %v3253_v18, 4  ;;  %v3264_v15 = vrot.slane %v3263_v61, 4  ;;  %v3570_v62 = vsel %vm7332_vm14, %v3568_v54, %v3569_v7  ;;  %v6219_v32 = vadd.f32 %v7976_v57, %v7950_v14  ;;  %v3435_v7 = vld [vmem:[#allocation2 + $0xac] sm:$0xf]  ;;  %v3437_v12 = vld [vmem:[#allocation2 + $0xb4] sm:$0xe] }
 0x1cc   : > { %v8077_v48 = vpop.f32.mrb[36].mxu0  ;;  %6576 = vmatmul.mubr.bf16.gmra.mrb[128].mxu0 %v5824_v25  ;;  %v5825_v53 = vcombine.low %v3567_v52, %v3570_v62  ;;  %v3577_v21 = vsel %vm7332_vm14, %v3575_v37, %v3576_v60  ;;  %v8119_v9 = vadd.f32 %v7996_v51, %v7987_v19  ;;  %v6222_v63 = vadd.f32 %v7998_v20, %v7989_v29  ;;  %v3434_v25 = vld [vmem:[#allocation2 + $0xa8] sm:$0xe]  ;;  %v3438_v19 = vld [vmem:[#allocation2 + $0xb8] sm:$0xf] }
 0x1cd   : > { %v8087_v27 = vpop.f32.mrb[37].mxu0  ;;  %v3259_v33 = vsel %vm7176_vm9, %v3254_v2, %v3258_v31  ;;  %v3269_v14 = vsel %vm7176_vm9, %v3264_v15, %v3268_v1  ;;  %v5826_v57 = vcombine.low %v3574_v36, %v3577_v21  ;;  %v8128_v58 = vadd.f32 %v6219_v32, %v7899_v6  ;;  %v3439_v18 = vld [vmem:[#allocation2 + $0xbc] sm:$0x1] }
 0x1ce   : > { %v8093_v22 = vpop.f32.mrb[38].mxu0  ;;  %v5796_v51 = vcombine.low %v3259_v33, %v3269_v14  ;;  %6579 = vmatprep.mubr.bf16.mxu0 %v5825_v53  ;;  %v8131_v29 = vadd.f32 %v6222_v63, %v7909_v41  ;;  %v3271_v20 = vshrl.u32 %v2928_v16, 16  ;;  %v3274_v11 = vshll.u32 %v2928_v16, 16 }
 0x1cf   : > { %v8097_v45 = vpop.f32.mrb[39].mxu0  ;;  %v3280_v31 = vshll.u32 %v2929_v40, 16  ;;  %v3284_v52 = vshrl.u32 %v2929_v40, 16  ;;  %v3290_v1 = vshll.u32 %v2930_v34, 16  ;;  %v5811_v54 = vrot.slane %v3434_v25, 9 }
 0x1d0   : > { %8622 = vst [vmem:[#allocation31_spill] sm:$0xff] %v8131_v29  ;;  %5025 = vmatprep.mubr.bf16.mxu1 %v5796_v51  ;;  %v3273_v6 = vrot.slane %v3271_v20, 4  ;;  %v3276_v37 = vrot.slane %v3274_v11, 5  ;;  %v3580_v60 = vrot.slane %v3435_v7, 5  ;;  %v3583_v2 = vrot.slane %v3436_v4, 5 }
 0x1d1   : > { %v8133_v61 = vpop.f32.mrb[44].mxu1  ;;  %5026 = vmatmul.mubr.bf16.gmra.mrb[132].mxu1 %v6791_v56  ;;  %v3282_v62 = vrot.slane %v3280_v31, 5  ;;  %v3286_v32 = vrot.slane %v3284_v52, 4  ;;  %v3292_v16 = vrot.slane %v3290_v1, 5  ;;  %v5812_v53 = vrot.slane %v3437_v12, 9 }
 0x1d2   : > { %v8135_v36 = vpop.f32.mrb[45].mxu1  ;;  %v3277_v63 = vor.u32 %v3276_v37, %v3273_v6  ;;  %v3581_v34 = vsel %vm7332_vm14, %v5811_v54, %v3580_v60  ;;  %v3582_v25 = vrot.slane %v3580_v60, 4  ;;  %v3587_v7 = vrot.slane %v3438_v19, 5  ;;  %v2931_v51 = vld [vmem:[#allocation2 + $0xcc] sm:$0xf] }
 0x1d3   : > { %v8139_v41 = vpop.f32.mrb[46].mxu1  ;;  %v3287_v14 = vor.u32 %v3286_v32, %v3282_v62  ;;  %v3590_v4 = vrot.slane %v3439_v18, 5  ;;  %v8151_v56 = vadd.f32 %v8024_v0, %v8018_v17  ;;  %v6225_v12 = vadd.f32 %v8008_v55, %v8002_v3  ;;  %v2932_v52 = vld [vmem:[#allocation2 + $0xd0] sm:$0xf]  ;;  %v2933_v18 = vld [vmem:[#allocation2 + $0xd4] sm:$0x1] }
 0x1d4   : > { %v8143_v40 = vpop.f32.mrb[47].mxu1  ;;  %6580 = vmatmul.mubr.bf16.gmra.mrb[132].mxu0 %v5826_v57  ;;  %v3278_v11 = vrot.slane %v3277_v63, 4  ;;  %v3584_v31 = vsel %vm7332_vm14, %v3582_v25, %v3583_v2  ;;  %v3588_v19 = vsel %vm7332_vm14, %v5812_v53, %v3587_v7  ;;  %v3589_v57 = vrot.slane %v3587_v7, 4  ;;  %v3440_v55 = vld [vmem:[#allocation2 + $0xc0] sm:$0xe] }
 0x1d5   : > { %v3288_v1 = vrot.slane %v3287_v14, 4  ;;  %v5827_v54 = vcombine.low %v3581_v34, %v3584_v31  ;;  %v8162_v17 = vadd.f32 %v6225_v12, %v7956_v43  ;;  %v8166_v3 = vadd.f32 %v8044_v10, %v8035_v59  ;;  %v3441_v0 = vld [vmem:[#allocation2 + $0xc4] sm:$0xf]  ;;  %v3442_v32 = vld [vmem:[#allocation2 + $0xc8] sm:$0x1] }
 0x1d6   : > { %v3283_v6 = vsel %vm7176_vm9, %v3278_v11, %v3282_v62  ;;  %v3591_v37 = vsel %vm7332_vm14, %v3589_v57, %v3590_v4  ;;  %v6228_v60 = vadd.f32 %v8037_v42, %v8026_v39  ;;  %v3295_v2 = vshrl.u32 %v2931_v51, 16  ;;  %v3443_v53 = vld [vmem:[#allocation2 + $0xcc] sm:$0xe]  ;;  %v6792_v10 = vld [vmem:[#allocation2 + $0xc0] sm:$0xff]   ;;  %v3444_v62 = vld [vmem:[#allocation2 + $0xd0] sm:$0xf] }
 0x1d7   : > { %v8137_v15 = vpop.f32.mrb[40].mxu0  ;;  %8623 = vst [vmem:[#allocation32_spill] sm:$0xff] %v8162_v17  ;;  %v3293_v59 = vsel %vm7176_vm9, %v3288_v1, %v3292_v16  ;;  %6583 = vmatprep.mubr.bf16.mxu0 %v5827_v54  ;;  %v5828_v63 = vcombine.low %v3588_v19, %v3591_v37  ;;  %v3298_v34 = vshll.u32 %v2931_v51, 16  ;;  %v3304_v25 = vshll.u32 %v2932_v52, 16  ;;  %v3445_v12 = vld [vmem:[#allocation2 + $0xd4] sm:$0x1] }
 0x1d8   : > { %v8141_v21 = vpop.f32.mrb[41].mxu0  ;;  %v5797_v14 = vcombine.low %v3283_v6, %v3293_v59  ;;  %v8179_v4 = vadd.f32 %v6228_v60, %v7970_v23  ;;  %v3297_v39 = vrot.slane %v3295_v2, 4  ;;  %v3308_v42 = vshrl.u32 %v2932_v52, 16 }
 0x1d9   : > { %v8147_v33 = vpop.f32.mrb[42].mxu0  ;;  %v8174_v43 = vpop.f32.mrb[48].mxu1  ;;  %v3300_v31 = vrot.slane %v3298_v34, 5  ;;  %v3306_v57 = vrot.slane %v3304_v25, 5  ;;  %v3314_v17 = vshll.u32 %v2933_v18, 16  ;;  %v5813_v29 = vrot.slane %v3440_v55, 9 }
 0x1da   : > { %v8155_v20 = vpop.f32.mrb[43].mxu0  ;;  %v6248_v7 = vpop.f32.mrb[49].mxu1  ;;  %5033 = vmatprep.mubr.bf16.mxu1 %v5797_v14  ;;  %v3310_v1 = vrot.slane %v3308_v42, 4  ;;  %v3594_v19 = vrot.slane %v3441_v0, 5  ;;  %v3597_v51 = vrot.slane %v3442_v32, 5  ;;  %v5814_v54 = vrot.slane %v3443_v53, 9 }
 0x1db   : > { %v6250_v11 = vpop.f32.mrb[50].mxu1  ;;  %5034 = vmatmul.mubr.bf16.gmra.mrb[136].mxu1 %v6792_v10  ;;  %v3301_v6 = vor.u32 %v3300_v31, %v3297_v39  ;;  %v3316_v37 = vrot.slane %v3314_v17, 5  ;;  %v3601_v23 = vrot.slane %v3444_v62, 5  ;;  %v3604_v60 = vrot.slane %v3445_v12, 5  ;;  %v6793_v39 = vld [vmem:[#allocation2 + $0xcc] sm:$0xff]  }
 0x1dc   : > { %v6251_v16 = vpop.f32.mrb[51].mxu1  ;;  %6584 = vmatmul.mubr.bf16.gmra.mrb[136].mxu0 %v5828_v63  ;;  %v3311_v2 = vor.u32 %v3310_v1, %v3306_v57  ;;  %v3595_v52 = vsel %vm7332_vm14, %v5813_v29, %v3594_v19  ;;  %v3596_v59 = vrot.slane %v3594_v19, 4  ;;  %v6143_v18 = vadd.f32 %v8087_v27, %v8077_v48 }
 0x1dd   : > { %v3302_v55 = vrot.slane %v3301_v6, 4  ;;  %v3602_v0 = vsel %vm7332_vm14, %v5814_v54, %v3601_v23  ;;  %v3603_v32 = vrot.slane %v3601_v23, 4  ;;  %v6231_v53 = vadd.f32 %v8059_v24, %v8049_v26 }
 0x1de   : > { %v3312_v17 = vrot.slane %v3311_v2, 4  ;;  %v3598_v63 = vsel %vm7332_vm14, %v3596_v59, %v3597_v51  ;;  %v6146_v29 = vadd.f32 %v8097_v45, %v8093_v22  ;;  %v6234_v34 = vadd.f32 %v8079_v35, %v8071_v46 }
 0x1df   : > { %v3307_v27 = vsel %vm7176_vm9, %v3302_v55, %v3306_v57  ;;  %v5829_v25 = vcombine.low %v3595_v52, %v3598_v63  ;;  %v3605_v62 = vsel %vm7332_vm14, %v3603_v32, %v3604_v60  ;;  %v8200_v26 = vadd.f32 %v6231_v53, %v8006_v8 }
 0x1e0   : > { %v3317_v14 = vsel %vm7176_vm9, %v3312_v17, %v3316_v37  ;;  %v5830_v22 = vcombine.low %v3602_v0, %v3605_v62  ;;  %v8205_v45 = vadd.f32 %v6234_v34, %v8022_v13  ;;  %v6149_v46 = vadd.f32 %v8141_v21, %v8137_v15 }
 0x1e1   : > { %v5798_v42 = vcombine.low %v3307_v27, %v3317_v14  ;;  %6587 = vmatprep.mubr.bf16.mxu0 %v5829_v25  ;;  %v6237_v30 = vadd.f32 %v8095_v44, %v8089_v50  ;;  %v6152_v8 = vadd.f32 %v8155_v20, %v8147_v33  ;;  %v6240_v38 = vadd.f32 %v8101_v47, %v8099_v5  ;;  %v8624_v50 = vld [vmem:[#allocation28_spill] sm:$0xff]  ;;  %v8628_v25 = vld [vmem:[#allocation27_spill] sm:$0xff] }
 0x1e2   : > { %v6153_v10 = vpop.f32.mrb[44].mxu0  ;;  %v6243_v13 = vadd.f32 %v8135_v36, %v8133_v61  ;;  %v6246_v15 = vadd.f32 %v8143_v40, %v8139_v41  ;;  %v6249_v33 = vadd.f32 %v6248_v7, %v8174_v43  ;;  %v6252_v36 = vadd.f32 %v6251_v16, %v6250_v11  ;;  %v8625_v11 = vld [vmem:[#allocation24_spill] sm:$0xff] }
 0x1e3   : > { %v6154_v48 = vpop.f32.mrb[45].mxu0  ;;  %5041 = vmatprep.mubr.bf16.mxu1 %v5798_v42  ;;  %v8220_v57 = vadd.f32 %v6237_v30, %v8055_v49  ;;  %v8223_v44 = vadd.f32 %v6240_v38, %v8624_v50 }
 0x1e4   : > { %v6156_v24 = vpop.f32.mrb[46].mxu0  ;;  %v6155_v12 = vadd.f32 %v6154_v48, %v6153_v10  ;;  %6588 = vmatmul.mubr.bf16.gmra.mrb[140].mxu0 %v5830_v22  ;;  %5042 = vmatmul.mubr.bf16.gmra.mrb[140].mxu1 %v6793_v39  ;;  %v8227_v47 = vadd.f32 %v6243_v13, %v8109_v28  ;;  %v8230_v61 = vadd.f32 %v6246_v15, %v8119_v9 }
 0x1e5   : > { %v6157_v35 = vpop.f32.mrb[47].mxu0  ;;  %v6253_v21 = vpop.f32.mrb[52].mxu1  ;;  %v8233_v49 = vadd.f32 %v6249_v33, %v8151_v56  ;;  %v8236_v51 = vadd.f32 %v6252_v36, %v8166_v3  ;;  %v8626_v56 = vld [vmem:[#allocation25_spill] sm:$0xff]  ;;  %v8630_v36 = vld [vmem:[#allocation30_spill] sm:$0xff] }
 0x1e6   : > { %v6158_v31 = vadd.f32 %v6157_v35, %v6156_v24  ;;  %v6254_v5 = vpop.f32.mrb[53].mxu1 }
 0x1e7   : > { %v6255_v41 = vadd.f32 %v6254_v5, %v6253_v21  ;;  %v6256_v40 = vpop.f32.mrb[54].mxu1  ;;  %v8629_v21 = vld [vmem:[#allocation29_spill] sm:$0xff] }
 0x1e8   : > { %v6257_v1 = vpop.f32.mrb[55].mxu1 }
 0x1e9   : > { %v8238_v43 = vadd.f32 %v6255_v41, %v6143_v18  ;;  %v6258_v7 = vadd.f32 %v6257_v1, %v6256_v40 }
 0x1ea   : > { %v6311_v20 = vpop.f32.mrb[48].mxu0 }
 0x1eb   : > { %v6312_v19 = vpop.f32.mrb[49].mxu0  ;;  %v8240_v9 = vadd.f32 %v6258_v7, %v6146_v29  ;;  %v8627_v29 = vld [vmem:[#allocation26_spill] sm:$0xff] }
 0x1ec   : > { %v6313_v28 = vadd.f32 %v6312_v19, %v6311_v20  ;;  %v6314_v54 = vpop.f32.mrb[50].mxu0 }
 0x1ed   : > { %v6315_v6 = vpop.f32.mrb[51].mxu0  ;;  %v6259_v23 = vpop.f32.mrb[56].mxu1 }
 0x1ee   : > { %v8243_v16 = vadd.f32 %v6313_v28, %v8625_v11  ;;  %v6316_v37 = vadd.f32 %v6315_v6, %v6314_v54  ;;  %v6260_v2 = vpop.f32.mrb[57].mxu1  ;;  %v8631_v28 = vld [vmem:[#allocation16_spill] sm:$0xff] }
 0x1ef   : > { %v6261_v52 = vadd.f32 %v6260_v2, %v6259_v23  ;;  %v6262_v3 = vpop.f32.mrb[58].mxu1  ;;  %v8632_v23 = vld [vmem:[#allocation17_spill] sm:$0xff] }
 0x1f0   : > { %v8246_v60 = vadd.f32 %v6316_v37, %v8626_v56  ;;  %v6263_v18 = vpop.f32.mrb[59].mxu1 }
 0x1f1   : > { %v8248_v0 = vadd.f32 %v6261_v52, %v6149_v46  ;;  %v6264_v32 = vadd.f32 %v6263_v18, %v6262_v3  ;;  %v8633_v3 = vld [vmem:[#allocation31_spill] sm:$0xff] }
 0x1f2   : > { %v6317_v59 = vpop.f32.mrb[52].mxu0 }
 0x1f3   : > { %v6318_v55 = vpop.f32.mrb[53].mxu0  ;;  %v8250_v63 = vadd.f32 %v6264_v32, %v6152_v8 }
 0x1f4   : > { %v6319_v53 = vadd.f32 %v6318_v55, %v6317_v59  ;;  %v6320_v10 = vpop.f32.mrb[54].mxu0 }
 0x1f5   : > { %v6321_v17 = vpop.f32.mrb[55].mxu0  ;;  %v6265_v27 = vpop.f32.mrb[60].mxu1 }
 0x1f6   : > { %v8253_v34 = vadd.f32 %v6319_v53, %v8627_v29  ;;  %v6322_v48 = vadd.f32 %v6321_v17, %v6320_v10  ;;  %v6266_v24 = vpop.f32.mrb[61].mxu1 }
 0x1f7   : > { %v6267_v14 = vadd.f32 %v6266_v24, %v6265_v27  ;;  %v6268_v39 = vpop.f32.mrb[62].mxu1 }
 0x1f8   : > { %v8256_v62 = vadd.f32 %v6322_v48, %v8628_v25  ;;  %v6269_v46 = vpop.f32.mrb[63].mxu1  ;;  %v8634_v25 = vld [vmem:[#allocation18_spill] sm:$0xff] }
 0x1f9   : > { %v8258_v42 = vadd.f32 %v6267_v14, %v6155_v12  ;;  %v6270_v30 = vadd.f32 %v6269_v46, %v6268_v39 }
 0x1fa   : > { %v6323_v22 = vpop.f32.mrb[56].mxu0 }
 0x1fb   : > { %v6324_v35 = vpop.f32.mrb[57].mxu0  ;;  %v8260_v15 = vadd.f32 %v6270_v30, %v6158_v31 }
 0x1fc   : > { %v6325_v38 = vadd.f32 %v6324_v35, %v6323_v22  ;;  %v6326_v8 = vpop.f32.mrb[58].mxu0  ;;  %v8636_v35 = vld [vmem:[#allocation19_spill] sm:$0xff] }
 0x1fd   : > { %v6327_v13 = vpop.f32.mrb[59].mxu0  ;;  %v6271_v5 = vpop.f32.mrb[64].mxu1 }
 0x1fe   : > { %v8263_v50 = vadd.f32 %v6325_v38, %v8629_v21  ;;  %v6328_v33 = vadd.f32 %v6327_v13, %v6326_v8  ;;  %v6272_v40 = vpop.f32.mrb[65].mxu1 }
 0x1ff   : > { %v6273_v20 = vadd.f32 %v6272_v40, %v6271_v5  ;;  %v6274_v1 = vpop.f32.mrb[66].mxu1 }
 0x200   : > { %v8266_v41 = vadd.f32 %v6328_v33, %v8630_v36  ;;  %v6275_v12 = vpop.f32.mrb[67].mxu1 }
 0x201   : > { %v8269_v54 = vadd.f32 %v6273_v20, %v8631_v28  ;;  %v6276_v6 = vadd.f32 %v6275_v12, %v6274_v1 }
 0x202   : > { %v6329_v19 = vpop.f32.mrb[60].mxu0 }
 0x203   : > { %v6330_v7 = vpop.f32.mrb[61].mxu0  ;;  %v8272_v56 = vadd.f32 %v6276_v6, %v8632_v23 }
 0x204   : > { %v6331_v31 = vadd.f32 %v6330_v7, %v6329_v19  ;;  %v6332_v11 = vpop.f32.mrb[62].mxu0  ;;  %v8637_v19 = vld [vmem:[#allocation20_spill] sm:$0xff] }
 0x205   : > { %v6333_v37 = vpop.f32.mrb[63].mxu0  ;;  %v6277_v18 = vpop.f32.mrb[68].mxu1 }
 0x206   : > { %v8275_v2 = vadd.f32 %v6331_v31, %v8128_v58  ;;  %v6334_v52 = vadd.f32 %v6333_v37, %v6332_v11  ;;  %v6278_v55 = vpop.f32.mrb[69].mxu1  ;;  %v8635_v58 = vld [vmem:[#allocation32_spill] sm:$0xff] }
 0x207   : > { %v6279_v53 = vadd.f32 %v6278_v55, %v6277_v18  ;;  %v6280_v10 = vpop.f32.mrb[70].mxu1 }
 0x208   : > { %v8278_v59 = vadd.f32 %v6334_v52, %v8633_v3  ;;  %v6281_v29 = vpop.f32.mrb[71].mxu1 }
 0x209   : > { %v8281_v24 = vadd.f32 %v6279_v53, %v8634_v25  ;;  %v6282_v14 = vadd.f32 %v6281_v29, %v6280_v10 }
 0x20a   : > { %v6335_v32 = vpop.f32.mrb[64].mxu0 }
 0x20b   : > { %v6336_v17 = vpop.f32.mrb[65].mxu0  ;;  %v8287_v30 = vadd.f32 %v6282_v14, %v8636_v35 }
 0x20c   : > { %v6337_v48 = vadd.f32 %v6336_v17, %v6335_v32  ;;  %v6338_v27 = vpop.f32.mrb[66].mxu0 }
 0x20d   : > { %v6339_v39 = vpop.f32.mrb[67].mxu0  ;;  %v6283_v8 = vpop.f32.mrb[72].mxu1 }
 0x20e   : > { %v8284_v22 = vadd.f32 %v6337_v48, %v8635_v58  ;;  %v6340_v46 = vadd.f32 %v6339_v39, %v6338_v27  ;;  %v6284_v13 = vpop.f32.mrb[73].mxu1 }
 0x20f   : > { %v6285_v33 = vadd.f32 %v6284_v13, %v6283_v8  ;;  %v6286_v5 = vpop.f32.mrb[74].mxu1 }
 0x210   : > { %v8290_v38 = vadd.f32 %v6340_v46, %v8179_v4  ;;  %v6287_v40 = vpop.f32.mrb[75].mxu1  ;;  %v8638_v4 = vld [vmem:[#allocation21_spill] sm:$0xff] }
 0x211   : > { %v8293_v12 = vadd.f32 %v6285_v33, %v8637_v19  ;;  %v6288_v7 = vadd.f32 %v6287_v40, %v6286_v5 }
 0x212   : > { %v6341_v21 = vpop.f32.mrb[68].mxu0 }
 0x213   : > { %v6342_v36 = vpop.f32.mrb[69].mxu0  ;;  %v8299_v11 = vadd.f32 %v6288_v7, %v8638_v4 }
 0x214   : > { %v6343_v20 = vadd.f32 %v6342_v36, %v6341_v21  ;;  %v6344_v1 = vpop.f32.mrb[70].mxu0  ;;  %v8640_v21 = vld [vmem:[#allocation23_spill] sm:$0xff] }
 0x215   : > { %v6345_v28 = vpop.f32.mrb[71].mxu0 }
 0x216   : > { %v8296_v6 = vadd.f32 %v6343_v20, %v8200_v26  ;;  %v6346_v31 = vadd.f32 %v6345_v28, %v6344_v1 }
 0x218   : > { %v8302_v37 = vadd.f32 %v6346_v31, %v8205_v45 }
 0x21a   : > { %v6347_v23 = vpop.f32.mrb[72].mxu0 }
 0x21b   : > { %v6348_v52 = vpop.f32.mrb[73].mxu0 }
 0x21c   : > { %v6349_v3 = vadd.f32 %v6348_v52, %v6347_v23  ;;  %v6350_v18 = vpop.f32.mrb[74].mxu0 }
 0x21d   : > { %v6351_v55 = vpop.f32.mrb[75].mxu0 }
 0x21e   : > { %v8305_v32 = vadd.f32 %v6349_v3, %v8220_v57  ;;  %v6352_v53 = vadd.f32 %v6351_v55, %v6350_v18  ;;  %v6289_v17 = vpop.f32.mrb[76].mxu1  ;;  %v8639_v57 = vld [vmem:[#allocation22_spill] sm:$0xff] }
 0x21f   : > { %v6290_v48 = vpop.f32.mrb[77].mxu1 }
 0x220   : > { %v8308_v10 = vadd.f32 %v6352_v53, %v8223_v44  ;;  %v6291_v45 = vadd.f32 %v6290_v48, %v6289_v17  ;;  %v6292_v14 = vpop.f32.mrb[78].mxu1 }
 0x221   : > { %v6293_v46 = vpop.f32.mrb[79].mxu1 }
 0x222   : > { %v6353_v26 = vpop.f32.mrb[76].mxu0  ;;  %v8314_v8 = vadd.f32 %v6291_v45, %v8639_v57  ;;  %v6294_v13 = vadd.f32 %v6293_v46, %v6292_v14 }
 0x223   : > { %v6354_v29 = vpop.f32.mrb[77].mxu0 }
 0x224   : > { %v6355_v27 = vadd.f32 %v6354_v29, %v6353_v26  ;;  %v6356_v25 = vpop.f32.mrb[78].mxu0  ;;  %v8320_v33 = vadd.f32 %v6294_v13, %v8640_v21 }
 0x225   : > { %v6357_v39 = vpop.f32.mrb[79].mxu0 }
 0x226   : > { %v8311_v58 = vadd.f32 %v6355_v27, %v8227_v47  ;;  %v6358_v35 = vadd.f32 %v6357_v39, %v6356_v25  ;;  %v6423_v5 = vpop.f32.mrb[80].mxu1 }
 0x227   : > { %v6424_v40 = vpop.f32.mrb[81].mxu1 }
 0x228   : > { %v8317_v44 = vadd.f32 %v6358_v35, %v8230_v61  ;;  %v6425_v1 = vadd.f32 %v6424_v40, %v6423_v5  ;;  %v6426_v19 = vpop.f32.mrb[82].mxu1 }
 0x229   : > { %v6427_v28 = vpop.f32.mrb[83].mxu1 }
 0x22a   : > { %v6359_v36 = vpop.f32.mrb[80].mxu0  ;;  %v6428_v4 = vadd.f32 %v6427_v28, %v6426_v19  ;;  %v8323_v23 = vadd.f32 %v6425_v1, %v8243_v16 }
 0x22b   : > { %v6360_v20 = vpop.f32.mrb[81].mxu0 }
 0x22c   : > { %v6361_v47 = vadd.f32 %v6360_v20, %v6359_v36  ;;  %v6362_v7 = vpop.f32.mrb[82].mxu0  ;;  %v8329_v3 = vadd.f32 %v6428_v4, %v8246_v60 }
 0x22d   : > { %v6363_v31 = vpop.f32.mrb[83].mxu0 }
 0x22e   : > { %v8326_v61 = vadd.f32 %v6361_v47, %v8233_v49  ;;  %v6364_v52 = vadd.f32 %v6363_v31, %v6362_v7  ;;  %v6429_v55 = vpop.f32.mrb[84].mxu1 }
 0x22f   : > { %v6430_v53 = vpop.f32.mrb[85].mxu1 }
 0x230   : > { %v8332_v18 = vadd.f32 %v6364_v52, %v8236_v51  ;;  %v6431_v26 = vadd.f32 %v6430_v53, %v6429_v55  ;;  %v6432_v17 = vpop.f32.mrb[86].mxu1 }
 0x231   : > { %v6433_v48 = vpop.f32.mrb[87].mxu1 }
 0x232   : > { %v6365_v29 = vpop.f32.mrb[84].mxu0  ;;  %v6434_v25 = vadd.f32 %v6433_v48, %v6432_v17  ;;  %v8335_v16 = vadd.f32 %v6431_v26, %v8253_v34 }
 0x233   : > { %v6366_v27 = vpop.f32.mrb[85].mxu0 }
 0x234   : > { %v6367_v49 = vadd.f32 %v6366_v27, %v6365_v29  ;;  %v6368_v45 = vpop.f32.mrb[86].mxu0  ;;  %v8338_v60 = vadd.f32 %v6434_v25, %v8256_v62 }
 0x235   : > { %v6369_v14 = vpop.f32.mrb[87].mxu0 }
 0x236   : > { %v8341_v51 = vadd.f32 %v6367_v49, %v8238_v43  ;;  %v6370_v39 = vadd.f32 %v6369_v14, %v6368_v45 }
 0x238   : > { %v8344_v46 = vadd.f32 %v6370_v39, %v8240_v9  ;;  %v6435_v35 = vpop.f32.mrb[88].mxu1 }
 0x239   : > { %v6436_v57 = vpop.f32.mrb[89].mxu1 }
 0x23a   : > { %v6437_v13 = vadd.f32 %v6436_v57, %v6435_v35  ;;  %v6438_v21 = vpop.f32.mrb[90].mxu1 }
 0x23b   : > { %v6371_v5 = vpop.f32.mrb[88].mxu0  ;;  %v6439_v34 = vpop.f32.mrb[91].mxu1 }
 0x23c   : > { %v6372_v36 = vpop.f32.mrb[89].mxu0  ;;  %v6440_v40 = vadd.f32 %v6439_v34, %v6438_v21  ;;  %v8347_v20 = vadd.f32 %v6437_v13, %v8263_v50 }
 0x23d   : > { %v6373_v62 = vadd.f32 %v6372_v36, %v6371_v5  ;;  %v6374_v1 = vpop.f32.mrb[90].mxu0 }
 0x23e   : > { %v6375_v19 = vpop.f32.mrb[91].mxu0  ;;  %v8350_v43 = vadd.f32 %v6440_v40, %v8266_v41 }
 0x23f   : > { %v8353_v9 = vadd.f32 %v6373_v62, %v8248_v0  ;;  %v6376_v47 = vadd.f32 %v6375_v19, %v6374_v1 }
 0x241   : > { %v8356_v7 = vadd.f32 %v6376_v47, %v8250_v63 }
 0x242   : > { %v6441_v28 = vpop.f32.mrb[92].mxu1 }
 0x243   : > { %v6442_v31 = vpop.f32.mrb[93].mxu1 }
 0x244   : > { %v6443_v4 = vadd.f32 %v6442_v31, %v6441_v28  ;;  %v6444_v52 = vpop.f32.mrb[94].mxu1 }
 0x245   : > { %v6377_v55 = vpop.f32.mrb[92].mxu0  ;;  %v6445_v50 = vpop.f32.mrb[95].mxu1 }
 0x246   : > { %v6378_v53 = vpop.f32.mrb[93].mxu0  ;;  %v6446_v26 = vadd.f32 %v6445_v50, %v6444_v52  ;;  %v8359_v17 = vadd.f32 %v6443_v4, %v8275_v2 }
 0x247   : > { %v6379_v41 = vadd.f32 %v6378_v53, %v6377_v55  ;;  %v6380_v29 = vpop.f32.mrb[94].mxu0 }
 0x248   : > { %v6381_v48 = vpop.f32.mrb[95].mxu0  ;;  %v8362_v0 = vadd.f32 %v6446_v26, %v8278_v59 }
 0x249   : > { %v8365_v63 = vadd.f32 %v6379_v41, %v8258_v42  ;;  %v6382_v27 = vadd.f32 %v6381_v48, %v6380_v29 }
 0x24b   : > { %v8368_v25 = vadd.f32 %v6382_v27, %v8260_v15 }
 0x24d   : > { %v6447_v49 = vpop.f32.mrb[96].mxu1 }
 0x24e   : > { %v6448_v45 = vpop.f32.mrb[97].mxu1 }
 0x24f   : > { %v6383_v14 = vpop.f32.mrb[96].mxu0  ;;  %v6449_v39 = vadd.f32 %v6448_v45, %v6447_v49  ;;  %v6450_v35 = vpop.f32.mrb[98].mxu1 }
 0x250   : > { %v6384_v2 = vpop.f32.mrb[97].mxu0  ;;  %v6451_v57 = vpop.f32.mrb[99].mxu1 }
 0x251   : > { %v6385_v13 = vadd.f32 %v6384_v2, %v6383_v14  ;;  %v6386_v21 = vpop.f32.mrb[98].mxu0  ;;  %v6452_v5 = vadd.f32 %v6451_v57, %v6450_v35  ;;  %v8371_v59 = vadd.f32 %v6449_v39, %v8284_v22 }
 0x252   : > { %v6387_v34 = vpop.f32.mrb[99].mxu0 }
 0x253   : > { %v8374_v42 = vadd.f32 %v6385_v13, %v8269_v54  ;;  %v6388_v36 = vadd.f32 %v6387_v34, %v6386_v21  ;;  %v8377_v15 = vadd.f32 %v6452_v5, %v8290_v38 }
 0x255   : > { %v8380_v40 = vadd.f32 %v6388_v36, %v8272_v56 }
 0x257   : > { %v6453_v62 = vpop.f32.mrb[100].mxu1 }
 0x258   : > { %v6454_v1 = vpop.f32.mrb[101].mxu1 }
 0x259   : > { %v6455_v19 = vadd.f32 %v6454_v1, %v6453_v62  ;;  %v6456_v47 = vpop.f32.mrb[102].mxu1 }
 0x25a   : > { %v6389_v28 = vpop.f32.mrb[100].mxu0  ;;  %v6457_v31 = vpop.f32.mrb[103].mxu1 }
 0x25b   : > { %v6390_v4 = vpop.f32.mrb[101].mxu0  ;;  %v6458_v22 = vadd.f32 %v6457_v31, %v6456_v47  ;;  %v8383_v52 = vadd.f32 %v6455_v19, %v8296_v6 }
 0x25c   : > { %v6391_v54 = vadd.f32 %v6390_v4, %v6389_v28  ;;  %v6392_v55 = vpop.f32.mrb[102].mxu0 }
 0x25d   : > { %v6393_v50 = vpop.f32.mrb[103].mxu0  ;;  %v8386_v38 = vadd.f32 %v6458_v22, %v8302_v37 }
 0x25e   : > { %v8389_v56 = vadd.f32 %v6391_v54, %v8281_v24  ;;  %v6394_v53 = vadd.f32 %v6393_v50, %v6392_v55 }
 0x260   : > { %v8392_v26 = vadd.f32 %v6394_v53, %v8287_v30 }
 0x262   : > { %v6459_v41 = vpop.f32.mrb[104].mxu1 }
 0x263   : > { %v6460_v29 = vpop.f32.mrb[105].mxu1 }
 0x264   : > { %v6395_v48 = vpop.f32.mrb[104].mxu0  ;;  %v6461_v27 = vadd.f32 %v6460_v29, %v6459_v41  ;;  %v6462_v49 = vpop.f32.mrb[106].mxu1 }
 0x265   : > { %v6396_v6 = vpop.f32.mrb[105].mxu0  ;;  %v6463_v45 = vpop.f32.mrb[107].mxu1 }
 0x266   : > { %v6397_v14 = vadd.f32 %v6396_v6, %v6395_v48  ;;  %v6398_v39 = vpop.f32.mrb[106].mxu0  ;;  %v6464_v35 = vadd.f32 %v6463_v45, %v6462_v49  ;;  %v8395_v37 = vadd.f32 %v6461_v27, %v8305_v32 }
 0x267   : > { %v6399_v2 = vpop.f32.mrb[107].mxu0 }
 0x268   : > { %v8398_v24 = vadd.f32 %v6397_v14, %v8293_v12  ;;  %v6400_v57 = vadd.f32 %v6399_v2, %v6398_v39  ;;  %v8401_v30 = vadd.f32 %v6464_v35, %v8308_v10 }
 0x26a   : > { %v8404_v13 = vadd.f32 %v6400_v57, %v8299_v11 }
 0x26d   : > { %v6465_v21 = vpop.f32.mrb[108].mxu1 }
 0x26e   : > { %v6466_v5 = vpop.f32.mrb[109].mxu1 }
 0x26f   : > { %v6467_v34 = vadd.f32 %v6466_v5, %v6465_v21  ;;  %v6468_v36 = vpop.f32.mrb[110].mxu1 }
 0x270   : > { %v6469_v62 = vpop.f32.mrb[111].mxu1 }
 0x271   : > { %v6470_v1 = vadd.f32 %v6469_v62, %v6468_v36  ;;  %v8407_v32 = vadd.f32 %v6467_v34, %v8311_v58 }
 0x273   : > { %v8410_v19 = vadd.f32 %v6470_v1, %v8317_v44 }
 0x275   : > { %v6471_v12 = vpop.f32.mrb[112].mxu1 }
 0x276   : > { %v6472_v28 = vpop.f32.mrb[113].mxu1 }
 0x277   : > { %v6401_v47 = vpop.f32.mrb[108].mxu0  ;;  %v6473_v31 = vadd.f32 %v6472_v28, %v6471_v12  ;;  %v6474_v4 = vpop.f32.mrb[114].mxu1 }
 0x278   : > { %v6402_v10 = vpop.f32.mrb[109].mxu0  ;;  %v6475_v54 = vpop.f32.mrb[115].mxu1 }
 0x279   : > { %v6403_v11 = vadd.f32 %v6402_v10, %v6401_v47  ;;  %v6404_v22 = vpop.f32.mrb[110].mxu0  ;;  %v6476_v50 = vadd.f32 %v6475_v54, %v6474_v4  ;;  %v8413_v53 = vadd.f32 %v6473_v31, %v8326_v61 }
 0x27a   : > { %v6405_v55 = vpop.f32.mrb[111].mxu0 }
 0x27b   : > { %v8416_v58 = vadd.f32 %v6403_v11, %v8314_v8  ;;  %v6406_v41 = vadd.f32 %v6405_v55, %v6404_v22  ;;  %v8419_v44 = vadd.f32 %v6476_v50, %v8332_v18 }
 0x27d   : > { %v8422_v29 = vadd.f32 %v6406_v41, %v8320_v33 }
 0x27f   : > { %v6561_v48 = vpop.f32.mrb[112].mxu0 }
 0x280   : > { %v5093_v27 = vadd.f32 %v6561_v48, %v8335_v16  ;;  %v5084_v49 = vpop.f32.mrb[113].mxu0  ;;  %v6477_v61 = vpop.f32.mrb[116].mxu1 }
 0x281   : > { %v5085_v6 = vadd.f32 %v5084_v49, %v8323_v23  ;;  %v6562_v45 = vpop.f32.mrb[114].mxu0  ;;  %v6478_v39 = vpop.f32.mrb[117].mxu1 }
 0x282   : > { %v5096_v14 = vadd.f32 %v6562_v45, %v8338_v60  ;;  %v5087_v8 = vpop.f32.mrb[115].mxu0  ;;  %v6479_v18 = vadd.f32 %v6478_v39, %v6477_v61  ;;  %v6480_v2 = vpop.f32.mrb[118].mxu1  ;;  %v5410_v60 = vmul.f32 %v5093_v27, %v5093_v27 }
 0x283   : > { %v5088_v35 = vadd.f32 %v5087_v8, %v8329_v3  ;;  %v5408_v57 = vmul.f32 %v5085_v6, %v5085_v6  ;;  %v6481_v21 = vpop.f32.mrb[119].mxu1 }
 0x284   : > { %v5984_v33 = vpack.c.bf16 %v5096_v14, %v5093_v27  ;;  %v6482_v36 = vadd.f32 %v6481_v21, %v6480_v2  ;;  %v8434_v23 = vadd.f32 %v6479_v18, %v8341_v51  ;;  %v5411_v10 = vmul.f32 %v5096_v14, %v5096_v14 }
 0x285   : > { %v5979_v5 = vpack.c.bf16 %v5088_v35, %v5085_v6  ;;  %v5371_v34 = vadd.f32 %v5088_v35, %v5085_v6  ;;  %v5409_v16 = vmul.f32 %v5088_v35, %v5088_v35 }
 0x286   : > { %6056 = vst [vmem:[%s8430_s22 + $0x8] sm:$0xff] %v5984_v33   ;;  %v8438_v12 = vadd.f32 %v6482_v36, %v8344_v46 }
 0x287   : > { %5980 = vst [vmem:[%s8430_s22] sm:$0xff] %v5979_v5   ;;  %v5372_v3 = vadd.f32 %v5371_v34, %v5093_v27  ;;  %v5440_v62 = vadd.f32 %v5409_v16, %v5408_v57  ;;  %v6565_v1 = vpop.f32.mrb[116].mxu0 }
 0x288   : > { %v5109_v47 = vadd.f32 %v6565_v1, %v8359_v17  ;;  %v5100_v28 = vpop.f32.mrb[117].mxu0  ;;  %v6483_v54 = vpop.f32.mrb[120].mxu1 }
 0x289   : > { %v5441_v31 = vadd.f32 %v5440_v62, %v5410_v60  ;;  %v5101_v4 = vadd.f32 %v5100_v28, %v8347_v20  ;;  %v5373_v11 = vadd.f32 %v5372_v3, %v5096_v14  ;;  %v6566_v22 = vpop.f32.mrb[118].mxu0  ;;  %v6484_v50 = vpop.f32.mrb[121].mxu1 }
 0x28a   : > { %v5112_v51 = vadd.f32 %v6566_v22, %v8362_v0  ;;  %v5103_v55 = vpop.f32.mrb[119].mxu0  ;;  %v6486_v17 = vpop.f32.mrb[122].mxu1  ;;  %v6485_v6 = vadd.f32 %v6484_v50, %v6483_v54  ;;  %v5414_v35 = vmul.f32 %v5109_v47, %v5109_v47 }
 0x28b   : > { %v5374_v41 = vadd.f32 %v5373_v11, %v5101_v4  ;;  %v5412_v48 = vmul.f32 %v5101_v4, %v5101_v4  ;;  %v5442_v46 = vadd.f32 %v5441_v31, %v5411_v10  ;;  %v5104_v27 = vadd.f32 %v5103_v55, %v8350_v43  ;;  %v6487_v45 = vpop.f32.mrb[123].mxu1 }
 0x28c   : > { %v5994_v49 = vpack.c.bf16 %v5112_v51, %v5109_v47  ;;  %v6488_v39 = vadd.f32 %v6487_v45, %v6486_v17  ;;  %v8446_v0 = vadd.f32 %v6485_v6, %v8353_v9  ;;  %v5415_v5 = vmul.f32 %v5112_v51, %v5112_v51 }
 0x28d   : > { %v5443_v61 = vadd.f32 %v5442_v46, %v5412_v48  ;;  %v5989_v20 = vpack.c.bf16 %v5104_v27, %v5101_v4  ;;  %v5375_v14 = vadd.f32 %v5374_v41, %v5104_v27  ;;  %v5413_v8 = vmul.f32 %v5104_v27, %v5104_v27 }
 0x28e   : > { %6058 = vst [vmem:[%s8430_s22 + $0x18] sm:$0xff] %v5994_v49   ;;  %v8451_v21 = vadd.f32 %v6488_v39, %v8356_v7 }
 0x28f   : > { %6057 = vst [vmem:[%s8430_s22 + $0x10] sm:$0xff] %v5989_v20   ;;  %v5376_v18 = vadd.f32 %v5375_v14, %v5109_v47  ;;  %v5444_v2 = vadd.f32 %v5443_v61, %v5413_v8  ;;  %v6569_v57 = vpop.f32.mrb[120].mxu0 }
 0x290   : > { %v5125_v43 = vadd.f32 %v6569_v57, %v8383_v52  ;;  %v5116_v33 = vpop.f32.mrb[121].mxu0 }
 0x291   : > { %v5445_v34 = vadd.f32 %v5444_v2, %v5414_v35  ;;  %v5117_v16 = vadd.f32 %v5116_v33, %v8371_v59  ;;  %v5377_v36 = vadd.f32 %v5376_v18, %v5112_v51  ;;  %v6570_v60 = vpop.f32.mrb[122].mxu0 }
 0x292   : > { %v5128_v9 = vadd.f32 %v6570_v60, %v8386_v38  ;;  %v5119_v3 = vpop.f32.mrb[123].mxu0  ;;  %v6489_v28 = vpop.f32.mrb[124].mxu1  ;;  %v5418_v55 = vmul.f32 %v5125_v43, %v5125_v43 }
 0x293   : > { %v5378_v62 = vadd.f32 %v5377_v36, %v5117_v16  ;;  %v5416_v1 = vmul.f32 %v5117_v16, %v5117_v16  ;;  %v5446_v47 = vadd.f32 %v5445_v34, %v5415_v5  ;;  %v5120_v52 = vadd.f32 %v5119_v3, %v8377_v15  ;;  %v6490_v7 = vpop.f32.mrb[125].mxu1 }
 0x294   : > { %v6004_v10 = vpack.c.bf16 %v5128_v9, %v5125_v43  ;;  %v6492_v59 = vpop.f32.mrb[126].mxu1  ;;  %v6491_v54 = vadd.f32 %v6490_v7, %v6489_v28  ;;  %v5419_v46 = vmul.f32 %v5128_v9, %v5128_v9 }
 0x295   : > { %v5447_v31 = vadd.f32 %v5446_v47, %v5416_v1  ;;  %v5999_v4 = vpack.c.bf16 %v5120_v52, %v5117_v16  ;;  %v5379_v11 = vadd.f32 %v5378_v62, %v5120_v52  ;;  %v5417_v22 = vmul.f32 %v5120_v52, %v5120_v52  ;;  %v6493_v51 = vpop.f32.mrb[127].mxu1 }
 0x296   : > { %6060 = vst [vmem:[%s8430_s22 + $0x28] sm:$0xff] %v6004_v10   ;;  %v6494_v48 = vadd.f32 %v6493_v51, %v6492_v59  ;;  %v5012_v17 = vadd.f32 %v6491_v54, %v8365_v63 }
 0x297   : > { %6059 = vst [vmem:[%s8430_s22 + $0x20] sm:$0xff] %v5999_v4   ;;  %v5380_v38 = vadd.f32 %v5379_v11, %v5125_v43  ;;  %v5448_v50 = vadd.f32 %v5447_v31, %v5417_v22  ;;  %v6573_v41 = vpop.f32.mrb[124].mxu0 }
 0x298   : > { %v5141_v15 = vadd.f32 %v6573_v41, %v8407_v32  ;;  %v5132_v27 = vpop.f32.mrb[125].mxu0  ;;  %v8462_v20 = vadd.f32 %v6494_v48, %v8368_v25 }
 0x299   : > { %v5449_v49 = vadd.f32 %v5448_v50, %v5418_v55  ;;  %v5133_v6 = vadd.f32 %v5132_v27, %v8395_v37  ;;  %v5381_v45 = vadd.f32 %v5380_v38, %v5128_v9  ;;  %v6574_v61 = vpop.f32.mrb[126].mxu0 }
 0x29a   : > { %v5144_v14 = vadd.f32 %v6574_v61, %v8410_v19  ;;  %v5135_v8 = vpop.f32.mrb[127].mxu0  ;;  %v5422_v34 = vmul.f32 %v5141_v15, %v5141_v15 }
 0x29b   : > { %v5382_v39 = vadd.f32 %v5381_v45, %v5133_v6  ;;  %v5420_v35 = vmul.f32 %v5133_v6, %v5133_v6  ;;  %v5450_v18 = vadd.f32 %v5449_v49, %v5419_v46  ;;  %v5136_v32 = vadd.f32 %v5135_v8, %v8401_v30 }
 0x29c   : > { %v6014_v2 = vpack.c.bf16 %v5144_v14, %v5141_v15  ;;  %v6495_v33 = vpop.f32.mrb[128].mxu1  ;;  %v5423_v9 = vmul.f32 %v5144_v14, %v5144_v14 }
 0x29d   : > { %v5451_v63 = vadd.f32 %v5450_v18, %v5420_v35  ;;  %v6009_v57 = vpack.c.bf16 %v5136_v32, %v5133_v6  ;;  %v5383_v43 = vadd.f32 %v5382_v39, %v5136_v32  ;;  %v5421_v37 = vmul.f32 %v5136_v32, %v5136_v32  ;;  %v6496_v5 = vpop.f32.mrb[129].mxu1 }
 0x29e   : > { %6062 = vst [vmem:[%s8430_s22 + $0x38] sm:$0xff] %v6014_v2   ;;  %v6497_v19 = vadd.f32 %v6496_v5, %v6495_v33  ;;  %v6498_v60 = vpop.f32.mrb[130].mxu1 }
 0x29f   : > { %6061 = vst [vmem:[%s8430_s22 + $0x30] sm:$0xff] %v6009_v57   ;;  %v5384_v25 = vadd.f32 %v5383_v43, %v5141_v15  ;;  %v5452_v16 = vadd.f32 %v5451_v63, %v5421_v37  ;;  %v6577_v36 = vpop.f32.mrb[128].mxu0  ;;  %v6499_v30 = vpop.f32.mrb[131].mxu1 }
 0x2a0   : > { %v5157_v3 = vadd.f32 %v6577_v36, %v8434_v23  ;;  %v5148_v62 = vpop.f32.mrb[129].mxu0  ;;  %v6500_v10 = vadd.f32 %v6499_v30, %v6498_v60  ;;  %v5020_v4 = vadd.f32 %v6497_v19, %v8374_v42 }
 0x2a1   : > { %v5453_v1 = vadd.f32 %v5452_v16, %v5422_v34  ;;  %v5149_v47 = vadd.f32 %v5148_v62, %v8413_v53  ;;  %v5385_v52 = vadd.f32 %v5384_v25, %v5144_v14  ;;  %v6578_v28 = vpop.f32.mrb[130].mxu0 }
 0x2a2   : > { %v5160_v7 = vadd.f32 %v6578_v28, %v8438_v12  ;;  %v5151_v31 = vpop.f32.mrb[131].mxu0  ;;  %v5023_v51 = vadd.f32 %v6500_v10, %v8380_v40  ;;  %v5426_v12 = vmul.f32 %v5157_v3, %v5157_v3 }
 0x2a3   : > { %v5386_v11 = vadd.f32 %v5385_v52, %v5149_v47  ;;  %v5424_v22 = vmul.f32 %v5149_v47, %v5149_v47  ;;  %v5454_v59 = vadd.f32 %v5453_v1, %v5423_v9  ;;  %v5152_v23 = vadd.f32 %v5151_v31, %v8419_v44 }
 0x2a4   : > { %v6024_v54 = vpack.c.bf16 %v5160_v7, %v5157_v3  ;;  %v6501_v41 = vpop.f32.mrb[132].mxu1  ;;  %v5427_v6 = vmul.f32 %v5160_v7, %v5160_v7 }
 0x2a5   : > { %v5455_v55 = vadd.f32 %v5454_v59, %v5424_v22  ;;  %v6019_v53 = vpack.c.bf16 %v5152_v23, %v5149_v47  ;;  %v5387_v38 = vadd.f32 %v5386_v11, %v5152_v23  ;;  %v5425_v50 = vmul.f32 %v5152_v23, %v5152_v23  ;;  %v6502_v48 = vpop.f32.mrb[133].mxu1 }
 0x2a6   : > { %6064 = vst [vmem:[%s8430_s22 + $0x48] sm:$0xff] %v6024_v54   ;;  %v6503_v27 = vadd.f32 %v6502_v48, %v6501_v41  ;;  %v6504_v49 = vpop.f32.mrb[134].mxu1 }
 0x2a7   : > { %6063 = vst [vmem:[%s8430_s22 + $0x40] sm:$0xff] %v6019_v53   ;;  %v5388_v46 = vadd.f32 %v5387_v38, %v5157_v3  ;;  %v5456_v15 = vadd.f32 %v5455_v55, %v5425_v50  ;;  %v6581_v42 = vpop.f32.mrb[132].mxu0  ;;  %v6505_v61 = vpop.f32.mrb[135].mxu1 }
 0x2a8   : > { %v5173_v45 = vadd.f32 %v6581_v42, %v5012_v17  ;;  %v5164_v44 = vpop.f32.mrb[133].mxu0  ;;  %v6506_v35 = vadd.f32 %v6505_v61, %v6504_v49  ;;  %v5028_v2 = vadd.f32 %v6503_v27, %v8389_v56 }
 0x2a9   : > { %v5457_v14 = vadd.f32 %v5456_v15, %v5426_v12  ;;  %v5165_v40 = vadd.f32 %v5164_v44, %v8446_v0  ;;  %v5389_v8 = vadd.f32 %v5388_v46, %v5160_v7  ;;  %v6582_v39 = vpop.f32.mrb[134].mxu0 }
 0x2aa   : > { %v5176_v18 = vadd.f32 %v6582_v39, %v8462_v20  ;;  %v5167_v32 = vpop.f32.mrb[135].mxu0  ;;  %v5031_v33 = vadd.f32 %v6506_v35, %v8392_v26  ;;  %v5430_v16 = vmul.f32 %v5173_v45, %v5173_v45 }
 0x2ab   : > { %v5390_v63 = vadd.f32 %v5389_v8, %v5165_v40  ;;  %v5428_v57 = vmul.f32 %v5165_v40, %v5165_v40  ;;  %v5458_v43 = vadd.f32 %v5457_v14, %v5427_v6  ;;  %v5168_v17 = vadd.f32 %v5167_v32, %v8451_v21 }
 0x2ac   : > { %v6034_v37 = vpack.c.bf16 %v5176_v18, %v5173_v45  ;;  %v5431_v56 = vmul.f32 %v5176_v18, %v5176_v18 }
 0x2ad   : > { %v5459_v5 = vadd.f32 %v5458_v43, %v5428_v57  ;;  %v6029_v0 = vpack.c.bf16 %v5168_v17, %v5165_v40  ;;  %v5391_v34 = vadd.f32 %v5390_v63, %v5168_v17  ;;  %v5429_v25 = vmul.f32 %v5168_v17, %v5168_v17 }
 0x2ae   : > { %6066 = vst [vmem:[%s8430_s22 + $0x58] sm:$0xff] %v6034_v37   ;;  %v6507_v19 = vpop.f32.mrb[136].mxu1 }
 0x2af   : > { %6065 = vst [vmem:[%s8430_s22 + $0x50] sm:$0xff] %v6029_v0   ;;  %v5392_v36 = vadd.f32 %v5391_v34, %v5173_v45  ;;  %v5460_v20 = vadd.f32 %v5459_v5, %v5429_v25  ;;  %v6585_v60 = vpop.f32.mrb[136].mxu0  ;;  %v6508_v3 = vpop.f32.mrb[137].mxu1 }
 0x2b0   : > { %v5189_v9 = vadd.f32 %v6585_v60, %v5028_v2  ;;  %v5180_v62 = vpop.f32.mrb[137].mxu0  ;;  %v6509_v21 = vadd.f32 %v6508_v3, %v6507_v19  ;;  %v6510_v47 = vpop.f32.mrb[138].mxu1 }
 0x2b1   : > { %v5461_v30 = vadd.f32 %v5460_v20, %v5430_v16  ;;  %v5181_v1 = vadd.f32 %v5180_v62, %v5020_v4  ;;  %v5393_v26 = vadd.f32 %v5392_v36, %v5176_v18  ;;  %v6586_v52 = vpop.f32.mrb[138].mxu0  ;;  %v6511_v10 = vpop.f32.mrb[139].mxu1 }
 0x2b2   : > { %v5192_v28 = vadd.f32 %v6586_v52, %v5031_v33  ;;  %v5183_v7 = vpop.f32.mrb[139].mxu0  ;;  %v6512_v59 = vadd.f32 %v6511_v10, %v6510_v47  ;;  %v5036_v55 = vadd.f32 %v6509_v21, %v8398_v24  ;;  %v5434_v12 = vmul.f32 %v5189_v9, %v5189_v9 }
 0x2b3   : > { %v5394_v31 = vadd.f32 %v5393_v26, %v5181_v1  ;;  %v5432_v11 = vmul.f32 %v5181_v1, %v5181_v1  ;;  %v5462_v22 = vadd.f32 %v5461_v30, %v5431_v56  ;;  %v5184_v54 = vadd.f32 %v5183_v7, %v5023_v51 }
 0x2b4   : > { %v6044_v23 = vpack.c.bf16 %v5192_v28, %v5189_v9  ;;  %v5039_v38 = vadd.f32 %v6512_v59, %v8404_v13  ;;  %v5435_v51 = vmul.f32 %v5192_v28, %v5192_v28 }
 0x2b5   : > { %v5463_v53 = vadd.f32 %v5462_v22, %v5432_v11  ;;  %v6039_v4 = vpack.c.bf16 %v5184_v54, %v5181_v1  ;;  %v5395_v50 = vadd.f32 %v5394_v31, %v5184_v54  ;;  %v5433_v41 = vmul.f32 %v5184_v54, %v5184_v54 }
 0x2b6   : > { %6068 = vst [vmem:[%s8430_s22 + $0x68] sm:$0xff] %v6044_v23  }
 0x2b7   : > { %v6589_v48 = vpop.f32.mrb[140].mxu0  ;;  %6067 = vst [vmem:[%s8430_s22 + $0x60] sm:$0xff] %v6039_v4   ;;  %v5396_v46 = vadd.f32 %v5395_v50, %v5189_v9  ;;  %v5464_v15 = vadd.f32 %v5463_v53, %v5433_v41  ;;  %v6513_v42 = vpop.f32.mrb[140].mxu1 }
 0x2b8   : > { %v5196_v27 = vpop.f32.mrb[141].mxu0  ;;  %v6514_v49 = vpop.f32.mrb[141].mxu1 }
 0x2b9   : > { %v5197_v6 = vadd.f32 %v5196_v27, %v5036_v55  ;;  %v6590_v45 = vpop.f32.mrb[142].mxu0  ;;  %v5465_v44 = vadd.f32 %v5464_v15, %v5434_v12  ;;  %v6515_v24 = vadd.f32 %v6514_v49, %v6513_v42  ;;  %v5397_v61 = vadd.f32 %v5396_v46, %v5192_v28  ;;  %v6516_v13 = vpop.f32.mrb[142].mxu1 }
 0x2ba   : > { %v5199_v14 = vpop.f32.mrb[143].mxu0  ;;  %v6517_v8 = vpop.f32.mrb[143].mxu1 }
 0x2bb   : > { %v5436_v40 = vmul.f32 %v5197_v6, %v5197_v6  ;;  %v5200_v39 = vadd.f32 %v5199_v14, %v5039_v38  ;;  %v5044_v35 = vadd.f32 %v6515_v24, %v8416_v58  ;;  %v5398_v18 = vadd.f32 %v5397_v61, %v5197_v6 }
 0x2bc   : > { %v5466_v32 = vadd.f32 %v5465_v44, %v5435_v51  ;;  %v6518_v2 = vadd.f32 %v6517_v8, %v6516_v13 }
 0x2bd   : > { %v6049_v63 = vpack.c.bf16 %v5200_v39, %v5197_v6  ;;  %v5437_v57 = vmul.f32 %v5200_v39, %v5200_v39  ;;  %v5205_v43 = vadd.f32 %v6589_v48, %v5044_v35  ;;  %v5399_v33 = vadd.f32 %v5398_v18, %v5200_v39 }
 0x2be   : > { %v5467_v17 = vadd.f32 %v5466_v32, %v5436_v40  ;;  %v5047_v37 = vadd.f32 %v6518_v2, %v8422_v29 }
 0x2bf   : > { %6069 = vst [vmem:[%s8430_s22 + $0x70] sm:$0xff] %v6049_v63   ;;  %v5438_v5 = vmul.f32 %v5205_v43, %v5205_v43  ;;  %v5400_v34 = vadd.f32 %v5399_v33, %v5205_v43 }
 0x2c0   : > { %v5208_v0 = vadd.f32 %v6590_v45, %v5047_v37  ;;  %v5468_v58 = vadd.f32 %v5467_v17, %v5437_v57 }
 0x2c2   : > { %v6054_v29 = vpack.c.bf16 %v5208_v0, %v5205_v43  ;;  %v5439_v25 = vmul.f32 %v5208_v0, %v5208_v0  ;;  %v5401_v16 = vadd.f32 %v5400_v34, %v5208_v0  ;;  %v5469_v36 = vadd.f32 %v5468_v58, %v5438_v5 }
 0x2c4   : > { %6070 = vst [vmem:[%s8430_s22 + $0x78] sm:$0xff] %v6054_v29   ;;  %v5402_v20 = vrot.slane %v5401_v16, 4  ;;  %v5470_v19 = vadd.f32 %v5469_v36, %v5439_v25 }
 0x2c5   : > { %6865 = shalt.err (!%p6862_p7)
}
 0x2c6   : > { %s6866_s8 = scalar_lea.hbm %s8495_s29, 2048  ;;  %s6870_s13 = scalar_lea.hbm %s8578_s4, 4096 }
 0x2c7   : > { %p6867_p9 = scmp.ne.s32.totalorder %s8495_s29, %s6866_s8  ;;  %p6871_p5 = scmp.lt.u32.totalorder %s8495_s29, %s8578_s4 }
 0x2c8   : > { %p6872_p11 = scmp.lt.u32.totalorder %s6870_s13, %s6866_s8  ;;  %p6874_p4 = scmp.lt.u32.totalorder %s6866_s8, %s8495_s29 }
 0x2c9   : > { %p6868_p1 = pnand %p6867_p9, %p7089_p12 }
 0x2ca   : > { %p6873_p2 = por %p6872_p11, %p6871_p5 }
 0x2cb   : > { %p6869_p0 = pneg %p6868_p1 }
 0x2cc   : > { %p6875_p6 = por %p6874_p4, %p6873_p2 }
 0x2ce   : > { %p6876_p8 = pnand %p6875_p6, %p6869_p0 }
 0x2d0   : > { %6879 = shalt.err (!%p6876_p8)
}
 0x2d1   : > { %s6962_s22 = smov 64   ;;  %s6963_s24 = smov 4   ;;  %v5403_v60 = vadd.f32 %v5402_v20, %v5401_v16  ;;  %v5471_v56 = vrot.slane %v5470_v19, 4 }
 0x2d2   : > { %6613 = dma.vmem_to_hbm [thread:$0]  (%p7089_p12), %s8497_s14, 2048, %s8495_s29, %s5481_s11, %s6962_s22, %s6962_s22, %s6963_s24  }
 0x2d3   : > { %v5404_v9 = vrot.slane %v5403_v60, 2  ;;  %v5472_v3 = vadd.f32 %v5471_v56, %v5470_v19  ;;  %s5638_s15 = sshll.u32 %s7140_s12, 1  ;;  %s5939_s10 = sshll.u32 %s7016_s20, 5 }
 0x2d4   : > { %s268_s17 = scalar_lea.vmem [#allocation10], %s5638_s15  ;;  %s8529_s14 = scalar_lea.hbm %s8579_s5, %s5939_s10 }
 0x2d5   : > { %v5405_v62 = vadd.f32 %v5404_v9, %v5403_v60  ;;  %v5473_v30 = vrot.slane %v5472_v3, 2  ;;  %s5515_s6 = sshll.u32 %s268_s17, 4  ;;  %s5486_s29 = scalar_lea.sflag [#allocation11], %s7140_s12  ;;  %s8531_s6 = int_to_ptr.vmem [resolvable:$true] %s5515_s6 }
 0x2d6   : > { %s6880_s11 = scalar_lea.vmem %s8531_s6, 32  ;;  %s6964_s20 = smov [#allocation10]  }
 0x2d7   : > { %v5406_v21 = vrot.slane %v5405_v62, 1  ;;  %v5474_v1 = vadd.f32 %v5473_v30, %v5472_v3  ;;  %p6881_p10 = scmp.ne.s32.totalorder %s8531_s6, %s6880_s11  ;;  %s6884_s8 = sshll.u32 %s6964_s20, 4  ;;  %s6885_s8 = int_to_ptr.vmem [resolvable:$false] %s6884_s8 }
 0x2d8   : > { %s6886_s9 = scalar_lea.vmem %s6885_s8, 64  ;;  %p6887_p7 = scmp.lt.s32.totalorder %s8531_s6, %s6885_s8 }
 0x2d9   : > { %v5475_v26 = vrot.slane %v5474_v1, 1  ;;  %v5407_v47 = vadd.f32 %v5406_v21, %v5405_v62  ;;  %p6882_p13 = pnand %p6881_p10, %p7089_p12  ;;  %p6888_p9 = scmp.lt.s32.totalorder %s6886_s9, %s6880_s11 }
 0x2db   : > { %v5476_v52 = vadd.f32 %v5475_v26, %v5474_v1  ;;  %p6883_p3 = pneg %p6882_p13  ;;  %p6889_p1 = por %p6888_p9, %p6887_p7 }
 0x2dd   : > { %v5478_v28 = vsel %vm310_vm0, %v5407_v47, %v5476_v52  ;;  %p6890_p0 = pnand %p6889_p1, %p6883_p3 }
 0x2de   : > { %5479 = vst [vmem:[%s268_s17] sm:$0x3] %v5478_v28 }
 0x2df   : > { %6893 = shalt.err (!%p6890_p0)
}
 0x2e0   : > { %s6894_s12 = scalar_lea.hbm %s8529_s14, 32  ;;  %s6898_s16 = scalar_lea.hbm %s8579_s5, 64 }
 0x2e1   : > { %p6895_p5 = scmp.ne.s32.totalorder %s8529_s14, %s6894_s12  ;;  %p6899_p4 = scmp.lt.u32.totalorder %s8529_s14, %s8579_s5 }
 0x2e2   : > { %p6900_p6 = scmp.lt.u32.totalorder %s6898_s16, %s6894_s12  ;;  %p6902_p10 = scmp.lt.u32.totalorder %s6894_s12, %s8529_s14 }
 0x2e3   : > { %p6896_p11 = pnand %p6895_p5, %p7089_p12 }
 0x2e4   : > { %p6901_p8 = por %p6900_p6, %p6899_p4 }
 0x2e5   : > { %p6897_p2 = pneg %p6896_p11 }
 0x2e6   : > { %p6903_p13 = por %p6902_p10, %p6901_p8 }
 0x2e8   : > { %p6904_p3 = pnand %p6903_p13, %p6897_p2 }
 0x2ea   : > { %6907 = shalt.err (!%p6904_p3)
}
 0x2eb   : > { %6614 = dma.vmem_to_hbm [thread:$0]  (%p7089_p12), %s8531_s6, 32, %s8529_s14, %s5486_s29  }
 0x2ec PF: > { %s5527_s24 = sand.u32 1, %s6942_s1   ;;  %p8641_p7 = scmp.ne.s32.totalorder %s8584_s23, 0 }
 0x2ed   : > { %p8642_p9 = scmp.ge.s32.totalorder %s6954_s19, 2  ;;  %s5528_s15 = scalar_lea.sflag [#allocation6], %s5527_s24 }
 0x2ef   : > { %p6626_p1 = pnand %p8642_p9, %p8641_p7 }
 0x2f1   : > { %6933 = dma.done.wait (!%p6626_p1), %s5528_s15, 2048  }
 0x2f2   : > { %6935 = vsyncadd (!%p6626_p1), %s5528_s15, 4294965248  ;;  %s5537_s10 = scalar_lea.sflag [#allocation11], %s5527_s24 }
 0x2f3   : > { %6937 = dma.done.wait (!%p6626_p1), %s5537_s10, 32  }
 0x2f4   : > { %6939 = vsyncadd (!%p6626_p1), %s5537_s10, 4294967264  ;;  %p23_p12 = scmp.ge.s32.totalorder %s7051_s28, 4   ;;  %s8643_s1 = smov %s6946_s18 }
 0x2f5   : > { %s8644_s18 = smov %s6950_s2  ;;  %s8645_s2 = smov %s7085_s21 }
 0x2f6   : > { %s8646_s19 = smov %s7051_s28  ;;  %25 = sbr.rel (!%p23_p12) target bundleno = 8 (0x8), region = 105 }
 0x2fd   :  { %5542 = vsyncpa [#allocation5], 1 }
 0x2fe   :  { %5544 = vsyncpa [#allocation5 + $0x1], 1 }
 0x2ff   :  { %5545 = vsyncpa [#allocation8], 1 }
 0x300   :  { %5546 = vsyncpa [#allocation6], 1 }
 0x301   :  { %5548 = vsyncpa [#allocation6 + $0x1], 1 }
 0x302   :  { %5549 = vsyncpa [#allocation11], 1 }
 0x303   :  { %5551 = vsyncpa [#allocation11 + $0x1], 1 }

</bundles_post_ra>
